<compile_context>
chip_gen: v6e
topology: v6e:2x2x1
jax: 0.10.0
libtpu: 0.0.40
codegen_flags: <defaults>
</compile_context>

<pallas_src>
import math
import jax
import jax.numpy as jnp
from jax.experimental import pallas as pl
from jax.experimental.pallas import tpu as pltpu

# Module constants (as in mini_gpt_final.py)
N_EMBED = 384
N_HEAD = 6
HEAD_DIM = N_EMBED // N_HEAD
LN_EPS = 1e-5  # torch.nn.LayerNorm default


def _layernorm(x, gamma, beta):
    # f32 statistics, biased variance (matches torch.nn.LayerNorm).
    mean = jnp.mean(x, axis=-1, keepdims=True)
    var = jnp.mean((x - mean) ** 2, axis=-1, keepdims=True)
    return (x - mean) * jax.lax.rsqrt(var + LN_EPS) * gamma + beta


def block_kernel(x_ref,
                 ln1_g_ref, ln1_b_ref,
                 w_qkv_ref,
                 w_attnproj_ref, b_attnproj_ref,
                 w_fc_ref, b_fc_ref,
                 w_mlpproj_ref, b_mlpproj_ref,
                 o_ref):
    Bb, T, C = x_ref.shape
    # Flatten batch rows into the MXU row dimension for LN / qkv / MLP matmuls.
    x = x_ref[...].reshape(Bb * T, C)                      # (Bb*T, C) f32
    g1 = ln1_g_ref[...]                                    # (1, C) f32
    b1 = ln1_b_ref[...]                                    # (1, C) f32

    # ---------------- attn(ln_1(x)) ----------------
    ln1 = _layernorm(x, g1, b1)                            # f32
    qkv = jnp.dot(ln1.astype(jnp.bfloat16), w_qkv_ref[...],
                  preferred_element_type=jnp.float32)      # (Bb*T, 3C) f32

    scale = 1.0 / math.sqrt(HEAD_DIM)
    row = jax.lax.broadcasted_iota(jnp.int32, (Bb, T, T), 1)
    col = jax.lax.broadcasted_iota(jnp.int32, (Bb, T, T), 2)
    causal = col <= row                                    # tril mask, per sequence

    w_ap = w_attnproj_ref[...]                             # (C, C) bf16

    # Per-head attention, batched over the Bb sequences in the tile.
    # Each head's output is projected by its slice of c_proj's weight and
    # accumulated directly -> no (64-lane) concatenate.
    # TODO(synk): for large T, switch to a query-tiled online-softmax (flash)
    # variant; with the small T used here the full (T, T) scores fit trivially.
    attn_acc = jnp.zeros((Bb * T, C), jnp.float32)
    for h in range(N_HEAD):                                # static unroll, nh=6
        lo = h * HEAD_DIM
        q_h = qkv[:, lo:lo + HEAD_DIM].reshape(Bb, T, HEAD_DIM).astype(jnp.bfloat16)
        k_h = qkv[:, C + lo:C + lo + HEAD_DIM].reshape(Bb, T, HEAD_DIM).astype(jnp.bfloat16)
        v_h = qkv[:, 2 * C + lo:2 * C + lo + HEAD_DIM].reshape(Bb, T, HEAD_DIM).astype(jnp.bfloat16)

        s = jnp.einsum('bqd,bkd->bqk', q_h, k_h,
                       preferred_element_type=jnp.float32) * scale   # (Bb, T, T) f32
        s = jnp.where(causal, s, -jnp.inf)
        # softmax in f32; divide -> EUP approx reciprocal
        m = jnp.max(s, axis=-1, keepdims=True)
        p = jnp.exp(s - m)
        l = jnp.sum(p, axis=-1, keepdims=True)
        p = p * pl.reciprocal(l, approx=True)
        # TODO(synk): attn_dropout / resid_dropout / mlp dropout are identity
        # (inference-mode); training-mode random masks are not generated here.

        out_h = jnp.einsum('bqk,bkd->bqd', p.astype(jnp.bfloat16), v_h,
                           preferred_element_type=jnp.float32)        # (Bb, T, hd)
        attn_acc = attn_acc + jnp.dot(
            out_h.reshape(Bb * T, HEAD_DIM).astype(jnp.bfloat16),
            w_ap[lo:lo + HEAD_DIM, :],
            preferred_element_type=jnp.float32)                       # (Bb*T, C)

    x1 = x + attn_acc + b_attnproj_ref[...]                # residual in f32

    # ---------------- mlpf(ln_1(x)) ----------------
    ln1b = _layernorm(x1, g1, b1)                          # ln_1 again (matches ref)
    h_fc = (jnp.dot(ln1b.astype(jnp.bfloat16), w_fc_ref[...],
                    preferred_element_type=jnp.float32) + b_fc_ref[...])
    h_fc = jnp.maximum(h_fc, 0.0)                          # ReLU, f32
    mlp_out = (jnp.dot(h_fc.astype(jnp.bfloat16), w_mlpproj_ref[...],
                       preferred_element_type=jnp.float32)
               + b_mlpproj_ref[...])

    o_ref[...] = (x1 + mlp_out).reshape(Bb, T, C).astype(o_ref.dtype)


def block_forward(x, params, batch_tile=None):
    B, T, C = x.shape
    assert C == N_EMBED
    (ln1_g, ln1_b, w_qkv, w_ap, b_ap, w_fc, b_fc, w_mp, b_mp) = params

    # Pick the batch tile so each grid step feeds ~256 rows to the MXU
    # (or all of B when B*T is small), and Bb divides B.
    if batch_tile is None:
        bb = max(1, min(B, max(1, 256 // max(T, 1))))
        while B % bb:
            bb -= 1
        batch_tile = bb
    Bb = batch_tile
    grid = (B // Bb,)

    # bf16 weights for the MXU; biases / LN params stay f32.
    w_qkv = w_qkv.astype(jnp.bfloat16)
    w_ap = w_ap.astype(jnp.bfloat16)
    w_fc = w_fc.astype(jnp.bfloat16)
    w_mp = w_mp.astype(jnp.bfloat16)

    def whole(a):
        nd = a.ndim
        return pl.BlockSpec(a.shape, lambda i, _nd=nd: (0,) * _nd)

    return pl.pallas_call(
        block_kernel,
        out_shape=jax.ShapeDtypeStruct((B, T, C), x.dtype),
        grid_spec=pltpu.PrefetchScalarGridSpec(
            num_scalar_prefetch=0,
            grid=grid,
            in_specs=[
                pl.BlockSpec((Bb, T, C), lambda i: (i, 0, 0)),   # x
                whole(ln1_g), whole(ln1_b),                      # ln_1 gamma/beta
                whole(w_qkv),                                    # atten weight^T (bf16)
                whole(w_ap), whole(b_ap),                        # attn c_proj
                whole(w_fc), whole(b_fc),                        # mlp c_fc
                whole(w_mp), whole(b_mp),                        # mlp c_proj
            ],
            out_specs=pl.BlockSpec((Bb, T, C), lambda i: (i, 0, 0)),
        ),
        compiler_params=pltpu.CompilerParams(
            dimension_semantics=("parallel",),
            vmem_limit_bytes=48 * 1024 * 1024,   # < 64 MiB physical on v7x
        ),
    )(x, ln1_g, ln1_b, w_qkv, w_ap, b_ap, w_fc, b_fc, w_mp, b_mp)


def reference_forward(x, params):
    """Pure-JAX f32 reference mirroring the PyTorch forward (dropout=identity)."""
    (ln1_g, ln1_b, w_qkv, w_ap, b_ap, w_fc, b_fc, w_mp, b_mp) = params
    B, T, C = x.shape

    def ln(v):
        return _layernorm(v, ln1_g, ln1_b)

    ln1 = ln(x)
    qkv = ln1 @ w_qkv                                  # (B, T, 3C)
    q, k, v = jnp.split(qkv, 3, axis=-1)
    q = q.reshape(B, T, N_HEAD, HEAD_DIM).transpose(0, 2, 1, 3)
    k = k.reshape(B, T, N_HEAD, HEAD_DIM).transpose(0, 2, 1, 3)
    v = v.reshape(B, T, N_HEAD, HEAD_DIM).transpose(0, 2, 1, 3)
    wei = jnp.einsum("bhqd,bhkd->bhqk", q, k) / math.sqrt(HEAD_DIM)
    mask = jnp.tril(jnp.ones((T, T), bool))
    wei = jnp.where(mask, wei, -jnp.inf)
    wei = jax.nn.softmax(wei, axis=-1)
    out = jnp.einsum("bhqk,bhkd->bhqd", wei, v)
    out = out.transpose(0, 2, 1, 3).reshape(B, T, C)
    attn_out = out @ w_ap + b_ap
    x1 = x + attn_out
    h = jnp.maximum(ln(x1) @ w_fc + b_fc, 0.0)
    return x1 + h @ w_mp + b_mp


def init_params(key, c=N_EMBED):
    ks = jax.random.split(key, 8)
    s = 0.02
    ln1_g = (1.0 + 0.1 * jax.random.normal(ks[0], (1, c))).astype(jnp.float32)
    ln1_b = (0.01 * jax.random.normal(ks[1], (1, c))).astype(jnp.float32)
    # Linear weights stored pre-transposed: y = x @ W_T + b
    w_qkv = (s * jax.random.normal(ks[2], (c, 3 * c))).astype(jnp.float32)
    w_ap = (s * jax.random.normal(ks[3], (c, c))).astype(jnp.float32)
    b_ap = (s * jax.random.normal(ks[4], (1, c))).astype(jnp.float32)
    w_fc = (s * jax.random.normal(ks[5], (c, 4 * c))).astype(jnp.float32)
    b_fc = (s * jax.random.normal(ks[6], (1, 4 * c))).astype(jnp.float32)
    w_mp = (s * jax.random.normal(ks[7], (4 * c, c))).astype(jnp.float32)
    b_mp = jnp.zeros((1, c), jnp.float32)
    return (ln1_g, ln1_b, w_qkv, w_ap, b_ap, w_fc, b_fc, w_mp, b_mp)


if __name__ == "__main__":
    key = jax.random.PRNGKey(0)
    k_x, k_p = jax.random.split(key)
    B, T = 2, 8                                  # small shapes; C fixed by module
    x = jax.random.normal(k_x, (B, T, N_EMBED), dtype=jnp.float32)
    params = init_params(k_p)

    out = block_forward(x, params)
    out = jax.block_until_ready(out)

    ref = reference_forward(x, params)
    assert out.shape == (B, T, N_EMBED)
    # bf16 MXU operands (f32 accumulation) => relaxed but meaningful tolerance.
    assert jnp.allclose(out, ref, rtol=3e-2, atol=3e-2), (
        float(jnp.max(jnp.abs(out - ref))))
    print("KERNEL_OK")
</pallas_src>

<mosaic_0001>
module attributes {stable_mosaic.version = 11 : i64} {
  func.func @block_kernel(%arg0: i32, %arg1: memref<2x8x384xf32, #tpu.memory_space<vmem>>, %arg2: memref<1x384xf32, #tpu.memory_space<vmem>>, %arg3: memref<1x384xf32, #tpu.memory_space<vmem>>, %arg4: memref<384x1152xbf16, #tpu.memory_space<vmem>>, %arg5: memref<384x384xbf16, #tpu.memory_space<vmem>>, %arg6: memref<1x384xf32, #tpu.memory_space<vmem>>, %arg7: memref<384x1536xbf16, #tpu.memory_space<vmem>>, %arg8: memref<1x1536xf32, #tpu.memory_space<vmem>>, %arg9: memref<1536x384xbf16, #tpu.memory_space<vmem>>, %arg10: memref<1x384xf32, #tpu.memory_space<vmem>>, %arg11: memref<2x8x384xf32, #tpu.memory_space<vmem>>) attributes {dimension_semantics = [#tpu.dimension_semantics<parallel>], iteration_bounds = array<i64: 1>, scalar_prefetch = 0 : i64, scratch_operands = 0 : i64, tpu.core_type = #tpu.core_type<tc>, window_params = [{transform_indices = @transform_0, window_bounds = array<i64: 2, 8, 384>}, {pipeline_mode = #tpu.pipeline_mode<synchronous>, transform_indices = @transform_1, window_bounds = array<i64: 1, 384>}, {pipeline_mode = #tpu.pipeline_mode<synchronous>, transform_indices = @transform_2, window_bounds = array<i64: 1, 384>}, {pipeline_mode = #tpu.pipeline_mode<synchronous>, transform_indices = @transform_3, window_bounds = array<i64: 384, 1152>}, {pipeline_mode = #tpu.pipeline_mode<synchronous>, transform_indices = @transform_4, window_bounds = array<i64: 384, 384>}, {pipeline_mode = #tpu.pipeline_mode<synchronous>, transform_indices = @transform_5, window_bounds = array<i64: 1, 384>}, {pipeline_mode = #tpu.pipeline_mode<synchronous>, transform_indices = @transform_6, window_bounds = array<i64: 384, 1536>}, {pipeline_mode = #tpu.pipeline_mode<synchronous>, transform_indices = @transform_7, window_bounds = array<i64: 1, 1536>}, {pipeline_mode = #tpu.pipeline_mode<synchronous>, transform_indices = @transform_8, window_bounds = array<i64: 1536, 384>}, {pipeline_mode = #tpu.pipeline_mode<synchronous>, transform_indices = @transform_9, window_bounds = array<i64: 1, 384>}, {transform_indices = @transform_10, window_bounds = array<i64: 2, 8, 384>}]} {
    %c0 = arith.constant 0 : index
    %c0_0 = arith.constant 0 : index
    %c0_1 = arith.constant 0 : index
    %0 = vector.load %arg1[%c0, %c0_0, %c0_1] : memref<2x8x384xf32, #tpu.memory_space<vmem>>, vector<2x8x384xf32>
    %1 = vector.shape_cast %0 : vector<2x8x384xf32> to vector<16x384xf32>
    %c0_2 = arith.constant 0 : index
    %c0_3 = arith.constant 0 : index
    %2 = vector.load %arg2[%c0_2, %c0_3] : memref<1x384xf32, #tpu.memory_space<vmem>>, vector<1x384xf32>
    %c0_4 = arith.constant 0 : index
    %c0_5 = arith.constant 0 : index
    %3 = vector.load %arg3[%c0_4, %c0_5] : memref<1x384xf32, #tpu.memory_space<vmem>>, vector<1x384xf32>
    %cst = arith.constant dense<0.000000e+00> : vector<16xf32>
    %4 = vector.multi_reduction <add>, %1, %cst [1] : vector<16x384xf32> to vector<16xf32>
    %5 = vector.shape_cast %4 : vector<16xf32> to vector<16x1xf32>
    %cst_6 = arith.constant 3.840000e+02 : f32
    %6 = vector.broadcast %cst_6 : f32 to vector<16x1xf32>
    %7 = arith.divf %5, %6 : vector<16x1xf32>
    %8 = vector.broadcast %7 : vector<16x1xf32> to vector<16x384xf32>
    %9 = arith.subf %1, %8 : vector<16x384xf32>
    %10 = arith.mulf %9, %9 : vector<16x384xf32>
    %cst_7 = arith.constant dense<0.000000e+00> : vector<16xf32>
    %11 = vector.multi_reduction <add>, %10, %cst_7 [1] : vector<16x384xf32> to vector<16xf32>
    %12 = vector.shape_cast %11 : vector<16xf32> to vector<16x1xf32>
    %cst_8 = arith.constant 3.840000e+02 : f32
    %13 = vector.broadcast %cst_8 : f32 to vector<16x1xf32>
    %14 = arith.divf %12, %13 : vector<16x1xf32>
    %15 = vector.broadcast %7 : vector<16x1xf32> to vector<16x384xf32>
    %16 = arith.subf %1, %15 : vector<16x384xf32>
    %cst_9 = arith.constant 9.99999974E-6 : f32
    %17 = vector.broadcast %cst_9 : f32 to vector<16x1xf32>
    %18 = arith.addf %14, %17 : vector<16x1xf32>
    %19 = math.rsqrt %18 : vector<16x1xf32>
    %20 = vector.broadcast %19 : vector<16x1xf32> to vector<16x384xf32>
    %21 = arith.mulf %16, %20 : vector<16x384xf32>
    %22 = vector.broadcast %2 : vector<1x384xf32> to vector<16x384xf32>
    %23 = arith.mulf %21, %22 : vector<16x384xf32>
    %24 = vector.broadcast %3 : vector<1x384xf32> to vector<16x384xf32>
    %25 = arith.addf %23, %24 : vector<16x384xf32>
    %26 = arith.truncf %25 : vector<16x384xf32> to vector<16x384xbf16>
    %c0_10 = arith.constant 0 : index
    %c0_11 = arith.constant 0 : index
    %27 = vector.load %arg4[%c0_10, %c0_11] : memref<384x1152xbf16, #tpu.memory_space<vmem>>, vector<384x1152xbf16>
    %cst_12 = arith.constant dense<0.000000e+00> : vector<16x1152xf32>
    %28 = tpu.matmul %26, %27, %cst_12 {dimension_numbers = #tpu.dot_dimension_numbers<[1], [0], [0], [1], [0, 0, 1, 1], [], []>} : vector<16x384xbf16>, vector<384x1152xbf16>, vector<16x1152xf32> -> vector<16x1152xf32>
    %29 = tpu.iota {dimensions = array<i32: 1>} : vector<2x8x8xi32>
    %30 = tpu.iota {dimensions = array<i32: 2>} : vector<2x8x8xi32>
    %31 = arith.cmpi sle, %30, %29 : vector<2x8x8xi32>
    %c0_13 = arith.constant 0 : index
    %c0_14 = arith.constant 0 : index
    %32 = vector.load %arg5[%c0_13, %c0_14] : memref<384x384xbf16, #tpu.memory_space<vmem>>, vector<384x384xbf16>
    %cst_15 = arith.constant 0.000000e+00 : f32
    %33 = vector.broadcast %cst_15 : f32 to vector<16x384xf32>
    %34 = vector.extract_strided_slice %28 {offsets = [0, 0], sizes = [16, 64], strides = [1, 1]} : vector<16x1152xf32> to vector<16x64xf32>
    %35 = vector.shape_cast %34 : vector<16x64xf32> to vector<2x8x64xf32>
    %36 = arith.truncf %35 : vector<2x8x64xf32> to vector<2x8x64xbf16>
    %37 = vector.extract_strided_slice %28 {offsets = [0, 384], sizes = [16, 64], strides = [1, 1]} : vector<16x1152xf32> to vector<16x64xf32>
    %38 = vector.shape_cast %37 : vector<16x64xf32> to vector<2x8x64xf32>
    %39 = arith.truncf %38 : vector<2x8x64xf32> to vector<2x8x64xbf16>
    %40 = vector.extract_strided_slice %28 {offsets = [0, 768], sizes = [16, 64], strides = [1, 1]} : vector<16x1152xf32> to vector<16x64xf32>
    %41 = vector.shape_cast %40 : vector<16x64xf32> to vector<2x8x64xf32>
    %42 = arith.truncf %41 : vector<2x8x64xf32> to vector<2x8x64xbf16>
    "tpu.trace_start"() <{level = 10 : i32, message = "bqd,bkd->bqk"}> : () -> ()
    %cst_16 = arith.constant dense<0.000000e+00> : vector<2x8x8xf32>
    %43 = tpu.matmul %36, %39, %cst_16 {dimension_numbers = #tpu.dot_dimension_numbers<[2], [2], [1], [1], [0, 0, 0, 1, 1, 1], [0], [0]>} : vector<2x8x64xbf16>, vector<2x8x64xbf16>, vector<2x8x8xf32> -> vector<2x8x8xf32>
    "tpu.trace_stop"() : () -> ()
    %cst_17 = arith.constant 1.250000e-01 : f32
    %44 = vector.broadcast %cst_17 : f32 to vector<2x8x8xf32>
    %45 = arith.mulf %43, %44 : vector<2x8x8xf32>
    %cst_18 = arith.constant 0xFF800000 : f32
    %46 = vector.broadcast %cst_18 : f32 to vector<2x8x8xf32>
    %47 = arith.select %31, %45, %46 : vector<2x8x8xi1>, vector<2x8x8xf32>
    %cst_19 = arith.constant dense<0xFF800000> : vector<2x8xf32>
    %48 = vector.multi_reduction <maximumf>, %47, %cst_19 [2] : vector<2x8x8xf32> to vector<2x8xf32>
    %49 = vector.shape_cast %48 : vector<2x8xf32> to vector<2x8x1xf32>
    %50 = vector.broadcast %49 : vector<2x8x1xf32> to vector<2x8x8xf32>
    %51 = arith.subf %47, %50 : vector<2x8x8xf32>
    %52 = math.exp %51 : vector<2x8x8xf32>
    %cst_20 = arith.constant dense<0.000000e+00> : vector<2x8xf32>
    %53 = vector.multi_reduction <add>, %52, %cst_20 [2] : vector<2x8x8xf32> to vector<2x8xf32>
    %54 = vector.shape_cast %53 : vector<2x8xf32> to vector<2x8x1xf32>
    %55 = tpu.reciprocal %54 {approx = true} : vector<2x8x1xf32> -> vector<2x8x1xf32>
    %56 = vector.broadcast %55 : vector<2x8x1xf32> to vector<2x8x8xf32>
    %57 = arith.mulf %52, %56 : vector<2x8x8xf32>
    %58 = arith.truncf %57 : vector<2x8x8xf32> to vector<2x8x8xbf16>
    "tpu.trace_start"() <{level = 10 : i32, message = "bqk,bkd->bqd"}> : () -> ()
    %cst_21 = arith.constant dense<0.000000e+00> : vector<2x8x64xf32>
    %59 = tpu.matmul %58, %42, %cst_21 {dimension_numbers = #tpu.dot_dimension_numbers<[2], [1], [1], [2], [0, 0, 0, 1, 1, 2], [0], [0]>} : vector<2x8x8xbf16>, vector<2x8x64xbf16>, vector<2x8x64xf32> -> vector<2x8x64xf32>
    "tpu.trace_stop"() : () -> ()
    %60 = vector.shape_cast %59 : vector<2x8x64xf32> to vector<16x64xf32>
    %61 = arith.truncf %60 : vector<16x64xf32> to vector<16x64xbf16>
    %62 = vector.extract_strided_slice %32 {offsets = [0, 0], sizes = [64, 384], strides = [1, 1]} : vector<384x384xbf16> to vector<64x384xbf16>
    %cst_22 = arith.constant dense<0.000000e+00> : vector<16x384xf32>
    %63 = tpu.matmul %61, %62, %cst_22 {dimension_numbers = #tpu.dot_dimension_numbers<[1], [0], [0], [1], [0, 0, 1, 1], [], []>} : vector<16x64xbf16>, vector<64x384xbf16>, vector<16x384xf32> -> vector<16x384xf32>
    %64 = arith.addf %33, %63 : vector<16x384xf32>
    %65 = vector.extract_strided_slice %28 {offsets = [0, 64], sizes = [16, 64], strides = [1, 1]} : vector<16x1152xf32> to vector<16x64xf32>
    %66 = vector.shape_cast %65 : vector<16x64xf32> to vector<2x8x64xf32>
    %67 = arith.truncf %66 : vector<2x8x64xf32> to vector<2x8x64xbf16>
    %68 = vector.extract_strided_slice %28 {offsets = [0, 448], sizes = [16, 64], strides = [1, 1]} : vector<16x1152xf32> to vector<16x64xf32>
    %69 = vector.shape_cast %68 : vector<16x64xf32> to vector<2x8x64xf32>
    %70 = arith.truncf %69 : vector<2x8x64xf32> to vector<2x8x64xbf16>
    %71 = vector.extract_strided_slice %28 {offsets = [0, 832], sizes = [16, 64], strides = [1, 1]} : vector<16x1152xf32> to vector<16x64xf32>
    %72 = vector.shape_cast %71 : vector<16x64xf32> to vector<2x8x64xf32>
    %73 = arith.truncf %72 : vector<2x8x64xf32> to vector<2x8x64xbf16>
    "tpu.trace_start"() <{level = 10 : i32, message = "bqd,bkd->bqk"}> : () -> ()
    %cst_23 = arith.constant dense<0.000000e+00> : vector<2x8x8xf32>
    %74 = tpu.matmul %67, %70, %cst_23 {dimension_numbers = #tpu.dot_dimension_numbers<[2], [2], [1], [1], [0, 0, 0, 1, 1, 1], [0], [0]>} : vector<2x8x64xbf16>, vector<2x8x64xbf16>, vector<2x8x8xf32> -> vector<2x8x8xf32>
    "tpu.trace_stop"() : () -> ()
    %cst_24 = arith.constant 1.250000e-01 : f32
    %75 = vector.broadcast %cst_24 : f32 to vector<2x8x8xf32>
    %76 = arith.mulf %74, %75 : vector<2x8x8xf32>
    %cst_25 = arith.constant 0xFF800000 : f32
    %77 = vector.broadcast %cst_25 : f32 to vector<2x8x8xf32>
    %78 = arith.select %31, %76, %77 : vector<2x8x8xi1>, vector<2x8x8xf32>
    %cst_26 = arith.constant dense<0xFF800000> : vector<2x8xf32>
    %79 = vector.multi_reduction <maximumf>, %78, %cst_26 [2] : vector<2x8x8xf32> to vector<2x8xf32>
    %80 = vector.shape_cast %79 : vector<2x8xf32> to vector<2x8x1xf32>
    %81 = vector.broadcast %80 : vector<2x8x1xf32> to vector<2x8x8xf32>
    %82 = arith.subf %78, %81 : vector<2x8x8xf32>
    %83 = math.exp %82 : vector<2x8x8xf32>
    %cst_27 = arith.constant dense<0.000000e+00> : vector<2x8xf32>
    %84 = vector.multi_reduction <add>, %83, %cst_27 [2] : vector<2x8x8xf32> to vector<2x8xf32>
    %85 = vector.shape_cast %84 : vector<2x8xf32> to vector<2x8x1xf32>
    %86 = tpu.reciprocal %85 {approx = true} : vector<2x8x1xf32> -> vector<2x8x1xf32>
    %87 = vector.broadcast %86 : vector<2x8x1xf32> to vector<2x8x8xf32>
    %88 = arith.mulf %83, %87 : vector<2x8x8xf32>
    %89 = arith.truncf %88 : vector<2x8x8xf32> to vector<2x8x8xbf16>
    "tpu.trace_start"() <{level = 10 : i32, message = "bqk,bkd->bqd"}> : () -> ()
    %cst_28 = arith.constant dense<0.000000e+00> : vector<2x8x64xf32>
    %90 = tpu.matmul %89, %73, %cst_28 {dimension_numbers = #tpu.dot_dimension_numbers<[2], [1], [1], [2], [0, 0, 0, 1, 1, 2], [0], [0]>} : vector<2x8x8xbf16>, vector<2x8x64xbf16>, vector<2x8x64xf32> -> vector<2x8x64xf32>
    "tpu.trace_stop"() : () -> ()
    %91 = vector.shape_cast %90 : vector<2x8x64xf32> to vector<16x64xf32>
    %92 = arith.truncf %91 : vector<16x64xf32> to vector<16x64xbf16>
    %93 = vector.extract_strided_slice %32 {offsets = [64, 0], sizes = [64, 384], strides = [1, 1]} : vector<384x384xbf16> to vector<64x384xbf16>
    %cst_29 = arith.constant dense<0.000000e+00> : vector<16x384xf32>
    %94 = tpu.matmul %92, %93, %cst_29 {dimension_numbers = #tpu.dot_dimension_numbers<[1], [0], [0], [1], [0, 0, 1, 1], [], []>} : vector<16x64xbf16>, vector<64x384xbf16>, vector<16x384xf32> -> vector<16x384xf32>
    %95 = arith.addf %64, %94 : vector<16x384xf32>
    %96 = vector.extract_strided_slice %28 {offsets = [0, 128], sizes = [16, 64], strides = [1, 1]} : vector<16x1152xf32> to vector<16x64xf32>
    %97 = vector.shape_cast %96 : vector<16x64xf32> to vector<2x8x64xf32>
    %98 = arith.truncf %97 : vector<2x8x64xf32> to vector<2x8x64xbf16>
    %99 = vector.extract_strided_slice %28 {offsets = [0, 512], sizes = [16, 64], strides = [1, 1]} : vector<16x1152xf32> to vector<16x64xf32>
    %100 = vector.shape_cast %99 : vector<16x64xf32> to vector<2x8x64xf32>
    %101 = arith.truncf %100 : vector<2x8x64xf32> to vector<2x8x64xbf16>
    %102 = vector.extract_strided_slice %28 {offsets = [0, 896], sizes = [16, 64], strides = [1, 1]} : vector<16x1152xf32> to vector<16x64xf32>
    %103 = vector.shape_cast %102 : vector<16x64xf32> to vector<2x8x64xf32>
    %104 = arith.truncf %103 : vector<2x8x64xf32> to vector<2x8x64xbf16>
    "tpu.trace_start"() <{level = 10 : i32, message = "bqd,bkd->bqk"}> : () -> ()
    %cst_30 = arith.constant dense<0.000000e+00> : vector<2x8x8xf32>
    %105 = tpu.matmul %98, %101, %cst_30 {dimension_numbers = #tpu.dot_dimension_numbers<[2], [2], [1], [1], [0, 0, 0, 1, 1, 1], [0], [0]>} : vector<2x8x64xbf16>, vector<2x8x64xbf16>, vector<2x8x8xf32> -> vector<2x8x8xf32>
    "tpu.trace_stop"() : () -> ()
    %cst_31 = arith.constant 1.250000e-01 : f32
    %106 = vector.broadcast %cst_31 : f32 to vector<2x8x8xf32>
    %107 = arith.mulf %105, %106 : vector<2x8x8xf32>
    %cst_32 = arith.constant 0xFF800000 : f32
    %108 = vector.broadcast %cst_32 : f32 to vector<2x8x8xf32>
    %109 = arith.select %31, %107, %108 : vector<2x8x8xi1>, vector<2x8x8xf32>
    %cst_33 = arith.constant dense<0xFF800000> : vector<2x8xf32>
    %110 = vector.multi_reduction <maximumf>, %109, %cst_33 [2] : vector<2x8x8xf32> to vector<2x8xf32>
    %111 = vector.shape_cast %110 : vector<2x8xf32> to vector<2x8x1xf32>
    %112 = vector.broadcast %111 : vector<2x8x1xf32> to vector<2x8x8xf32>
    %113 = arith.subf %109, %112 : vector<2x8x8xf32>
    %114 = math.exp %113 : vector<2x8x8xf32>
    %cst_34 = arith.constant dense<0.000000e+00> : vector<2x8xf32>
    %115 = vector.multi_reduction <add>, %114, %cst_34 [2] : vector<2x8x8xf32> to vector<2x8xf32>
    %116 = vector.shape_cast %115 : vector<2x8xf32> to vector<2x8x1xf32>
    %117 = tpu.reciprocal %116 {approx = true} : vector<2x8x1xf32> -> vector<2x8x1xf32>
    %118 = vector.broadcast %117 : vector<2x8x1xf32> to vector<2x8x8xf32>
    %119 = arith.mulf %114, %118 : vector<2x8x8xf32>
    %120 = arith.truncf %119 : vector<2x8x8xf32> to vector<2x8x8xbf16>
    "tpu.trace_start"() <{level = 10 : i32, message = "bqk,bkd->bqd"}> : () -> ()
    %cst_35 = arith.constant dense<0.000000e+00> : vector<2x8x64xf32>
    %121 = tpu.matmul %120, %104, %cst_35 {dimension_numbers = #tpu.dot_dimension_numbers<[2], [1], [1], [2], [0, 0, 0, 1, 1, 2], [0], [0]>} : vector<2x8x8xbf16>, vector<2x8x64xbf16>, vector<2x8x64xf32> -> vector<2x8x64xf32>
    "tpu.trace_stop"() : () -> ()
    %122 = vector.shape_cast %121 : vector<2x8x64xf32> to vector<16x64xf32>
    %123 = arith.truncf %122 : vector<16x64xf32> to vector<16x64xbf16>
    %124 = vector.extract_strided_slice %32 {offsets = [128, 0], sizes = [64, 384], strides = [1, 1]} : vector<384x384xbf16> to vector<64x384xbf16>
    %cst_36 = arith.constant dense<0.000000e+00> : vector<16x384xf32>
    %125 = tpu.matmul %123, %124, %cst_36 {dimension_numbers = #tpu.dot_dimension_numbers<[1], [0], [0], [1], [0, 0, 1, 1], [], []>} : vector<16x64xbf16>, vector<64x384xbf16>, vector<16x384xf32> -> vector<16x384xf32>
    %126 = arith.addf %95, %125 : vector<16x384xf32>
    %127 = vector.extract_strided_slice %28 {offsets = [0, 192], sizes = [16, 64], strides = [1, 1]} : vector<16x1152xf32> to vector<16x64xf32>
    %128 = vector.shape_cast %127 : vector<16x64xf32> to vector<2x8x64xf32>
    %129 = arith.truncf %128 : vector<2x8x64xf32> to vector<2x8x64xbf16>
    %130 = vector.extract_strided_slice %28 {offsets = [0, 576], sizes = [16, 64], strides = [1, 1]} : vector<16x1152xf32> to vector<16x64xf32>
    %131 = vector.shape_cast %130 : vector<16x64xf32> to vector<2x8x64xf32>
    %132 = arith.truncf %131 : vector<2x8x64xf32> to vector<2x8x64xbf16>
    %133 = vector.extract_strided_slice %28 {offsets = [0, 960], sizes = [16, 64], strides = [1, 1]} : vector<16x1152xf32> to vector<16x64xf32>
    %134 = vector.shape_cast %133 : vector<16x64xf32> to vector<2x8x64xf32>
    %135 = arith.truncf %134 : vector<2x8x64xf32> to vector<2x8x64xbf16>
    "tpu.trace_start"() <{level = 10 : i32, message = "bqd,bkd->bqk"}> : () -> ()
    %cst_37 = arith.constant dense<0.000000e+00> : vector<2x8x8xf32>
    %136 = tpu.matmul %129, %132, %cst_37 {dimension_numbers = #tpu.dot_dimension_numbers<[2], [2], [1], [1], [0, 0, 0, 1, 1, 1], [0], [0]>} : vector<2x8x64xbf16>, vector<2x8x64xbf16>, vector<2x8x8xf32> -> vector<2x8x8xf32>
    "tpu.trace_stop"() : () -> ()
    %cst_38 = arith.constant 1.250000e-01 : f32
    %137 = vector.broadcast %cst_38 : f32 to vector<2x8x8xf32>
    %138 = arith.mulf %136, %137 : vector<2x8x8xf32>
    %cst_39 = arith.constant 0xFF800000 : f32
    %139 = vector.broadcast %cst_39 : f32 to vector<2x8x8xf32>
    %140 = arith.select %31, %138, %139 : vector<2x8x8xi1>, vector<2x8x8xf32>
    %cst_40 = arith.constant dense<0xFF800000> : vector<2x8xf32>
    %141 = vector.multi_reduction <maximumf>, %140, %cst_40 [2] : vector<2x8x8xf32> to vector<2x8xf32>
    %142 = vector.shape_cast %141 : vector<2x8xf32> to vector<2x8x1xf32>
    %143 = vector.broadcast %142 : vector<2x8x1xf32> to vector<2x8x8xf32>
    %144 = arith.subf %140, %143 : vector<2x8x8xf32>
    %145 = math.exp %144 : vector<2x8x8xf32>
    %cst_41 = arith.constant dense<0.000000e+00> : vector<2x8xf32>
    %146 = vector.multi_reduction <add>, %145, %cst_41 [2] : vector<2x8x8xf32> to vector<2x8xf32>
    %147 = vector.shape_cast %146 : vector<2x8xf32> to vector<2x8x1xf32>
    %148 = tpu.reciprocal %147 {approx = true} : vector<2x8x1xf32> -> vector<2x8x1xf32>
    %149 = vector.broadcast %148 : vector<2x8x1xf32> to vector<2x8x8xf32>
    %150 = arith.mulf %145, %149 : vector<2x8x8xf32>
    %151 = arith.truncf %150 : vector<2x8x8xf32> to vector<2x8x8xbf16>
    "tpu.trace_start"() <{level = 10 : i32, message = "bqk,bkd->bqd"}> : () -> ()
    %cst_42 = arith.constant dense<0.000000e+00> : vector<2x8x64xf32>
    %152 = tpu.matmul %151, %135, %cst_42 {dimension_numbers = #tpu.dot_dimension_numbers<[2], [1], [1], [2], [0, 0, 0, 1, 1, 2], [0], [0]>} : vector<2x8x8xbf16>, vector<2x8x64xbf16>, vector<2x8x64xf32> -> vector<2x8x64xf32>
    "tpu.trace_stop"() : () -> ()
    %153 = vector.shape_cast %152 : vector<2x8x64xf32> to vector<16x64xf32>
    %154 = arith.truncf %153 : vector<16x64xf32> to vector<16x64xbf16>
    %155 = vector.extract_strided_slice %32 {offsets = [192, 0], sizes = [64, 384], strides = [1, 1]} : vector<384x384xbf16> to vector<64x384xbf16>
    %cst_43 = arith.constant dense<0.000000e+00> : vector<16x384xf32>
    %156 = tpu.matmul %154, %155, %cst_43 {dimension_numbers = #tpu.dot_dimension_numbers<[1], [0], [0], [1], [0, 0, 1, 1], [], []>} : vector<16x64xbf16>, vector<64x384xbf16>, vector<16x384xf32> -> vector<16x384xf32>
    %157 = arith.addf %126, %156 : vector<16x384xf32>
    %158 = vector.extract_strided_slice %28 {offsets = [0, 256], sizes = [16, 64], strides = [1, 1]} : vector<16x1152xf32> to vector<16x64xf32>
    %159 = vector.shape_cast %158 : vector<16x64xf32> to vector<2x8x64xf32>
    %160 = arith.truncf %159 : vector<2x8x64xf32> to vector<2x8x64xbf16>
    %161 = vector.extract_strided_slice %28 {offsets = [0, 640], sizes = [16, 64], strides = [1, 1]} : vector<16x1152xf32> to vector<16x64xf32>
    %162 = vector.shape_cast %161 : vector<16x64xf32> to vector<2x8x64xf32>
    %163 = arith.truncf %162 : vector<2x8x64xf32> to vector<2x8x64xbf16>
    %164 = vector.extract_strided_slice %28 {offsets = [0, 1024], sizes = [16, 64], strides = [1, 1]} : vector<16x1152xf32> to vector<16x64xf32>
    %165 = vector.shape_cast %164 : vector<16x64xf32> to vector<2x8x64xf32>
    %166 = arith.truncf %165 : vector<2x8x64xf32> to vector<2x8x64xbf16>
    "tpu.trace_start"() <{level = 10 : i32, message = "bqd,bkd->bqk"}> : () -> ()
    %cst_44 = arith.constant dense<0.000000e+00> : vector<2x8x8xf32>
    %167 = tpu.matmul %160, %163, %cst_44 {dimension_numbers = #tpu.dot_dimension_numbers<[2], [2], [1], [1], [0, 0, 0, 1, 1, 1], [0], [0]>} : vector<2x8x64xbf16>, vector<2x8x64xbf16>, vector<2x8x8xf32> -> vector<2x8x8xf32>
    "tpu.trace_stop"() : () -> ()
    %cst_45 = arith.constant 1.250000e-01 : f32
    %168 = vector.broadcast %cst_45 : f32 to vector<2x8x8xf32>
    %169 = arith.mulf %167, %168 : vector<2x8x8xf32>
    %cst_46 = arith.constant 0xFF800000 : f32
    %170 = vector.broadcast %cst_46 : f32 to vector<2x8x8xf32>
    %171 = arith.select %31, %169, %170 : vector<2x8x8xi1>, vector<2x8x8xf32>
    %cst_47 = arith.constant dense<0xFF800000> : vector<2x8xf32>
    %172 = vector.multi_reduction <maximumf>, %171, %cst_47 [2] : vector<2x8x8xf32> to vector<2x8xf32>
    %173 = vector.shape_cast %172 : vector<2x8xf32> to vector<2x8x1xf32>
    %174 = vector.broadcast %173 : vector<2x8x1xf32> to vector<2x8x8xf32>
    %175 = arith.subf %171, %174 : vector<2x8x8xf32>
    %176 = math.exp %175 : vector<2x8x8xf32>
    %cst_48 = arith.constant dense<0.000000e+00> : vector<2x8xf32>
    %177 = vector.multi_reduction <add>, %176, %cst_48 [2] : vector<2x8x8xf32> to vector<2x8xf32>
    %178 = vector.shape_cast %177 : vector<2x8xf32> to vector<2x8x1xf32>
    %179 = tpu.reciprocal %178 {approx = true} : vector<2x8x1xf32> -> vector<2x8x1xf32>
    %180 = vector.broadcast %179 : vector<2x8x1xf32> to vector<2x8x8xf32>
    %181 = arith.mulf %176, %180 : vector<2x8x8xf32>
    %182 = arith.truncf %181 : vector<2x8x8xf32> to vector<2x8x8xbf16>
    "tpu.trace_start"() <{level = 10 : i32, message = "bqk,bkd->bqd"}> : () -> ()
    %cst_49 = arith.constant dense<0.000000e+00> : vector<2x8x64xf32>
    %183 = tpu.matmul %182, %166, %cst_49 {dimension_numbers = #tpu.dot_dimension_numbers<[2], [1], [1], [2], [0, 0, 0, 1, 1, 2], [0], [0]>} : vector<2x8x8xbf16>, vector<2x8x64xbf16>, vector<2x8x64xf32> -> vector<2x8x64xf32>
    "tpu.trace_stop"() : () -> ()
    %184 = vector.shape_cast %183 : vector<2x8x64xf32> to vector<16x64xf32>
    %185 = arith.truncf %184 : vector<16x64xf32> to vector<16x64xbf16>
    %186 = vector.extract_strided_slice %32 {offsets = [256, 0], sizes = [64, 384], strides = [1, 1]} : vector<384x384xbf16> to vector<64x384xbf16>
    %cst_50 = arith.constant dense<0.000000e+00> : vector<16x384xf32>
    %187 = tpu.matmul %185, %186, %cst_50 {dimension_numbers = #tpu.dot_dimension_numbers<[1], [0], [0], [1], [0, 0, 1, 1], [], []>} : vector<16x64xbf16>, vector<64x384xbf16>, vector<16x384xf32> -> vector<16x384xf32>
    %188 = arith.addf %157, %187 : vector<16x384xf32>
    %189 = vector.extract_strided_slice %28 {offsets = [0, 320], sizes = [16, 64], strides = [1, 1]} : vector<16x1152xf32> to vector<16x64xf32>
    %190 = vector.shape_cast %189 : vector<16x64xf32> to vector<2x8x64xf32>
    %191 = arith.truncf %190 : vector<2x8x64xf32> to vector<2x8x64xbf16>
    %192 = vector.extract_strided_slice %28 {offsets = [0, 704], sizes = [16, 64], strides = [1, 1]} : vector<16x1152xf32> to vector<16x64xf32>
    %193 = vector.shape_cast %192 : vector<16x64xf32> to vector<2x8x64xf32>
    %194 = arith.truncf %193 : vector<2x8x64xf32> to vector<2x8x64xbf16>
    %195 = vector.extract_strided_slice %28 {offsets = [0, 1088], sizes = [16, 64], strides = [1, 1]} : vector<16x1152xf32> to vector<16x64xf32>
    %196 = vector.shape_cast %195 : vector<16x64xf32> to vector<2x8x64xf32>
    %197 = arith.truncf %196 : vector<2x8x64xf32> to vector<2x8x64xbf16>
    "tpu.trace_start"() <{level = 10 : i32, message = "bqd,bkd->bqk"}> : () -> ()
    %cst_51 = arith.constant dense<0.000000e+00> : vector<2x8x8xf32>
    %198 = tpu.matmul %191, %194, %cst_51 {dimension_numbers = #tpu.dot_dimension_numbers<[2], [2], [1], [1], [0, 0, 0, 1, 1, 1], [0], [0]>} : vector<2x8x64xbf16>, vector<2x8x64xbf16>, vector<2x8x8xf32> -> vector<2x8x8xf32>
    "tpu.trace_stop"() : () -> ()
    %cst_52 = arith.constant 1.250000e-01 : f32
    %199 = vector.broadcast %cst_52 : f32 to vector<2x8x8xf32>
    %200 = arith.mulf %198, %199 : vector<2x8x8xf32>
    %cst_53 = arith.constant 0xFF800000 : f32
    %201 = vector.broadcast %cst_53 : f32 to vector<2x8x8xf32>
    %202 = arith.select %31, %200, %201 : vector<2x8x8xi1>, vector<2x8x8xf32>
    %cst_54 = arith.constant dense<0xFF800000> : vector<2x8xf32>
    %203 = vector.multi_reduction <maximumf>, %202, %cst_54 [2] : vector<2x8x8xf32> to vector<2x8xf32>
    %204 = vector.shape_cast %203 : vector<2x8xf32> to vector<2x8x1xf32>
    %205 = vector.broadcast %204 : vector<2x8x1xf32> to vector<2x8x8xf32>
    %206 = arith.subf %202, %205 : vector<2x8x8xf32>
    %207 = math.exp %206 : vector<2x8x8xf32>
    %cst_55 = arith.constant dense<0.000000e+00> : vector<2x8xf32>
    %208 = vector.multi_reduction <add>, %207, %cst_55 [2] : vector<2x8x8xf32> to vector<2x8xf32>
    %209 = vector.shape_cast %208 : vector<2x8xf32> to vector<2x8x1xf32>
    %210 = tpu.reciprocal %209 {approx = true} : vector<2x8x1xf32> -> vector<2x8x1xf32>
    %211 = vector.broadcast %210 : vector<2x8x1xf32> to vector<2x8x8xf32>
    %212 = arith.mulf %207, %211 : vector<2x8x8xf32>
    %213 = arith.truncf %212 : vector<2x8x8xf32> to vector<2x8x8xbf16>
    "tpu.trace_start"() <{level = 10 : i32, message = "bqk,bkd->bqd"}> : () -> ()
    %cst_56 = arith.constant dense<0.000000e+00> : vector<2x8x64xf32>
    %214 = tpu.matmul %213, %197, %cst_56 {dimension_numbers = #tpu.dot_dimension_numbers<[2], [1], [1], [2], [0, 0, 0, 1, 1, 2], [0], [0]>} : vector<2x8x8xbf16>, vector<2x8x64xbf16>, vector<2x8x64xf32> -> vector<2x8x64xf32>
    "tpu.trace_stop"() : () -> ()
    %215 = vector.shape_cast %214 : vector<2x8x64xf32> to vector<16x64xf32>
    %216 = arith.truncf %215 : vector<16x64xf32> to vector<16x64xbf16>
    %217 = vector.extract_strided_slice %32 {offsets = [320, 0], sizes = [64, 384], strides = [1, 1]} : vector<384x384xbf16> to vector<64x384xbf16>
    %cst_57 = arith.constant dense<0.000000e+00> : vector<16x384xf32>
    %218 = tpu.matmul %216, %217, %cst_57 {dimension_numbers = #tpu.dot_dimension_numbers<[1], [0], [0], [1], [0, 0, 1, 1], [], []>} : vector<16x64xbf16>, vector<64x384xbf16>, vector<16x384xf32> -> vector<16x384xf32>
    %219 = arith.addf %188, %218 : vector<16x384xf32>
    %220 = arith.addf %1, %219 : vector<16x384xf32>
    %c0_58 = arith.constant 0 : index
    %c0_59 = arith.constant 0 : index
    %221 = vector.load %arg6[%c0_58, %c0_59] : memref<1x384xf32, #tpu.memory_space<vmem>>, vector<1x384xf32>
    %222 = vector.broadcast %221 : vector<1x384xf32> to vector<16x384xf32>
    %223 = arith.addf %220, %222 : vector<16x384xf32>
    %cst_60 = arith.constant dense<0.000000e+00> : vector<16xf32>
    %224 = vector.multi_reduction <add>, %223, %cst_60 [1] : vector<16x384xf32> to vector<16xf32>
    %225 = vector.shape_cast %224 : vector<16xf32> to vector<16x1xf32>
    %cst_61 = arith.constant 3.840000e+02 : f32
    %226 = vector.broadcast %cst_61 : f32 to vector<16x1xf32>
    %227 = arith.divf %225, %226 : vector<16x1xf32>
    %228 = vector.broadcast %227 : vector<16x1xf32> to vector<16x384xf32>
    %229 = arith.subf %223, %228 : vector<16x384xf32>
    %230 = arith.mulf %229, %229 : vector<16x384xf32>
    %cst_62 = arith.constant dense<0.000000e+00> : vector<16xf32>
    %231 = vector.multi_reduction <add>, %230, %cst_62 [1] : vector<16x384xf32> to vector<16xf32>
    %232 = vector.shape_cast %231 : vector<16xf32> to vector<16x1xf32>
    %cst_63 = arith.constant 3.840000e+02 : f32
    %233 = vector.broadcast %cst_63 : f32 to vector<16x1xf32>
    %234 = arith.divf %232, %233 : vector<16x1xf32>
    %235 = vector.broadcast %227 : vector<16x1xf32> to vector<16x384xf32>
    %236 = arith.subf %223, %235 : vector<16x384xf32>
    %cst_64 = arith.constant 9.99999974E-6 : f32
    %237 = vector.broadcast %cst_64 : f32 to vector<16x1xf32>
    %238 = arith.addf %234, %237 : vector<16x1xf32>
    %239 = math.rsqrt %238 : vector<16x1xf32>
    %240 = vector.broadcast %239 : vector<16x1xf32> to vector<16x384xf32>
    %241 = arith.mulf %236, %240 : vector<16x384xf32>
    %242 = vector.broadcast %2 : vector<1x384xf32> to vector<16x384xf32>
    %243 = arith.mulf %241, %242 : vector<16x384xf32>
    %244 = vector.broadcast %3 : vector<1x384xf32> to vector<16x384xf32>
    %245 = arith.addf %243, %244 : vector<16x384xf32>
    %246 = arith.truncf %245 : vector<16x384xf32> to vector<16x384xbf16>
    %c0_65 = arith.constant 0 : index
    %c0_66 = arith.constant 0 : index
    %247 = vector.load %arg7[%c0_65, %c0_66] : memref<384x1536xbf16, #tpu.memory_space<vmem>>, vector<384x1536xbf16>
    %cst_67 = arith.constant dense<0.000000e+00> : vector<16x1536xf32>
    %248 = tpu.matmul %246, %247, %cst_67 {dimension_numbers = #tpu.dot_dimension_numbers<[1], [0], [0], [1], [0, 0, 1, 1], [], []>} : vector<16x384xbf16>, vector<384x1536xbf16>, vector<16x1536xf32> -> vector<16x1536xf32>
    %c0_68 = arith.constant 0 : index
    %c0_69 = arith.constant 0 : index
    %249 = vector.load %arg8[%c0_68, %c0_69] : memref<1x1536xf32, #tpu.memory_space<vmem>>, vector<1x1536xf32>
    %250 = vector.broadcast %249 : vector<1x1536xf32> to vector<16x1536xf32>
    %251 = arith.addf %248, %250 : vector<16x1536xf32>
    %cst_70 = arith.constant 0.000000e+00 : f32
    %252 = vector.broadcast %cst_70 : f32 to vector<16x1536xf32>
    %253 = arith.maximumf %251, %252 : vector<16x1536xf32>
    %254 = arith.truncf %253 : vector<16x1536xf32> to vector<16x1536xbf16>
    %c0_71 = arith.constant 0 : index
    %c0_72 = arith.constant 0 : index
    %255 = vector.load %arg9[%c0_71, %c0_72] : memref<1536x384xbf16, #tpu.memory_space<vmem>>, vector<1536x384xbf16>
    %cst_73 = arith.constant dense<0.000000e+00> : vector<16x384xf32>
    %256 = tpu.matmul %254, %255, %cst_73 {dimension_numbers = #tpu.dot_dimension_numbers<[1], [0], [0], [1], [0, 0, 1, 1], [], []>} : vector<16x1536xbf16>, vector<1536x384xbf16>, vector<16x384xf32> -> vector<16x384xf32>
    %c0_74 = arith.constant 0 : index
    %c0_75 = arith.constant 0 : index
    %257 = vector.load %arg10[%c0_74, %c0_75] : memref<1x384xf32, #tpu.memory_space<vmem>>, vector<1x384xf32>
    %258 = vector.broadcast %257 : vector<1x384xf32> to vector<16x384xf32>
    %259 = arith.addf %256, %258 : vector<16x384xf32>
    %260 = arith.addf %223, %259 : vector<16x384xf32>
    %261 = vector.shape_cast %260 : vector<16x384xf32> to vector<2x8x384xf32>
    %c0_76 = arith.constant 0 : index
    %c0_77 = arith.constant 0 : index
    %c0_78 = arith.constant 0 : index
    %262 = vector.load %arg11[%c0_76, %c0_77, %c0_78] : memref<2x8x384xf32, #tpu.memory_space<vmem>>, vector<2x8x384xf32>
    tpu.vector_store %arg11[%c0_76, %c0_77, %c0_78], %261 {strides = array<i32>} : memref<2x8x384xf32, #tpu.memory_space<vmem>>, vector<2x8x384xf32>,
    return
  }
  func.func @transform_0(%arg0: i32) -> (i32, i32, i32) {
    %c0_i32 = arith.constant 0 : i32
    %c0_i32_0 = arith.constant 0 : i32
    %c0_i32_1 = arith.constant 0 : i32
    return %arg0, %c0_i32, %c0_i32_0 : i32, i32, i32
  }
  func.func @transform_1(%arg0: i32) -> (i32, i32) {
    %c0_i32 = arith.constant 0 : i32
    %c0_i32_0 = arith.constant 0 : i32
    %c0_i32_1 = arith.constant 0 : i32
    return %c0_i32, %c0_i32_0 : i32, i32
  }
  func.func @transform_2(%arg0: i32) -> (i32, i32) {
    %c0_i32 = arith.constant 0 : i32
    %c0_i32_0 = arith.constant 0 : i32
    %c0_i32_1 = arith.constant 0 : i32
    return %c0_i32, %c0_i32_0 : i32, i32
  }
  func.func @transform_3(%arg0: i32) -> (i32, i32) {
    %c0_i32 = arith.constant 0 : i32
    %c0_i32_0 = arith.constant 0 : i32
    %c0_i32_1 = arith.constant 0 : i32
    return %c0_i32, %c0_i32_0 : i32, i32
  }
  func.func @transform_4(%arg0: i32) -> (i32, i32) {
    %c0_i32 = arith.constant 0 : i32
    %c0_i32_0 = arith.constant 0 : i32
    %c0_i32_1 = arith.constant 0 : i32
    return %c0_i32, %c0_i32_0 : i32, i32
  }
  func.func @transform_5(%arg0: i32) -> (i32, i32) {
    %c0_i32 = arith.constant 0 : i32
    %c0_i32_0 = arith.constant 0 : i32
    %c0_i32_1 = arith.constant 0 : i32
    return %c0_i32, %c0_i32_0 : i32, i32
  }
  func.func @transform_6(%arg0: i32) -> (i32, i32) {
    %c0_i32 = arith.constant 0 : i32
    %c0_i32_0 = arith.constant 0 : i32
    %c0_i32_1 = arith.constant 0 : i32
    return %c0_i32, %c0_i32_0 : i32, i32
  }
  func.func @transform_7(%arg0: i32) -> (i32, i32) {
    %c0_i32 = arith.constant 0 : i32
    %c0_i32_0 = arith.constant 0 : i32
    %c0_i32_1 = arith.constant 0 : i32
    return %c0_i32, %c0_i32_0 : i32, i32
  }
  func.func @transform_8(%arg0: i32) -> (i32, i32) {
    %c0_i32 = arith.constant 0 : i32
    %c0_i32_0 = arith.constant 0 : i32
    %c0_i32_1 = arith.constant 0 : i32
    return %c0_i32, %c0_i32_0 : i32, i32
  }
  func.func @transform_9(%arg0: i32) -> (i32, i32) {
    %c0_i32 = arith.constant 0 : i32
    %c0_i32_0 = arith.constant 0 : i32
    %c0_i32_1 = arith.constant 0 : i32
    return %c0_i32, %c0_i32_0 : i32, i32
  }
  func.func @transform_10(%arg0: i32) -> (i32, i32, i32) {
    %c0_i32 = arith.constant 0 : i32
    %c0_i32_0 = arith.constant 0 : i32
    %c0_i32_1 = arith.constant 0 : i32
    return %arg0, %c0_i32, %c0_i32_0 : i32, i32, i32
  }
}

</mosaic_0001>

<bundles_post_ra>
// kernel: tpu_custom_call.1
= control target key start
LH: loop header
LB: loop body
LE: loop exit
PB: predicated region body
PF: predicated region fallthrough
CT: control target
= control target key end

     0   :  { %15 = vsyncpa [#allocation3], 0  ;;  %s13127_s0 = inlined_call_operand.hbm [shape: f32[2,8,384], index: 0, kind: input, shape index: {}]   ;;  %s13128_s1 = inlined_call_operand.hbm [shape: f32[1,384], index: 1, kind: input, shape index: {}]   ;;  %s13129_s2 = inlined_call_operand.hbm [shape: f32[1,384], index: 2, kind: input, shape index: {}]   ;;  %s13130_s3 = inlined_call_operand.hbm [shape: bf16[384,1152], index: 3, kind: input, shape index: {}]   ;;  %s13131_s4 = inlined_call_operand.hbm [shape: bf16[384,384], index: 4, kind: input, shape index: {}]   ;;  %s13132_s5 = inlined_call_operand.hbm [shape: f32[1,384], index: 5, kind: input, shape index: {}]   ;;  %s13133_s6 = inlined_call_operand.hbm [shape: bf16[384,1536], index: 6, kind: input, shape index: {}]   ;;  %s13134_s7 = inlined_call_operand.hbm [shape: f32[1,1536], index: 7, kind: input, shape index: {}]   ;;  %s13135_s8 = inlined_call_operand.hbm [shape: bf16[1536,384], index: 8, kind: input, shape index: {}]   ;;  %s13136_s9 = inlined_call_operand.hbm [shape: f32[1,384], index: 9, kind: input, shape index: {}]   ;;  %s13137_s10 = inlined_call_operand.hbm [shape: f32[2,8,384], index: 10, kind: output, shape index: {}]  }
   0x1   :  { %16 = vsyncpa [#allocation6], 0 }
   0x2   :  { %17 = vsyncpa [#allocation9], 0 }
   0x3   :  { %18 = vsyncpa [#allocation12], 0 }
   0x4   :  { %19 = vsyncpa [#allocation15], 0 }
   0x5   :  { %20 = vsyncpa [#allocation18], 0 }
   0x6   :  { %21 = vsyncpa [#allocation4], 0  ;;  %s12240_s13 = smov [#allocation5]   ;;  %s12241_s15 = smov [#allocation8]  }
   0x7   :  { %s40_s14 = sshll.u32 %s12240_s13, 4  ;;  %s59_s16 = sshll.u32 %s12241_s15, 4  ;;  %s41_s14 = int_to_ptr.vmem [resolvable:$true] %s40_s14  ;;  %s60_s16 = int_to_ptr.vmem [resolvable:$true] %s59_s16 }
   0x8   :  { %s12014_s17 = scalar_lea.vmem %s41_s14, 48  ;;  %s12018_s18 = scalar_lea.vmem %s41_s14, 64 }
   0x9   :  { %p12015_p0 = scmp.ne.s32.totalorder %s41_s14, %s12014_s17  ;;  %p12019_p1 = scmp.lt.s32.totalorder %s41_s14, %s41_s14 }
   0xa   :  { %p12020_p2 = scmp.lt.s32.totalorder %s12018_s18, %s12014_s17 }
   0xc   :  { %p12021_p3 = por %p12020_p2, %p12019_p1 }
   0xe   :  { %p12022_p4 = pnand %p12021_p3, %p12015_p0 }
  0x10   :  { %12025 = shalt.err (!%p12022_p4)
}
  0x11   :  { %43 = dma.hbm_to_vmem [thread:$0]  %s13128_s1, 48, %s41_s14, [#allocation6]  }
  0x12   :  { %s12034_s21 = scalar_lea.vmem %s60_s16, 27648  ;;  %p12039_p6 = scmp.lt.s32.totalorder %s60_s16, %s60_s16 }
  0x13   :  { %p12035_p5 = scmp.ne.s32.totalorder %s60_s16, %s12034_s21  ;;  %p12040_p7 = scmp.lt.s32.totalorder %s12034_s21, %s12034_s21 }
  0x15   :  { %p12041_p8 = por %p12040_p7, %p12039_p6 }
  0x17   :  { %p12042_p9 = pnand %p12041_p8, %p12035_p5 }
  0x19   :  { %12045 = shalt.err (!%p12042_p9)
}
  0x1a   :  { %s12242_s22 = smov 576   ;;  %s12243_s23 = smov 36  }
  0x1b   :  { %65 = dma.hbm_to_vmem [thread:$0]  %s13130_s3, 27648, %s60_s16, [#allocation9], %s12242_s22, %s12242_s22, %s12243_s23  }
  0x1c   :  { %s12244_s26 = smov [#allocation11]   ;;  %s12245_s28 = smov [#allocation14]  }
  0x1d   :  { %s84_s27 = sshll.u32 %s12244_s26, 4  ;;  %s106_s29 = sshll.u32 %s12245_s28, 4  ;;  %s85_s27 = int_to_ptr.vmem [resolvable:$true] %s84_s27  ;;  %s107_s29 = int_to_ptr.vmem [resolvable:$true] %s106_s29 }
  0x1e   :  { %s12054_s1 = scalar_lea.vmem %s85_s27, 48  ;;  %s12058_s30 = scalar_lea.vmem %s85_s27, 64 }
  0x1f   :  { %p12055_p10 = scmp.ne.s32.totalorder %s85_s27, %s12054_s1  ;;  %p12059_p11 = scmp.lt.s32.totalorder %s85_s27, %s85_s27 }
  0x20   :  { %p12060_p12 = scmp.lt.s32.totalorder %s12058_s30, %s12054_s1 }
  0x22   :  { %p12061_p13 = por %p12060_p12, %p12059_p11 }
  0x24   :  { %p12062_p0 = pnand %p12061_p13, %p12055_p10 }
  0x26   :  { %12065 = shalt.err (!%p12062_p0)
}
  0x27   :  { %87 = dma.hbm_to_vmem [thread:$0]  %s13132_s5, 48, %s85_s27, [#allocation12]  }
  0x28   :  { %s12074_s13 = scalar_lea.vmem %s107_s29, 192  ;;  %p12079_p2 = scmp.lt.s32.totalorder %s107_s29, %s107_s29 }
  0x29   :  { %p12075_p1 = scmp.ne.s32.totalorder %s107_s29, %s12074_s13  ;;  %p12080_p3 = scmp.lt.s32.totalorder %s12074_s13, %s12074_s13 }
  0x2b   :  { %p12081_p4 = por %p12080_p3, %p12079_p2 }
  0x2d   :  { %p12082_p5 = pnand %p12081_p4, %p12075_p1 }
  0x2f   :  { %12085 = shalt.err (!%p12082_p5)
}
  0x30   :  { %109 = dma.hbm_to_vmem [thread:$0]  %s13134_s7, 192, %s107_s29, [#allocation15]  }
  0x31   :  { %s12246_s15 = smov [#allocation2]  }
  0x32   :  { %s27_s16 = sshll.u32 %s12246_s15, 4  ;;  %s28_s16 = int_to_ptr.vmem [resolvable:$true] %s27_s16 }
  0x33   :  { %s12094_s17 = scalar_lea.vmem %s28_s16, 768  ;;  %p12099_p7 = scmp.lt.s32.totalorder %s28_s16, %s28_s16 }
  0x34   :  { %p12095_p6 = scmp.ne.s32.totalorder %s28_s16, %s12094_s17  ;;  %p12100_p8 = scmp.lt.s32.totalorder %s12094_s17, %s12094_s17 }
  0x36   :  { %p12101_p9 = por %p12100_p8, %p12099_p7 }
  0x38   :  { %p12102_p10 = pnand %p12101_p9, %p12095_p6 }
  0x3a   :  { %12105 = shalt.err (!%p12102_p10)
}
  0x3b   :  { %s12247_s5 = smov 384   ;;  %s12248_s18 = smov 24  }
  0x3c   :  { %33 = dma.hbm_to_vmem [thread:$0]  %s13127_s0, 768, %s28_s16, [#allocation3], %s12247_s5, %s12247_s5, %s12248_s18  }
  0x3d   :  { %s12249_s7 = smov [#allocation7]   ;;  %s12250_s22 = smov [#allocation10]  }
  0x3e   :  { %s50_s21 = sshll.u32 %s12249_s7, 4  ;;  %s71_s23 = sshll.u32 %s12250_s22, 4  ;;  %s51_s21 = int_to_ptr.vmem [resolvable:$true] %s50_s21  ;;  %s72_s23 = int_to_ptr.vmem [resolvable:$true] %s71_s23 }
  0x3f   :  { %s12114_s24 = scalar_lea.vmem %s51_s21, 48  ;;  %s12118_s25 = scalar_lea.vmem %s51_s21, 64 }
  0x40   :  { %p12115_p11 = scmp.ne.s32.totalorder %s51_s21, %s12114_s24  ;;  %p12119_p12 = scmp.lt.s32.totalorder %s51_s21, %s51_s21 }
  0x41   :  { %p12120_p13 = scmp.lt.s32.totalorder %s12118_s25, %s12114_s24 }
  0x43   :  { %p12121_p0 = por %p12120_p13, %p12119_p12 }
  0x45   :  { %p12122_p1 = pnand %p12121_p0, %p12115_p11 }
  0x47   :  { %12125 = shalt.err (!%p12122_p1)
}
  0x48   :  { %53 = dma.hbm_to_vmem [thread:$0]  %s13129_s2, 48, %s51_s21, [#allocation6]  }
  0x49   :  { %s12134_s28 = scalar_lea.vmem %s72_s23, 9216  ;;  %p12139_p3 = scmp.lt.s32.totalorder %s72_s23, %s72_s23 }
  0x4a   :  { %p12135_p2 = scmp.ne.s32.totalorder %s72_s23, %s12134_s28  ;;  %p12140_p4 = scmp.lt.s32.totalorder %s12134_s28, %s12134_s28 }
  0x4c   :  { %p12141_p5 = por %p12140_p4, %p12139_p3 }
  0x4e   :  { %p12142_p6 = pnand %p12141_p5, %p12135_p2 }
  0x50   :  { %12145 = shalt.err (!%p12142_p6)
}
  0x51   :  { %s12251_s0 = smov 192   ;;  %s12252_s29 = smov 12  }
  0x52   :  { %77 = dma.hbm_to_vmem [thread:$0]  %s13131_s4, 9216, %s72_s23, [#allocation9], %s12251_s0, %s12251_s0, %s12252_s29  }
  0x53   :  { %s12253_s11 = smov [#allocation13]  }
  0x54   :  { %s93_s12 = sshll.u32 %s12253_s11, 4  ;;  %s94_s12 = int_to_ptr.vmem [resolvable:$true] %s93_s12 }
  0x55   :  { %s12154_s2 = scalar_lea.vmem %s94_s12, 36864  ;;  %p12159_p8 = scmp.lt.s32.totalorder %s94_s12, %s94_s12 }
  0x56   :  { %p12155_p7 = scmp.ne.s32.totalorder %s94_s12, %s12154_s2  ;;  %p12160_p9 = scmp.lt.s32.totalorder %s12154_s2, %s12154_s2 }
  0x58   :  { %p12161_p10 = por %p12160_p9, %p12159_p8 }
  0x5a   :  { %p12162_p11 = pnand %p12161_p10, %p12155_p7 }
  0x5c   :  { %12165 = shalt.err (!%p12162_p11)
}
  0x5d   :  { %s12254_s13 = smov 768   ;;  %s12255_s3 = smov 48  }
  0x5e   :  { %99 = dma.hbm_to_vmem [thread:$0]  %s13133_s6, 36864, %s94_s12, [#allocation12], %s12254_s13, %s12254_s13, %s12255_s3  }
  0x5f   :  { %s12256_s16 = smov [#allocation16]   ;;  %s12257_s19 = smov [#allocation17]  }
  0x60   :  { %s115_s17 = sshll.u32 %s12256_s16, 4  ;;  %s128_s4 = sshll.u32 %s12257_s19, 4  ;;  %s116_s17 = int_to_ptr.vmem [resolvable:$true] %s115_s17  ;;  %s129_s4 = int_to_ptr.vmem [resolvable:$true] %s128_s4 }
  0x61   :  { %s12174_s20 = scalar_lea.vmem %s116_s17, 36864  ;;  %p12179_p13 = scmp.lt.s32.totalorder %s116_s17, %s116_s17 }
  0x62   :  { %p12175_p12 = scmp.ne.s32.totalorder %s116_s17, %s12174_s20  ;;  %p12180_p0 = scmp.lt.s32.totalorder %s12174_s20, %s12174_s20 }
  0x64   :  { %p12181_p1 = por %p12180_p0, %p12179_p13 }
  0x66   :  { %p12182_p2 = pnand %p12181_p1, %p12175_p12 }
  0x68   :  { %12185 = shalt.err (!%p12182_p2)
}
  0x69   :  { %121 = dma.hbm_to_vmem [thread:$0]  %s13135_s8, 36864, %s116_s17, [#allocation15], %s12251_s0, %s12251_s0, %s12252_s29  }
  0x6a   :  { %s12194_s6 = scalar_lea.vmem %s129_s4, 48  ;;  %s12198_s22 = scalar_lea.vmem %s129_s4, 64 }
  0x6b   :  { %p12195_p3 = scmp.ne.s32.totalorder %s129_s4, %s12194_s6  ;;  %p12199_p4 = scmp.lt.s32.totalorder %s129_s4, %s129_s4 }
  0x6c   :  { %p12200_p5 = scmp.lt.s32.totalorder %s12198_s22, %s12194_s6 }
  0x6e   :  { %p12201_p6 = por %p12200_p5, %p12199_p4 }
  0x70   :  { %p12202_p7 = pnand %p12201_p6, %p12195_p3 }
  0x72   :  { %12205 = shalt.err (!%p12202_p7)
}
  0x73   :  { %131 = dma.hbm_to_vmem [thread:$0]  %s13136_s9, 48, %s129_s4, [#allocation18]  }
  0x74   :  { %12226 = dma.done.wait [#allocation3], 768  }
  0x75   :  { %12227 = vsyncadd [#allocation3], 4294966528 }
  0x76   :  { %12228 = dma.done.wait [#allocation6], 96  }
  0x77   :  { %12229 = vsyncadd [#allocation6], 4294967200 }
  0x78   :  { %12230 = dma.done.wait [#allocation9], 36864  }
  0x79   :  { %12231 = vsyncadd [#allocation9], 4294930432 }
  0x7a   :  { %12232 = dma.done.wait [#allocation12], 36912  }
  0x7b   :  { %12233 = vsyncadd [#allocation12], 4294930384 }
  0x7c   :  { %12234 = dma.done.wait [#allocation15], 37056  }
  0x7d   :  { %12235 = vsyncadd [#allocation15], 4294930240 }
  0x7e   :  { %12236 = dma.done.wait [#allocation18], 48  }
  0x7f   :  { %12237 = vsyncadd [#allocation18], 4294967248  ;;  %v163_v0 = vld [vmem:[#allocation2] sm:$0xff]  ;;  %v164_v1 = vld [vmem:[#allocation2 + $0x8] sm:$0xff]  ;;  %vm12260_vm0 = vmmov 0   ;;  %vm2138_vm1 = vcmask 523264  }
  0x80   :  { %v165_v2 = vld [vmem:[#allocation2 + $0x10] sm:$0xff]  ;;  %v171_v3 = vadd.f32 %v164_v1, %v163_v0  ;;  %v166_v4 = vld [vmem:[#allocation2 + $0x18] sm:$0xff]  ;;  %v167_v5 = vld [vmem:[#allocation2 + $0x20] sm:$0xff]  ;;  %vm2263_vm2 = vcmask 1043456   ;;  %vm2235_vm4 = vcmask 64512   ;;  %s12261_s8 = smov 64  }
  0x81   :  { %v168_v6 = vld [vmem:[#allocation2 + $0x28] sm:$0xff]  ;;  %v175_v7 = vadd.f32 %v167_v5, %v166_v4  ;;  %v10720_v10 = vld [vmem:[#allocation8 + $0x1fc] ss:$36 sps:$4 sm:$0xff]   ;;  %v10728_v15 = vld [vmem:[#allocation8 + $0x168] ss:$36 sps:$4 sm:$0xff]   ;;  %s12262_s9 = smov [#allocation19]  }
  0x82   :  { %v172_v8 = vadd.f32 %v171_v3, %v165_v2  ;;  %v10722_v11 = vld [vmem:[#allocation8 + $0x1f8] ss:$36 sps:$4 sm:$0xff]   ;;  %1605 = vmatprep.subr.bf16.mxu0 %v10720_v10  ;;  %v10725_v13 = vld [vmem:[#allocation8 + $0x1b0] ss:$36 sps:$4 sm:$0xff]   ;;  %v10729_v17 = vld [vmem:[#allocation8 + $0x124] ss:$36 sps:$4 sm:$0xff]  }
  0x83   :  { %v176_v9 = vadd.f32 %v175_v7, %v168_v6  ;;  %v10723_v12 = vld [vmem:[#allocation8 + $0x1b4] ss:$36 sps:$4 sm:$0xff]   ;;  %1606 = vmatpush1.bf16.msra.mxu0 %v10722_v11  ;;  %v10726_v14 = vld [vmem:[#allocation8 + $0x16c] ss:$36 sps:$4 sm:$0xff]   ;;  %v10744_v16 = vld [vmem:[#allocation8 + $0x67c] ss:$36 sps:$4 sm:$0xff]  }
  0x84   :  { %173 = vadd.xlane.f32.xlu0 %v172_v8  ;;  %1607 = vmatprep.subr.bf16.mxu0 %v10723_v12  ;;  %v10748_v18 = vld [vmem:[#allocation8 + $0x678] ss:$36 sps:$4 sm:$0xff]   ;;  %v10731_v19 = vld [vmem:[#allocation8 + $0x120] ss:$36 sps:$4 sm:$0xff]   ;;  %v10737_v23 = vld [vmem:[#allocation8 + $0x90] ss:$36 sps:$4 sm:$0xff]  }
  0x85   :  { %1648 = vmatprep.subr.bf16.mxu1 %v10744_v16  ;;  %v10732_v20 = vld [vmem:[#allocation8 + $0xdc] ss:$36 sps:$4 sm:$0xff]   ;;  %v10735_v22 = vld [vmem:[#allocation8 + $0x94] ss:$36 sps:$4 sm:$0xff]   ;;  %v10738_v24 = vld [vmem:[#allocation8 + $0x4c] ss:$36 sps:$4 sm:$0xff]  }
  0x86   :  { %1649 = vmatpush1.bf16.msra.mxu1 %v10748_v18  ;;  %v10734_v21 = vld [vmem:[#allocation8 + $0xd8] ss:$36 sps:$4 sm:$0xff]   ;;  %v10740_v25 = vld [vmem:[#allocation8 + $0x48] ss:$36 sps:$4 sm:$0xff]   ;;  %v10743_v27 = vld [vmem:[#allocation8] ss:$36 sps:$4 sm:$0xff]  }
  0x87   :  { %1608 = vmatpush1.bf16.msra.mxu0 %v10725_v13  ;;  %v10741_v26 = vld [vmem:[#allocation8 + $0x4] ss:$36 sps:$4 sm:$0xff]   ;;  %v10746_v28 = vld [vmem:[#allocation8 + $0x43c] ss:$36 sps:$4 sm:$0xff]   ;;  %v10750_v50 = vld [vmem:[#allocation8 + $0x634] ss:$36 sps:$4 sm:$0xff]  }
  0x88   :  { %177 = vadd.xlane.f32.xlu0 %v176_v9  ;;  %1609 = vmatprep.subr.bf16.mxu0 %v10726_v14  ;;  %v10749_v29 = vld [vmem:[#allocation8 + $0x438] ss:$36 sps:$4 sm:$0xff]   ;;  %v10754_v52 = vld [vmem:[#allocation8 + $0x630] ss:$36 sps:$4 sm:$0xff]   ;;  %v10760_v56 = vld [vmem:[#allocation8 + $0x5e8] ss:$36 sps:$4 sm:$0xff]  }
  0x89   :  { %v10752_v51 = vld [vmem:[#allocation8 + $0x3f4] ss:$36 sps:$4 sm:$0xff]   ;;  %1650 = vmatprep.subr.bf16.mxu1 %v10750_v50  ;;  %v10756_v54 = vld [vmem:[#allocation8 + $0x5ec] ss:$36 sps:$4 sm:$0xff]   ;;  %v10762_v58 = vld [vmem:[#allocation8 + $0x5a4] ss:$36 sps:$4 sm:$0xff]  }
  0x8a   :  { %v10755_v53 = vld [vmem:[#allocation8 + $0x3f0] ss:$36 sps:$4 sm:$0xff]   ;;  %1651 = vmatpush1.bf16.msra.mxu1 %v10754_v52  ;;  %v10761_v57 = vld [vmem:[#allocation8 + $0x3a8] ss:$36 sps:$4 sm:$0xff]   ;;  %v10766_v60 = vld [vmem:[#allocation8 + $0x5a0] ss:$36 sps:$4 sm:$0xff]  }
  0x8b   :  { %1610 = vmatpush1.bf16.msra.mxu0 %v10728_v15  ;;  %v10758_v55 = vld [vmem:[#allocation8 + $0x3ac] ss:$36 sps:$4 sm:$0xff]   ;;  %1652 = vmatprep.subr.bf16.mxu1 %v10756_v54  ;;  %v10764_v59 = vld [vmem:[#allocation8 + $0x364] ss:$36 sps:$4 sm:$0xff]   ;;  %v10768_v62 = vld [vmem:[#allocation8 + $0x55c] ss:$36 sps:$4 sm:$0xff]  }
  0x8c   :  { %1611 = vmatprep.subr.bf16.mxu0 %v10729_v17  ;;  %v10767_v61 = vld [vmem:[#allocation8 + $0x360] ss:$36 sps:$4 sm:$0xff]   ;;  %v10776_v3 = vld [vmem:[#allocation8 + $0x2d4] ss:$36 sps:$4 sm:$0xff]   ;;  %v10782_v7 = vld [vmem:[#allocation8 + $0x28c] ss:$36 sps:$4 sm:$0xff]  }
  0x8d   :  { %v10770_v63 = vld [vmem:[#allocation8 + $0x31c] ss:$36 sps:$4 sm:$0xff]   ;;  %v10784_v8 = vld [vmem:[#allocation8 + $0x4c8] ss:$36 sps:$4 sm:$0xff]   ;;  %v12258_v9 = vmov 0   ;;  %s9303_s25 = sshll.u32 %s12262_s9, 4  ;;  %s9304_s25 = int_to_ptr.vmem [resolvable:$true] %s9303_s25 }
  0x8e   :  { %1653 = vmatpush1.bf16.msra.mxu1 %v10760_v56  ;;  %1680 = vmatprep.mubr.bf16.mxu1 %v12258_v9  ;;  %v10785_v10 = vld [vmem:[#allocation8 + $0x288] ss:$36 sps:$4 sm:$0xff]   ;;  %v10790_v13 = vld [vmem:[#allocation8 + $0x480] ss:$36 sps:$4 sm:$0xff]   ;;  %s12206_s26 = scalar_lea.vmem %s9304_s25, 768  ;;  %p12211_p9 = scmp.lt.s32.totalorder %s9304_s25, %s9304_s25 }
  0x8f   :  { %1612 = vmatpush1.bf16.msra.mxu0 %v10731_v19  ;;  %1654 = vmatprep.subr.bf16.mxu1 %v10762_v58  ;;  %v10786_v11 = vld [vmem:[#allocation8 + $0x484] ss:$36 sps:$4 sm:$0xff]   ;;  %p12207_p8 = scmp.ne.s32.totalorder %s9304_s25, %s12206_s26  ;;  %p12212_p10 = scmp.lt.s32.totalorder %s12206_s26, %s12206_s26 }
  0x90   :  { %1613 = vmatprep.subr.bf16.mxu0 %v10732_v20  ;;  %v10788_v12 = vld [vmem:[#allocation8 + $0x244] ss:$36 sps:$4 sm:$0xff]  }
  0x91   :  { %v10791_v14 = vld [vmem:[#allocation8 + $0x240] ss:$36 sps:$4 sm:$0xff]   ;;  %p12213_p11 = por %p12212_p10, %p12211_p9 }
  0x92   :  { %1655 = vmatpush1.bf16.msra.mxu1 %v10766_v60  ;;  %v10794_v15 = vld [vmem:[#allocation8 + $0x204] ss:$36 sps:$4 sm:$0xff]   ;;  %v10800_v60 = vld [vmem:[#allocation8 + $0x1bc] ss:$36 sps:$4 sm:$0xff]  }
  0x93   :  { %1614 = vmatpush1.bf16.msra.mxu0 %v10734_v21  ;;  %1656 = vmatprep.subr.bf16.mxu1 %v10768_v62  ;;  %v10797_v16 = vld [vmem:[#allocation8 + $0x684] ss:$36 sps:$4 sm:$0xff]   ;;  %p12214_p12 = pnand %p12213_p11, %p12207_p8 }
  0x94   :  { %1615 = vmatprep.subr.bf16.mxu0 %v10735_v22 }
  0x97   :  { %1616 = vmatpush1.bf16.msra.mxu0 %v10737_v23  ;;  %v215_v23 = vlaneseq }
  0x98   :  { %1617 = vmatprep.subr.bf16.mxu0 %v10738_v24 }
  0x99   :  { %v12383_v24 = vshrl.u32 %v215_v23, 7 }
  0x9b   :  { %1618 = vmatpush1.bf16.msra.mxu0 %v10740_v25  ;;  %v12386_v25 = vsub.s32 1, %v12383_v24 }
  0x9c   :  { %1619 = vmatprep.subr.bf16.mxu0 %v10741_v26  ;;  %v12389_v26 = vsub.s32 2, %v12383_v24 }
  0x9f   :  { %1620 = vmatpush1.bf16.msra.mxu0 %v10743_v27  ;;  %v169_v27 = vld [vmem:[#allocation5] sm:$0x7] }
  0xa0   :  { %1621 = vmatprep.subr.bf16.mxu0 %v10746_v28  ;;  %v12392_v28 = vsub.s32 0, %v12383_v24 }
  0xa3   :  { %1622 = vmatpush2.bf16.msra.mxu0 %v10749_v29 }
  0xa4   :  { %1623 = vmatprep.subr.bf16.mxu0 %v10752_v51 }
  0xa7   :  { %1624 = vmatpush2.bf16.msra.mxu0 %v10755_v53 }
  0xa8   :  { %1625 = vmatprep.subr.bf16.mxu0 %v10758_v55  ;;  %v10795_v55 = vld [vmem:[#allocation8 + $0x680] ss:$36 sps:$4 sm:$0xff]  }
  0xab   :  { %1626 = vmatpush2.bf16.msra.mxu0 %v10761_v57 }
  0xac   :  { %1627 = vmatprep.subr.bf16.mxu0 %v10764_v59 }
  0xaf   :  { %1628 = vmatpush2.bf16.msra.mxu0 %v10767_v61  ;;  %v10803_v61 = vld [vmem:[#allocation8 + $0x63c] ss:$36 sps:$4 sm:$0xff]  }
  0xb0   :  { %1629 = vmatprep.subr.bf16.mxu0 %v10770_v63  ;;  %v10798_v63 = vld [vmem:[#allocation8 + $0x1b8] ss:$36 sps:$4 sm:$0xff]  }
 0x10d   :  { %v174_v30 = vpop.xlane.xlu0 %173 }
 0x10e   :  { %v180_v31 = vmul.f32 0.0026041667, %v174_v30  ;;  %v170_v30 = vld [vmem:[#allocation7] sm:$0x7] }
 0x110   :  { %v12357_v32 = vsub.f32 %v163_v0, %v180_v31  ;;  %v12359_v33 = vsub.f32 %v164_v1, %v180_v31  ;;  %v12361_v34 = vsub.f32 %v165_v2, %v180_v31  ;;  %v10772_v0 = vld [vmem:[#allocation8 + $0x558] ss:$36 sps:$4 sm:$0xff]  }
 0x111   :  { %v178_v35 = vpop.xlane.xlu0 %177  ;;  %v10773_v1 = vld [vmem:[#allocation8 + $0x318] ss:$36 sps:$4 sm:$0xff]   ;;  %1657 = vmatpush1.bf16.msra.mxu1 %v10772_v0 }
 0x112   :  { %v181_v36 = vmul.f32 0.0026041667, %v178_v35  ;;  %v188_v37 = vmul.f32 %v12357_v32, %v12357_v32  ;;  %v189_v38 = vmul.f32 %v12359_v33, %v12359_v33  ;;  %v190_v39 = vmul.f32 %v12361_v34, %v12361_v34  ;;  %v10774_v2 = vld [vmem:[#allocation8 + $0x514] ss:$36 sps:$4 sm:$0xff]   ;;  %1630 = vmatpush2.bf16.msra.mxu0 %v10773_v1 }
 0x113   :  { %1658 = vmatprep.subr.bf16.mxu1 %v10774_v2  ;;  %1631 = vmatprep.subr.bf16.mxu0 %v10776_v3  ;;  %v12396_v35 = vrot.slane %v169_v27, %v12386_v25  ;;  %v10801_v0 = vld [vmem:[#allocation8 + $0x638] ss:$36 sps:$4 sm:$0xff]   ;;  %v10804_v3 = vld [vmem:[#allocation8 + $0x170] ss:$36 sps:$4 sm:$0xff]  }
 0x114   :  { %v12369_v40 = vsub.f32 %v166_v4, %v181_v36  ;;  %v12371_v41 = vsub.f32 %v167_v5, %v181_v36  ;;  %v12373_v42 = vsub.f32 %v168_v6, %v181_v36  ;;  %v194_v43 = vadd.f32 %v189_v38, %v188_v37  ;;  %v10778_v4 = vld [vmem:[#allocation8 + $0x510] ss:$36 sps:$4 sm:$0xff]  }
 0x115   :  { %v10779_v5 = vld [vmem:[#allocation8 + $0x2d0] ss:$36 sps:$4 sm:$0xff]   ;;  %1659 = vmatpush1.bf16.msra.mxu1 %v10778_v4  ;;  %v12400_v37 = vrot.slane %v169_v27, %v12389_v26 }
 0x116   :  { %v195_v44 = vadd.f32 %v194_v43, %v190_v39  ;;  %v191_v45 = vmul.f32 %v12369_v40, %v12369_v40  ;;  %v192_v46 = vmul.f32 %v12371_v41, %v12371_v41  ;;  %v193_v47 = vmul.f32 %v12373_v42, %v12373_v42  ;;  %v10780_v6 = vld [vmem:[#allocation8 + $0x4cc] ss:$36 sps:$4 sm:$0xff]   ;;  %1632 = vmatpush2.bf16.msra.mxu0 %v10779_v5  ;;  %v10806_v1 = vld [vmem:[#allocation8 + $0x174] ss:$36 sps:$4 sm:$0xff]  }
 0x117   :  { %1660 = vmatprep.subr.bf16.mxu1 %v10780_v6  ;;  %1633 = vmatprep.subr.bf16.mxu0 %v10782_v7  ;;  %v12404_v39 = vrot.slane %v169_v27, %v12392_v28  ;;  %v10809_v2 = vld [vmem:[#allocation8 + $0x5f4] ss:$36 sps:$4 sm:$0xff]   ;;  %v10812_v5 = vld [vmem:[#allocation8 + $0x12c] ss:$36 sps:$4 sm:$0xff]  }
 0x118   :  { %196 = vadd.xlane.f32.xlu1 %v195_v44  ;;  %v198_v48 = vadd.f32 %v192_v46, %v191_v45  ;;  %v12407_v44 = vrot.slane %v170_v30, %v12386_v25  ;;  %v12410_v45 = vrot.slane %v170_v30, %v12389_v26  ;;  %v10807_v4 = vld [vmem:[#allocation8 + $0x5f0] ss:$36 sps:$4 sm:$0xff]   ;;  %v10810_v7 = vld [vmem:[#allocation8 + $0x128] ss:$36 sps:$4 sm:$0xff]  }
 0x119   :  { %1661 = vmatpush1.bf16.msra.mxu1 %v10784_v8  ;;  %v10815_v6 = vld [vmem:[#allocation8 + $0x5ac] ss:$36 sps:$4 sm:$0xff]  }
 0x11a   :  { %v199_v49 = vadd.f32 %v198_v48, %v193_v47  ;;  %1634 = vmatpush2.bf16.msra.mxu0 %v10785_v10  ;;  %1662 = vmatprep.subr.bf16.mxu1 %v10786_v11  ;;  %v10813_v8 = vld [vmem:[#allocation8 + $0x5a8] ss:$36 sps:$4 sm:$0xff]  }
 0x11b   :  { %1635 = vmatprep.subr.bf16.mxu0 %v10788_v12  ;;  %v10818_v10 = vld [vmem:[#allocation8 + $0xe4] ss:$36 sps:$4 sm:$0xff]   ;;  %v10839_v27 = vld [vmem:[#allocation8 + $0x48c] ss:$36 sps:$4 sm:$0xff]  }
 0x11c   :  { %200 = vadd.xlane.f32.xlu1 %v199_v49  ;;  %v12419_v49 = vrot.slane %v170_v30, %v12392_v28  ;;  %v10821_v11 = vld [vmem:[#allocation8 + $0x564] ss:$36 sps:$4 sm:$0xff]  }
 0x11d   :  { %1663 = vmatpush1.bf16.msra.mxu1 %v10790_v13  ;;  %v10816_v12 = vld [vmem:[#allocation8 + $0xe0] ss:$36 sps:$4 sm:$0xff]   ;;  %v10837_v30 = vld [vmem:[#allocation8 + $0x488] ss:$36 sps:$4 sm:$0xff]  }
 0x11e   :  { %1636 = vmatpush2.bf16.msra.mxu0 %v10791_v14  ;;  %1691 = vmatprep.subr.bf16.mxu1 %v10794_v15  ;;  %v10819_v13 = vld [vmem:[#allocation8 + $0x560] ss:$36 sps:$4 sm:$0xff]  }
 0x11f   :  { %1734 = vmatprep.subr.bf16.mxu0 %v10797_v16  ;;  %v10824_v14 = vld [vmem:[#allocation8 + $0x9c] ss:$36 sps:$4 sm:$0xff]  }
 0x120   :  { %v10827_v15 = vld [vmem:[#allocation8 + $0x51c] ss:$36 sps:$4 sm:$0xff]  }
 0x121   :  { %v10822_v16 = vld [vmem:[#allocation8 + $0x98] ss:$36 sps:$4 sm:$0xff]  }
 0x1a1   :  { %v197_v17 = vpop.xlane.xlu1 %196 }
 0x1a2   :  { %v202_v18 = vmul.f32 0.0026041667, %v197_v17  ;;  %v10825_v17 = vld [vmem:[#allocation8 + $0x518] ss:$36 sps:$4 sm:$0xff]  }
 0x1a4   :  { %v204_v19 = vadd.f32 1e-05, %v202_v18  ;;  %v10830_v18 = vld [vmem:[#allocation8 + $0x54] ss:$36 sps:$4 sm:$0xff]  }
 0x1a5   :  { %v201_v20 = vpop.xlane.xlu1 %200 }
 0x1a6   :  { %11944 = vrsqrt.f32 %v204_v19  ;;  %v203_v21 = vmul.f32 0.0026041667, %v201_v20  ;;  %v10833_v19 = vld [vmem:[#allocation8 + $0x4d4] ss:$36 sps:$4 sm:$0xff]  }
 0x1a7   :  { %v10828_v20 = vld [vmem:[#allocation8 + $0x50] ss:$36 sps:$4 sm:$0xff]  }
 0x1a8   :  { %v205_v22 = vadd.f32 1e-05, %v203_v21  ;;  %v10831_v21 = vld [vmem:[#allocation8 + $0x4d0] ss:$36 sps:$4 sm:$0xff]  }
 0x1aa   :  { %11946 = vrsqrt.f32 %v205_v22  ;;  %v10836_v22 = vld [vmem:[#allocation8 + $0xc] ss:$36 sps:$4 sm:$0xff]  }
 0x1b3   :  { %v11945_v29 = vpop.eup %11944 }
 0x1b4   :  { %v209_v31 = vmul.f32 %v11945_v29, %v12359_v33  ;;  %v210_v36 = vmul.f32 %v11945_v29, %v12361_v34  ;;  %v208_v38 = vmul.f32 %v11945_v29, %v12357_v32  ;;  %v10834_v29 = vld [vmem:[#allocation8 + $0x8] ss:$36 sps:$4 sm:$0xff]  }
 0x1b6   :  { %v231_v46 = vmul.f32 %v12396_v35, %v209_v31  ;;  %v232_v47 = vmul.f32 %v12400_v37, %v210_v36  ;;  %v230_v48 = vmul.f32 %v12404_v39, %v208_v38  ;;  %v10842_v31 = vld [vmem:[#allocation8 + $0x444] ss:$36 sps:$4 sm:$0xff]   ;;  %v10845_v36 = vld [vmem:[#allocation8 + $0x20c] ss:$36 sps:$4 sm:$0xff]  }
 0x1b7   :  { %v11947_v43 = vpop.eup %11946  ;;  %v10840_v38 = vld [vmem:[#allocation8 + $0x440] ss:$36 sps:$4 sm:$0xff]  }
 0x1b8   :  { %v212_v33 = vmul.f32 %v11947_v43, %v12371_v41  ;;  %v213_v34 = vmul.f32 %v11947_v43, %v12373_v42  ;;  %v211_v32 = vmul.f32 %v11947_v43, %v12369_v40  ;;  %v10792_v41 = vld [vmem:[#allocation8 + $0x200] ss:$36 sps:$4 sm:$0xff]   ;;  %v253_v53 = vadd.f32 %v12407_v44, %v231_v46  ;;  %v10843_v43 = vld [vmem:[#allocation8 + $0x208] ss:$36 sps:$4 sm:$0xff]  }
 0x1b9   :  { %v254_v54 = vadd.f32 %v12410_v45, %v232_v47  ;;  %v252_v56 = vadd.f32 %v12419_v49, %v230_v48  ;;  %v10851_v46 = vld [vmem:[#allocation8 + $0x1c4] ss:$36 sps:$4 sm:$0xff]   ;;  %v10857_v48 = vld [vmem:[#allocation8 + $0x17c] ss:$36 sps:$4 sm:$0xff]  }
 0x1ba   :  { %v234_v50 = vmul.f32 %v12396_v35, %v212_v33  ;;  %v235_v51 = vmul.f32 %v12400_v37, %v213_v34  ;;  %v233_v52 = vmul.f32 %v12404_v39, %v211_v32  ;;  %v10848_v33 = vld [vmem:[#allocation8 + $0x3fc] ss:$36 sps:$4 sm:$0xff]   ;;  %v10854_v32 = vld [vmem:[#allocation8 + $0x3b4] ss:$36 sps:$4 sm:$0xff]  }
 0x1bb   :  { %v10846_v34 = vld [vmem:[#allocation8 + $0x3f8] ss:$36 sps:$4 sm:$0xff]   ;;  %v10849_v47 = vld [vmem:[#allocation8 + $0x1c0] ss:$36 sps:$4 sm:$0xff]  }
 0x1bc   :  { %v256_v42 = vadd.f32 %v12407_v44, %v234_v50  ;;  %v257_v40 = vadd.f32 %v12410_v45, %v235_v51  ;;  %v255_v57 = vadd.f32 %v12419_v49, %v233_v52  ;;  %v10852_v50 = vld [vmem:[#allocation8 + $0x3b0] ss:$36 sps:$4 sm:$0xff]   ;;  %v10855_v51 = vld [vmem:[#allocation8 + $0x178] ss:$36 sps:$4 sm:$0xff]  }
 0x1bd   :  { %v10860_v52 = vld [vmem:[#allocation8 + $0x36c] ss:$36 sps:$4 sm:$0xff]  }
 0x1be   :  { %v12430_v58 = vpack.c.bf16 %v256_v42, %v253_v53  ;;  %v12432_v59 = vpack.c.bf16 %v257_v40, %v254_v54  ;;  %v12434_v62 = vpack.c.bf16 %v255_v57, %v252_v56  ;;  %v10858_v53 = vld [vmem:[#allocation8 + $0x368] ss:$36 sps:$4 sm:$0xff]   ;;  %v10861_v42 = vld [vmem:[#allocation8 + $0x130] ss:$36 sps:$4 sm:$0xff]   ;;  %v10872_v57 = vld [vmem:[#allocation8 + $0x2dc] ss:$36 sps:$4 sm:$0xff]  }
 0x1bf   :  { %v10866_v54 = vld [vmem:[#allocation8 + $0x324] ss:$36 sps:$4 sm:$0xff]   ;;  %v10869_v40 = vld [vmem:[#allocation8 + $0xec] ss:$36 sps:$4 sm:$0xff]  }
 0x1c0   :  { %1637 = vmatprep.mubr.bf16.mxu0 %v12430_v58  ;;  %1681 = vmatmul.mubr.bf16.vlgmr.msra.gmra.mxu1 %v12432_v59  ;;  %v10867_v56 = vld [vmem:[#allocation8 + $0xe8] ss:$36 sps:$4 sm:$0xff]  }
 0x1c1   :  { %1692 = vmatpush1.bf16.msra.mxu1 %v10792_v41  ;;  %1638 = vmatmul.mubr.bf16.vlgmr.msra.gmra.mxu0 %v12434_v62  ;;  %v10863_v41 = vld [vmem:[#allocation8 + $0x134] ss:$36 sps:$4 sm:$0xff]  }
 0x1c2   :  { %1723 = vmatprep.mubr.bf16.mxu1 %v12430_v58  ;;  %1735 = vmatpush1.bf16.msra.mxu0 %v10795_v55  ;;  %v10864_v55 = vld [vmem:[#allocation8 + $0x320] ss:$36 sps:$4 sm:$0xff]  }
 0x1c3   :  { %1693 = vmatprep.subr.bf16.mxu1 %v10800_v60  ;;  %1736 = vmatprep.subr.bf16.mxu0 %v10803_v61  ;;  %v10875_v60 = vld [vmem:[#allocation8 + $0xa4] ss:$36 sps:$4 sm:$0xff]   ;;  %v10870_v61 = vld [vmem:[#allocation8 + $0x2d8] ss:$36 sps:$4 sm:$0xff]  }
 0x1c4   :  { %1766 = vmatprep.mubr.bf16.mxu0 %v12258_v9 }
 0x1c5   :  { %1694 = vmatpush1.bf16.msra.mxu1 %v10798_v63  ;;  %v10873_v63 = vld [vmem:[#allocation8 + $0xa0] ss:$36 sps:$4 sm:$0xff]  }
 0x1c6   :  { %1737 = vmatpush1.bf16.msra.mxu0 %v10801_v0  ;;  %1695 = vmatprep.subr.bf16.mxu1 %v10806_v1  ;;  %v10878_v0 = vld [vmem:[#allocation8 + $0x294] ss:$36 sps:$4 sm:$0xff]   ;;  %v10881_v1 = vld [vmem:[#allocation8 + $0x5c] ss:$36 sps:$4 sm:$0xff]  }
 0x1c7   :  { %1738 = vmatprep.subr.bf16.mxu0 %v10809_v2  ;;  %v10876_v2 = vld [vmem:[#allocation8 + $0x290] ss:$36 sps:$4 sm:$0xff]  }
 0x1c9   :  { %1696 = vmatpush1.bf16.msra.mxu1 %v10804_v3  ;;  %v10879_v3 = vld [vmem:[#allocation8 + $0x58] ss:$36 sps:$4 sm:$0xff]  }
 0x1ca   :  { %1739 = vmatpush1.bf16.msra.mxu0 %v10807_v4  ;;  %1697 = vmatprep.subr.bf16.mxu1 %v10812_v5  ;;  %v10884_v4 = vld [vmem:[#allocation8 + $0x24c] ss:$36 sps:$4 sm:$0xff]   ;;  %v10887_v5 = vld [vmem:[#allocation8 + $0x14] ss:$36 sps:$4 sm:$0xff]  }
 0x1cb   :  { %1740 = vmatprep.subr.bf16.mxu0 %v10815_v6  ;;  %v10882_v6 = vld [vmem:[#allocation8 + $0x248] ss:$36 sps:$4 sm:$0xff]  }
 0x1cd   :  { %1698 = vmatpush1.bf16.msra.mxu1 %v10810_v7  ;;  %v10885_v7 = vld [vmem:[#allocation8 + $0x10] ss:$36 sps:$4 sm:$0xff]  }
 0x1ce   :  { %1741 = vmatpush1.bf16.msra.mxu0 %v10813_v8  ;;  %1699 = vmatprep.subr.bf16.mxu1 %v10818_v10  ;;  %v10890_v8 = vld [vmem:[#allocation8 + $0x68c] ss:$36 sps:$4 sm:$0xff]  }
 0x1cf   :  { %1742 = vmatprep.subr.bf16.mxu0 %v10821_v11  ;;  %v10893_v10 = vld [vmem:[#allocation8 + $0x44c] ss:$36 sps:$4 sm:$0xff]  }
 0x1d0   :  { %v10888_v11 = vld [vmem:[#allocation8 + $0x688] ss:$36 sps:$4 sm:$0xff]  }
 0x1d1   :  { %1700 = vmatpush1.bf16.msra.mxu1 %v10816_v12  ;;  %v10891_v12 = vld [vmem:[#allocation8 + $0x448] ss:$36 sps:$4 sm:$0xff]  }
 0x1d2   :  { %1743 = vmatpush1.bf16.msra.mxu0 %v10819_v13  ;;  %1701 = vmatprep.subr.bf16.mxu1 %v10824_v14  ;;  %v10896_v13 = vld [vmem:[#allocation8 + $0x644] ss:$36 sps:$4 sm:$0xff]  }
 0x1d3   :  { %1744 = vmatprep.subr.bf16.mxu0 %v10827_v15  ;;  %v10899_v14 = vld [vmem:[#allocation8 + $0x404] ss:$36 sps:$4 sm:$0xff]  }
 0x1d4   :  { %v10894_v15 = vld [vmem:[#allocation8 + $0x640] ss:$36 sps:$4 sm:$0xff]  }
 0x1d5   :  { %1702 = vmatpush1.bf16.msra.mxu1 %v10822_v16  ;;  %v10897_v16 = vld [vmem:[#allocation8 + $0x400] ss:$36 sps:$4 sm:$0xff]  }
 0x1d6   :  { %1745 = vmatpush1.bf16.msra.mxu0 %v10825_v17  ;;  %1703 = vmatprep.subr.bf16.mxu1 %v10830_v18  ;;  %v10902_v17 = vld [vmem:[#allocation8 + $0x5fc] ss:$36 sps:$4 sm:$0xff]  }
 0x1d7   :  { %1746 = vmatprep.subr.bf16.mxu0 %v10833_v19  ;;  %v10905_v18 = vld [vmem:[#allocation8 + $0x3bc] ss:$36 sps:$4 sm:$0xff]  }
 0x1d8   :  { %v10900_v19 = vld [vmem:[#allocation8 + $0x5f8] ss:$36 sps:$4 sm:$0xff]  }
 0x1d9   :  { %1704 = vmatpush1.bf16.msra.mxu1 %v10828_v20  ;;  %v10903_v20 = vld [vmem:[#allocation8 + $0x3b8] ss:$36 sps:$4 sm:$0xff]  }
 0x1da   :  { %1747 = vmatpush1.bf16.msra.mxu0 %v10831_v21  ;;  %1705 = vmatprep.subr.bf16.mxu1 %v10836_v22  ;;  %v10908_v21 = vld [vmem:[#allocation8 + $0x5b4] ss:$36 sps:$4 sm:$0xff]  }
 0x1db   :  { %1748 = vmatprep.subr.bf16.mxu0 %v10839_v27  ;;  %v10911_v22 = vld [vmem:[#allocation8 + $0x374] ss:$36 sps:$4 sm:$0xff]  }
 0x1dc   :  { %v10906_v27 = vld [vmem:[#allocation8 + $0x5b0] ss:$36 sps:$4 sm:$0xff]  }
 0x1dd   :  { %1706 = vmatpush1.bf16.msra.mxu1 %v10834_v29  ;;  %v10909_v29 = vld [vmem:[#allocation8 + $0x370] ss:$36 sps:$4 sm:$0xff]  }
 0x1de   :  { %1749 = vmatpush1.bf16.msra.mxu0 %v10837_v30  ;;  %1707 = vmatprep.subr.bf16.mxu1 %v10842_v31  ;;  %v10914_v30 = vld [vmem:[#allocation8 + $0x56c] ss:$36 sps:$4 sm:$0xff]  }
 0x1df   :  { %1777 = vmatprep.subr.bf16.mxu0 %v10845_v36  ;;  %v10917_v31 = vld [vmem:[#allocation8 + $0x32c] ss:$36 sps:$4 sm:$0xff]  }
 0x1e0   :  { %v10912_v36 = vld [vmem:[#allocation8 + $0x568] ss:$36 sps:$4 sm:$0xff]  }
 0x1e1   :  { %1708 = vmatpush2.bf16.msra.mxu1 %v10840_v38  ;;  %1767 = vmatmul.mubr.bf16.vlgmr.msra.gmra.mxu0 %v12432_v59  ;;  %v10915_v38 = vld [vmem:[#allocation8 + $0x328] ss:$36 sps:$4 sm:$0xff]  }
 0x1e2   :  { %1778 = vmatpush1.bf16.msra.mxu0 %v10843_v43  ;;  %1809 = vmatprep.mubr.bf16.mxu0 %v12430_v58  ;;  %v10920_v43 = vld [vmem:[#allocation8 + $0x524] ss:$36 sps:$4 sm:$0xff]  }
 0x1e3   :  { %1709 = vmatprep.subr.bf16.mxu1 %v10848_v33  ;;  %1779 = vmatprep.subr.bf16.mxu0 %v10851_v46  ;;  %v10923_v33 = vld [vmem:[#allocation8 + $0x2e4] ss:$36 sps:$4 sm:$0xff]  }
 0x1e4   :  { %v10918_v46 = vld [vmem:[#allocation8 + $0x520] ss:$36 sps:$4 sm:$0xff]  }
 0x1e5   :  { %1710 = vmatpush2.bf16.msra.mxu1 %v10846_v34  ;;  %v10921_v34 = vld [vmem:[#allocation8 + $0x2e0] ss:$36 sps:$4 sm:$0xff]  }
 0x1e6   :  { %1780 = vmatpush1.bf16.msra.mxu0 %v10849_v47  ;;  %1711 = vmatprep.subr.bf16.mxu1 %v10854_v32  ;;  %v10926_v47 = vld [vmem:[#allocation8 + $0x4dc] ss:$36 sps:$4 sm:$0xff]  }
 0x1e7   :  { %1781 = vmatprep.subr.bf16.mxu0 %v10857_v48  ;;  %v10929_v32 = vld [vmem:[#allocation8 + $0x29c] ss:$36 sps:$4 sm:$0xff]  }
 0x1e8   :  { %v10924_v48 = vld [vmem:[#allocation8 + $0x4d8] ss:$36 sps:$4 sm:$0xff]  }
 0x1e9   :  { %1712 = vmatpush2.bf16.msra.mxu1 %v10852_v50  ;;  %v10927_v50 = vld [vmem:[#allocation8 + $0x298] ss:$36 sps:$4 sm:$0xff]  }
 0x1ea   :  { %1782 = vmatpush1.bf16.msra.mxu0 %v10855_v51  ;;  %1713 = vmatprep.subr.bf16.mxu1 %v10860_v52  ;;  %v10932_v51 = vld [vmem:[#allocation8 + $0x494] ss:$36 sps:$4 sm:$0xff]  }
 0x1eb   :  { %1783 = vmatprep.subr.bf16.mxu0 %v10863_v41  ;;  %v10935_v52 = vld [vmem:[#allocation8 + $0x254] ss:$36 sps:$4 sm:$0xff]  }
 0x1ec   :  { %v10930_v41 = vld [vmem:[#allocation8 + $0x490] ss:$36 sps:$4 sm:$0xff]  }
 0x1ed   :  { %1714 = vmatpush2.bf16.msra.mxu1 %v10858_v53  ;;  %v10933_v53 = vld [vmem:[#allocation8 + $0x250] ss:$36 sps:$4 sm:$0xff]  }
 0x1ee   :  { %1784 = vmatpush1.bf16.msra.mxu0 %v10861_v42  ;;  %1715 = vmatprep.subr.bf16.mxu1 %v10866_v54  ;;  %v10938_v42 = vld [vmem:[#allocation8 + $0x214] ss:$36 sps:$4 sm:$0xff]  }
 0x1ef   :  { %1785 = vmatprep.subr.bf16.mxu0 %v10869_v40  ;;  %v10941_v54 = vld [vmem:[#allocation8 + $0x694] ss:$36 sps:$4 sm:$0xff]  }
 0x1f0   :  { %v10936_v40 = vld [vmem:[#allocation8 + $0x210] ss:$36 sps:$4 sm:$0xff]  }
 0x1f1   :  { %1716 = vmatpush2.bf16.msra.mxu1 %v10864_v55  ;;  %v10939_v55 = vld [vmem:[#allocation8 + $0x690] ss:$36 sps:$4 sm:$0xff]  }
 0x1f2   :  { %1786 = vmatpush1.bf16.msra.mxu0 %v10867_v56  ;;  %1717 = vmatprep.subr.bf16.mxu1 %v10872_v57  ;;  %v10944_v56 = vld [vmem:[#allocation8 + $0x1cc] ss:$36 sps:$4 sm:$0xff]  }
 0x1f3   :  { %1787 = vmatprep.subr.bf16.mxu0 %v10875_v60  ;;  %v10947_v57 = vld [vmem:[#allocation8 + $0x64c] ss:$36 sps:$4 sm:$0xff]  }
 0x1f4   :  { %v10942_v60 = vld [vmem:[#allocation8 + $0x1c8] ss:$36 sps:$4 sm:$0xff]  }
 0x1f5   :  { %1718 = vmatpush2.bf16.msra.mxu1 %v10870_v61  ;;  %v10945_v61 = vld [vmem:[#allocation8 + $0x648] ss:$36 sps:$4 sm:$0xff]  }
 0x1f6   :  { %1788 = vmatpush1.bf16.msra.mxu0 %v10873_v63  ;;  %1719 = vmatprep.subr.bf16.mxu1 %v10878_v0  ;;  %v10950_v63 = vld [vmem:[#allocation8 + $0x184] ss:$36 sps:$4 sm:$0xff]  }
 0x1f7   :  { %1789 = vmatprep.subr.bf16.mxu0 %v10881_v1  ;;  %v10953_v0 = vld [vmem:[#allocation8 + $0x604] ss:$36 sps:$4 sm:$0xff]  }
 0x1f8   :  { %v10948_v1 = vld [vmem:[#allocation8 + $0x180] ss:$36 sps:$4 sm:$0xff]  }
 0x1f9   :  { %1720 = vmatpush2.bf16.msra.mxu1 %v10876_v2  ;;  %v10951_v2 = vld [vmem:[#allocation8 + $0x600] ss:$36 sps:$4 sm:$0xff]  }
 0x1fa   :  { %1790 = vmatpush1.bf16.msra.mxu0 %v10879_v3  ;;  %1721 = vmatprep.subr.bf16.mxu1 %v10884_v4  ;;  %v10956_v3 = vld [vmem:[#allocation8 + $0x13c] ss:$36 sps:$4 sm:$0xff]  }
 0x1fb   :  { %1791 = vmatprep.subr.bf16.mxu0 %v10887_v5  ;;  %v10959_v4 = vld [vmem:[#allocation8 + $0x5bc] ss:$36 sps:$4 sm:$0xff]  }
 0x1fc   :  { %v10954_v5 = vld [vmem:[#allocation8 + $0x138] ss:$36 sps:$4 sm:$0xff]  }
 0x1fd   :  { %1722 = vmatpush2.bf16.msra.mxu1 %v10882_v6  ;;  %v10957_v6 = vld [vmem:[#allocation8 + $0x5b8] ss:$36 sps:$4 sm:$0xff]  }
 0x1fe   :  { %1792 = vmatpush1.bf16.msra.mxu0 %v10885_v7  ;;  %1820 = vmatprep.subr.bf16.mxu1 %v10890_v8  ;;  %v10962_v7 = vld [vmem:[#allocation8 + $0xf4] ss:$36 sps:$4 sm:$0xff]  }
 0x1ff   :  { %1793 = vmatprep.subr.bf16.mxu0 %v10893_v10  ;;  %v10965_v8 = vld [vmem:[#allocation8 + $0x574] ss:$36 sps:$4 sm:$0xff]  }
 0x200   :  { %1724 = vmatmul.mubr.bf16.vlgmr.msra.gmra.mxu1 %v12434_v62  ;;  %v10960_v10 = vld [vmem:[#allocation8 + $0xf0] ss:$36 sps:$4 sm:$0xff]  }
 0x201   :  { %1821 = vmatpush1.bf16.msra.mxu1 %v10888_v11  ;;  %1852 = vmatprep.mubr.bf16.mxu1 %v12258_v9  ;;  %v10963_v11 = vld [vmem:[#allocation8 + $0x570] ss:$36 sps:$4 sm:$0xff]  }
 0x202   :  { %1794 = vmatpush2.bf16.msra.mxu0 %v10891_v12  ;;  %1822 = vmatprep.subr.bf16.mxu1 %v10896_v13  ;;  %v10968_v12 = vld [vmem:[#allocation8 + $0xac] ss:$36 sps:$4 sm:$0xff]  }
 0x203   :  { %1795 = vmatprep.subr.bf16.mxu0 %v10899_v14  ;;  %v10971_v13 = vld [vmem:[#allocation8 + $0x52c] ss:$36 sps:$4 sm:$0xff]  }
 0x204   :  { %v10966_v14 = vld [vmem:[#allocation8 + $0xa8] ss:$36 sps:$4 sm:$0xff]  }
 0x205   :  { %1823 = vmatpush1.bf16.msra.mxu1 %v10894_v15  ;;  %v10969_v15 = vld [vmem:[#allocation8 + $0x528] ss:$36 sps:$4 sm:$0xff]  }
 0x206   :  { %1796 = vmatpush2.bf16.msra.mxu0 %v10897_v16  ;;  %1824 = vmatprep.subr.bf16.mxu1 %v10902_v17  ;;  %v10974_v16 = vld [vmem:[#allocation8 + $0x64] ss:$36 sps:$4 sm:$0xff]  }
 0x207   :  { %1797 = vmatprep.subr.bf16.mxu0 %v10905_v18  ;;  %v10977_v17 = vld [vmem:[#allocation8 + $0x4e4] ss:$36 sps:$4 sm:$0xff]  }
 0x208   :  { %v10972_v18 = vld [vmem:[#allocation8 + $0x60] ss:$36 sps:$4 sm:$0xff]  }
 0x209   :  { %1825 = vmatpush1.bf16.msra.mxu1 %v10900_v19  ;;  %v10975_v19 = vld [vmem:[#allocation8 + $0x4e0] ss:$36 sps:$4 sm:$0xff]  }
 0x20a   :  { %1798 = vmatpush2.bf16.msra.mxu0 %v10903_v20  ;;  %1826 = vmatprep.subr.bf16.mxu1 %v10908_v21  ;;  %v10980_v20 = vld [vmem:[#allocation8 + $0x1c] ss:$36 sps:$4 sm:$0xff]  }
 0x20b   :  { %1799 = vmatprep.subr.bf16.mxu0 %v10911_v22  ;;  %v10983_v21 = vld [vmem:[#allocation8 + $0x49c] ss:$36 sps:$4 sm:$0xff]  }
 0x20c   :  { %v10978_v22 = vld [vmem:[#allocation8 + $0x18] ss:$36 sps:$4 sm:$0xff]  }
 0x20d   :  { %1827 = vmatpush1.bf16.msra.mxu1 %v10906_v27  ;;  %v10981_v27 = vld [vmem:[#allocation8 + $0x498] ss:$36 sps:$4 sm:$0xff]  }
 0x20e   :  { %1800 = vmatpush2.bf16.msra.mxu0 %v10909_v29  ;;  %1828 = vmatprep.subr.bf16.mxu1 %v10914_v30  ;;  %v10986_v29 = vld [vmem:[#allocation8 + $0x454] ss:$36 sps:$4 sm:$0xff]  }
 0x20f   :  { %1801 = vmatprep.subr.bf16.mxu0 %v10917_v31  ;;  %v10987_v30 = vld [vmem:[#allocation8 + $0x458] ss:$36 sps:$4 sm:$0xff]   ;;  %v10984_v31 = vld [vmem:[#allocation8 + $0x450] ss:$36 sps:$4 sm:$0xff]  }
 0x211   :  { %1829 = vmatpush1.bf16.msra.mxu1 %v10912_v36  ;;  %v10988_v36 = vld [vmem:[#allocation8 + $0x218] ss:$36 sps:$4 sm:$0xff]  }
 0x212   :  { %1802 = vmatpush2.bf16.msra.mxu0 %v10915_v38  ;;  %1830 = vmatprep.subr.bf16.mxu1 %v10920_v43  ;;  %v10991_v38 = vld [vmem:[#allocation8 + $0x40c] ss:$36 sps:$4 sm:$0xff]  }
 0x213   :  { %1803 = vmatprep.subr.bf16.mxu0 %v10923_v33  ;;  %v10992_v43 = vld [vmem:[#allocation8 + $0x410] ss:$36 sps:$4 sm:$0xff]   ;;  %v10989_v33 = vld [vmem:[#allocation8 + $0x408] ss:$36 sps:$4 sm:$0xff]  }
 0x215   :  { %1831 = vmatpush1.bf16.msra.mxu1 %v10918_v46  ;;  %v10993_v46 = vld [vmem:[#allocation8 + $0x1d0] ss:$36 sps:$4 sm:$0xff]  }
 0x216   :  { %1804 = vmatpush2.bf16.msra.mxu0 %v10921_v34  ;;  %1832 = vmatprep.subr.bf16.mxu1 %v10926_v47  ;;  %v10996_v34 = vld [vmem:[#allocation8 + $0x3c4] ss:$36 sps:$4 sm:$0xff]  }
 0x217   :  { %1805 = vmatprep.subr.bf16.mxu0 %v10929_v32  ;;  %v10997_v47 = vld [vmem:[#allocation8 + $0x3c8] ss:$36 sps:$4 sm:$0xff]   ;;  %v10994_v32 = vld [vmem:[#allocation8 + $0x3c0] ss:$36 sps:$4 sm:$0xff]  }
 0x219   :  { %1833 = vmatpush1.bf16.msra.mxu1 %v10924_v48  ;;  %v10998_v48 = vld [vmem:[#allocation8 + $0x188] ss:$36 sps:$4 sm:$0xff]  }
 0x21a   :  { %1806 = vmatpush2.bf16.msra.mxu0 %v10927_v50  ;;  %1834 = vmatprep.subr.bf16.mxu1 %v10932_v51  ;;  %v11001_v50 = vld [vmem:[#allocation8 + $0x37c] ss:$36 sps:$4 sm:$0xff]  }
 0x21b   :  { %1807 = vmatprep.subr.bf16.mxu0 %v10935_v52  ;;  %v11002_v51 = vld [vmem:[#allocation8 + $0x380] ss:$36 sps:$4 sm:$0xff]   ;;  %v10999_v52 = vld [vmem:[#allocation8 + $0x378] ss:$36 sps:$4 sm:$0xff]  }
 0x21d   :  { %1835 = vmatpush1.bf16.msra.mxu1 %v10930_v41  ;;  %v11003_v41 = vld [vmem:[#allocation8 + $0x140] ss:$36 sps:$4 sm:$0xff]  }
 0x21e   :  { %1808 = vmatpush2.bf16.msra.mxu0 %v10933_v53  ;;  %1863 = vmatprep.subr.bf16.mxu1 %v10938_v42  ;;  %v11006_v53 = vld [vmem:[#allocation8 + $0x334] ss:$36 sps:$4 sm:$0xff]  }
 0x21f   :  { %1906 = vmatprep.subr.bf16.mxu0 %v10941_v54  ;;  %v11004_v42 = vld [vmem:[#allocation8 + $0x330] ss:$36 sps:$4 sm:$0xff]   ;;  %v11008_v54 = vld [vmem:[#allocation8 + $0xf8] ss:$36 sps:$4 sm:$0xff]  }
 0x220   :  { %1853 = vmatmul.mubr.bf16.vlgmr.msra.gmra.mxu1 %v12432_v59 }
 0x221   :  { %1810 = vmatmul.mubr.bf16.vlgmr.msra.gmra.mxu0 %v12434_v62  ;;  %1864 = vmatpush1.bf16.msra.mxu1 %v10936_v40  ;;  %v11011_v40 = vld [vmem:[#allocation8 + $0x2ec] ss:$36 sps:$4 sm:$0xff]  }
 0x222   :  { %1895 = vmatprep.mubr.bf16.mxu1 %v12430_v58  ;;  %1907 = vmatpush1.bf16.msra.mxu0 %v10939_v55  ;;  %v11012_v55 = vld [vmem:[#allocation8 + $0x2f0] ss:$36 sps:$4 sm:$0xff]  }
 0x223   :  { %1865 = vmatprep.subr.bf16.mxu1 %v10944_v56  ;;  %1908 = vmatprep.subr.bf16.mxu0 %v10947_v57  ;;  %v11009_v56 = vld [vmem:[#allocation8 + $0x2e8] ss:$36 sps:$4 sm:$0xff]   ;;  %v11013_v57 = vld [vmem:[#allocation8 + $0xb0] ss:$36 sps:$4 sm:$0xff]  }
 0x224   :  { %1938 = vmatprep.mubr.bf16.mxu0 %v12258_v9 }
 0x225   :  { %1866 = vmatpush1.bf16.msra.mxu1 %v10942_v60  ;;  %v11016_v60 = vld [vmem:[#allocation8 + $0x2a4] ss:$36 sps:$4 sm:$0xff]  }
 0x226   :  { %1909 = vmatpush1.bf16.msra.mxu0 %v10945_v61  ;;  %1867 = vmatprep.subr.bf16.mxu1 %v10950_v63  ;;  %v11017_v61 = vld [vmem:[#allocation8 + $0x2a8] ss:$36 sps:$4 sm:$0xff]   ;;  %v11014_v63 = vld [vmem:[#allocation8 + $0x2a0] ss:$36 sps:$4 sm:$0xff]  }
 0x227   :  { %1910 = vmatprep.subr.bf16.mxu0 %v10953_v0  ;;  %v11018_v0 = vld [vmem:[#allocation8 + $0x68] ss:$36 sps:$4 sm:$0xff]  }
 0x229   :  { %1868 = vmatpush1.bf16.msra.mxu1 %v10948_v1  ;;  %v11021_v1 = vld [vmem:[#allocation8 + $0x25c] ss:$36 sps:$4 sm:$0xff]  }
 0x22a   :  { %1911 = vmatpush1.bf16.msra.mxu0 %v10951_v2  ;;  %1869 = vmatprep.subr.bf16.mxu1 %v10956_v3  ;;  %v11022_v2 = vld [vmem:[#allocation8 + $0x260] ss:$36 sps:$4 sm:$0xff]   ;;  %v11019_v3 = vld [vmem:[#allocation8 + $0x258] ss:$36 sps:$4 sm:$0xff]  }
 0x22b   :  { %1912 = vmatprep.subr.bf16.mxu0 %v10959_v4  ;;  %v11023_v4 = vld [vmem:[#allocation8 + $0x20] ss:$36 sps:$4 sm:$0xff]  }
 0x22d   :  { %1870 = vmatpush1.bf16.msra.mxu1 %v10954_v5  ;;  %v11024_v5 = vld [vmem:[#allocation8 + $0x698] ss:$36 sps:$4 sm:$0xff]  }
 0x22e   :  { %1913 = vmatpush1.bf16.msra.mxu0 %v10957_v6  ;;  %1871 = vmatprep.subr.bf16.mxu1 %v10962_v7  ;;  %v12259_v6 = vmov 0.0   ;;  %v11025_v7 = vld [vmem:[#allocation8 + $0x650] ss:$36 sps:$4 sm:$0xff]  }
 0x22f   :  { %1914 = vmatprep.subr.bf16.mxu0 %v10965_v8  ;;  %v11026_v8 = vld [vmem:[#allocation8 + $0x608] ss:$36 sps:$4 sm:$0xff]  }
 0x231   :  { %1872 = vmatpush1.bf16.msra.mxu1 %v10960_v10  ;;  %v11027_v10 = vld [vmem:[#allocation8 + $0x5c0] ss:$36 sps:$4 sm:$0xff]  }
 0x232   :  { %1915 = vmatpush1.bf16.msra.mxu0 %v10963_v11  ;;  %1873 = vmatprep.subr.bf16.mxu1 %v10968_v12  ;;  %v11029_v11 = vld [vmem:[#allocation8 + $0x530] ss:$36 sps:$4 sm:$0xff]   ;;  %v11030_v12 = vld [vmem:[#allocation8 + $0x4e8] ss:$36 sps:$4 sm:$0xff]  }
 0x233   :  { %1916 = vmatprep.subr.bf16.mxu0 %v10971_v13  ;;  %v11031_v13 = vld [vmem:[#allocation8 + $0x4a0] ss:$36 sps:$4 sm:$0xff]  }
 0x235   :  { %1874 = vmatpush1.bf16.msra.mxu1 %v10966_v14 }
 0x236   :  { %1917 = vmatpush1.bf16.msra.mxu0 %v10969_v15  ;;  %1875 = vmatprep.subr.bf16.mxu1 %v10974_v16 }
 0x237   :  { %1918 = vmatprep.subr.bf16.mxu0 %v10977_v17 }
 0x239   :  { %1876 = vmatpush1.bf16.msra.mxu1 %v10972_v18 }
 0x23a   :  { %1919 = vmatpush1.bf16.msra.mxu0 %v10975_v19  ;;  %1877 = vmatprep.subr.bf16.mxu1 %v10980_v20 }
 0x23b   :  { %1920 = vmatprep.subr.bf16.mxu0 %v10983_v21 }
 0x23d   :  { %1878 = vmatpush1.bf16.msra.mxu1 %v10978_v22 }
 0x23e   :  { %1921 = vmatpush1.bf16.msra.mxu0 %v10981_v27  ;;  %1879 = vmatprep.subr.bf16.mxu1 %v10986_v29 }
 0x23f   :  { %10220 = vmatprep.subr.bf16.mxu0 %v10987_v30 }
 0x241   :  { %1880 = vmatpush2.bf16.msra.mxu1 %v10984_v31  ;;  %1939 = vmatmul.mubr.bf16.vlgmr.msra.gmra.mxu0 %v12432_v59 }
 0x242   :  { %10221 = vmatpush3.bf16.msra.mxu0 %v10988_v36  ;;  %1981 = vmatprep.mubr.bf16.mxu0 %v12430_v58  ;;  %v11007_v58 = vld [vmem:[#allocation8 + $0x338] ss:$36 sps:$4 sm:$0xff]  }
 0x243   :  { %1881 = vmatprep.subr.bf16.mxu1 %v10991_v38  ;;  %10222 = vmatprep.subr.bf16.mxu0 %v10992_v43 }
 0x245   :  { %1882 = vmatpush2.bf16.msra.mxu1 %v10989_v33 }
 0x246   :  { %10223 = vmatpush3.bf16.msra.mxu0 %v10993_v46  ;;  %1883 = vmatprep.subr.bf16.mxu1 %v10996_v34 }
 0x247   :  { %10224 = vmatprep.subr.bf16.mxu0 %v10997_v47 }
 0x249   :  { %1884 = vmatpush2.bf16.msra.mxu1 %v10994_v32 }
 0x24a   :  { %10225 = vmatpush3.bf16.msra.mxu0 %v10998_v48  ;;  %1885 = vmatprep.subr.bf16.mxu1 %v11001_v50 }
 0x24b   :  { %10226 = vmatprep.subr.bf16.mxu0 %v11002_v51 }
 0x24d   :  { %1886 = vmatpush2.bf16.msra.mxu1 %v10999_v52 }
 0x24e   :  { %10227 = vmatpush3.bf16.msra.mxu0 %v11003_v41  ;;  %1887 = vmatprep.subr.bf16.mxu1 %v11006_v53 }
 0x24f   :  { %10228 = vmatprep.subr.bf16.mxu0 %v11007_v58 }
 0x251   :  { %1888 = vmatpush2.bf16.msra.mxu1 %v11004_v42 }
 0x252   :  { %10229 = vmatpush3.bf16.msra.mxu0 %v11008_v54  ;;  %1889 = vmatprep.subr.bf16.mxu1 %v11011_v40 }
 0x253   :  { %10230 = vmatprep.subr.bf16.mxu0 %v11012_v55 }
 0x255   :  { %1890 = vmatpush2.bf16.msra.mxu1 %v11009_v56 }
 0x256   :  { %10231 = vmatpush3.bf16.msra.mxu0 %v11013_v57  ;;  %1891 = vmatprep.subr.bf16.mxu1 %v11016_v60 }
 0x257   :  { %10232 = vmatprep.subr.bf16.mxu0 %v11017_v61 }
 0x259   :  { %1892 = vmatpush2.bf16.msra.mxu1 %v11014_v63 }
 0x25a   :  { %10233 = vmatpush3.bf16.msra.mxu0 %v11018_v0  ;;  %1893 = vmatprep.subr.bf16.mxu1 %v11021_v1 }
 0x25b   :  { %10234 = vmatprep.subr.bf16.mxu0 %v11022_v2 }
 0x25d   :  { %1894 = vmatpush2.bf16.msra.mxu1 %v11019_v3 }
 0x25e   :  { %10235 = vmatpush3.bf16.msra.mxu0 %v11023_v4  ;;  %10461 = vmatprep.subr.bf16.mxu1 %v12259_v6 }
 0x25f   :  { %10481 = vmatprep.subr.bf16.mxu0 %v12259_v6 }
 0x260   :  { %1896 = vmatmul.mubr.bf16.vlgmr.msra.gmra.mxu1 %v12434_v62 }
 0x261   :  { %1982 = vmatmul.mubr.bf16.vlgmr.msra.gmra.mxu0 %v12434_v62  ;;  %10462 = vmatpush3.bf16.msra.mxu1 %v11024_v5  ;;  %v11028_v62 = vld [vmem:[#allocation8 + $0x578] ss:$36 sps:$4 sm:$0xff]  }
 0x262   :  { %10463 = vmatprep.subr.bf16.mxu1 %v12259_v6  ;;  %10477 = vmatprep.mubr.msk.bf16.mxu1 %vm12260_vm0, %v12259_v6 }
 0x263   :  { %10483 = vmatprep.mubr.msk.bf16.mxu0 %vm12260_vm0, %v12259_v6 }
 0x265   :  { %10464 = vmatpush3.bf16.msra.mxu1 %v11025_v7 }
 0x266   :  { %10465 = vmatprep.subr.bf16.mxu1 %v12259_v6 }
 0x269   :  { %10466 = vmatpush3.bf16.msra.mxu1 %v11026_v8 }
 0x26a   :  { %10467 = vmatprep.subr.bf16.mxu1 %v12259_v6 }
 0x26d   :  { %10468 = vmatpush3.bf16.msra.mxu1 %v11027_v10 }
 0x26e   :  { %10469 = vmatprep.subr.bf16.mxu1 %v12259_v6 }
 0x271   :  { %10470 = vmatpush3.bf16.msra.mxu1 %v11028_v62 }
 0x272   :  { %10471 = vmatprep.subr.bf16.mxu1 %v12259_v6 }
 0x275   :  { %10472 = vmatpush3.bf16.msra.mxu1 %v11029_v11 }
 0x276   :  { %10473 = vmatprep.subr.bf16.mxu1 %v12259_v6 }
 0x279   :  { %10474 = vmatpush3.bf16.msra.mxu1 %v11030_v12 }
 0x27a   :  { %10475 = vmatprep.subr.bf16.mxu1 %v12259_v6 }
 0x27d   :  { %10476 = vmatpush3.bf16.msra.mxu1 %v11031_v13 }
 0x27e   :  { %10487 = vmatprep.subr.bf16.mxu1 %v12259_v6 }
 0x280   :  { %10478 = vmatmul.mubr.bf16.vlgmr.msra.gmra.mxu1 %v12432_v59  ;;  %v1682_v14 = vpop.f32.mrf.mxu1 }
 0x281   :  { %v1639_v15 = vpop.f32.mrf.mxu0  ;;  %10489 = vmatprep.mubr.msk.bf16.mxu1 %vm12260_vm0, %v12259_v6 }
 0x282   :  { %v1684_v16 = vpop.f32.mrf.mxu1  ;;  %v1683_v50 = vadd.f32 %v1682_v14, %v1639_v15 }
 0x283   :  { %v1641_v17 = vpop.f32.mrf.mxu0 }
 0x284   :  { %v12470_v18 = vadd.f32 %v1684_v16, %v1641_v17  ;;  %v1686_v21 = vpop.f32.mrf.mxu1  ;;  %v12489_v41 = vpack.c.bf16 %v1683_v50, %v1683_v50 }
 0x285   :  { %v1643_v19 = vpop.f32.mrf.mxu0 }
 0x286   :  { %v12474_v27 = vpop.f32.mrf.mxu1  ;;  %v1687_v53 = vadd.f32 %v1686_v21, %v1643_v19 }
 0x287   :  { %v12472_v20 = vpop.f32.mrf.mxu0 }
 0x288   :  { %v12496_v58 = vpack.c.bf16 %v1687_v53, %v1687_v53 }
 0x2a1   :  { %v1768_v22 = vpop.f32.mrf.mxu0 }
 0x2a3   :  { %v1770_v29 = vpop.f32.mrf.mxu0 }
 0x2a5   :  { %v1772_v59 = vpop.f32.mrf.mxu0 }
 0x2a7   :  { %v1774_v34 = vpop.f32.mrf.mxu0 }
 0x2c0   :  { %v1725_v30 = vpop.f32.mrf.mxu1 }
 0x2c1   :  { %v12476_v31 = vadd.f32 %v1768_v22, %v1725_v30 }
 0x2c2   :  { %v1727_v36 = vpop.f32.mrf.mxu1 }
 0x2c3   :  { %v1771_v38 = vadd.f32 %v1770_v29, %v1727_v36 }
 0x2c4   :  { %v1729_v43 = vpop.f32.mrf.mxu1 }
 0x2c5   :  { %v12478_v33 = vpack.c.bf16 %v1771_v38, %v1771_v38  ;;  %v12480_v46 = vadd.f32 %v1772_v59, %v1729_v43 }
 0x2c6   :  { %v1731_v47 = vpop.f32.mrf.mxu1 }
 0x2c7   :  { %v2143_v32 = vsel %vm2138_vm1, %v12478_v33, 0  ;;  %v1775_v48 = vadd.f32 %v1774_v34, %v1731_v47 }
 0x2c8   :  { %10482 = vmatpush3.bf16.xpose.msra.mxu0 %v2143_v32 }
 0x2c9   :  { %v12484_v51 = vpack.c.bf16 %v1775_v48, %v1775_v48  ;;  %10493 = vmatprep.subr.bf16.mxu0 %v12259_v6  ;;  %v2034_v48 = vand.u32 127, %v215_v23 }
 0x2cb   :  { %v2189_v52 = vsel %vm2138_vm1, %v12484_v51, 0  ;;  %vm12534_vm3 = vcmp.le.s32.totalorder %v2034_v48, %v12383_v24 }
 0x2cc   :  { %10488 = vmatpush3.bf16.xpose.msra.mxu1 %v2189_v52 }
 0x2cd   :  { %10499 = vmatprep.subr.bf16.mxu1 %v12259_v6 }
 0x2cf   :  { %10484 = vmatmul.mubr.msk.bf16.vlgmr.msra.gmra.mxu0 %vm2138_vm1, %v12489_v41 }
 0x2d0   :  { %10495 = vmatprep.mubr.msk.bf16.mxu0 %vm12260_vm0, %v12259_v6 }
 0x2d3   :  { %10490 = vmatmul.mubr.msk.bf16.vlgmr.msra.gmra.mxu1 %vm2138_vm1, %v12496_v58 }
 0x2d4   :  { %10501 = vmatprep.mubr.msk.bf16.mxu1 %vm12260_vm0, %v12259_v6 }
 0x2e0   :  { %v1854_v42 = vpop.f32.mrf.mxu1 }
 0x2e1   :  { %v1811_v54 = vpop.f32.mrf.mxu0 }
 0x2e2   :  { %v12502_v40 = vadd.f32 %v1854_v42, %v1811_v54  ;;  %v1856_v55 = vpop.f32.mrf.mxu1 }
 0x2e3   :  { %v1813_v56 = vpop.f32.mrf.mxu0 }
 0x2e4   :  { %v12504_v57 = vadd.f32 %v1856_v55, %v1813_v56  ;;  %v1858_v60 = vpop.f32.mrf.mxu1 }
 0x2e5   :  { %v1815_v61 = vpop.f32.mrf.mxu0 }
 0x2e6   :  { %v12506_v63 = vadd.f32 %v1858_v60, %v1815_v61  ;;  %v12510_v4 = vpop.f32.mrf.mxu1 }
 0x2e7   :  { %v12508_v0 = vpop.f32.mrf.mxu0 }
 0x301   :  { %v1940_v1 = vpop.f32.mrf.mxu0 }
 0x303   :  { %v1942_v2 = vpop.f32.mrf.mxu0 }
 0x305   :  { %v1944_v3 = vpop.f32.mrf.mxu0 }
 0x307   :  { %v12512_v5 = vpop.f32.mrf.mxu0 }
 0x320   :  { %v1897_v7 = vpop.f32.mrf.mxu1 }
 0x321   :  { %v1941_v8 = vadd.f32 %v1940_v1, %v1897_v7  ;;  %v10236_v10 = vpop.f32.mrf.mxu0 }
 0x322   :  { %v1899_v62 = vpop.f32.mrf.mxu1 }
 0x323   :  { %v12514_v11 = vpack.c.bf16 %v1941_v8, %v1941_v8  ;;  %v12516_v12 = vadd.f32 %v1942_v2, %v1899_v62  ;;  %v10237_v13 = vpop.f32.mrf.mxu0 }
 0x324   :  { %v10238_v14 = vadd.f32 %v10237_v13, %v10236_v10  ;;  %v1901_v15 = vpop.f32.mrf.mxu1 }
 0x325   :  { %v2265_v16 = vsel %vm2263_vm2, %v12514_v11, 0  ;;  %v1945_v17 = vadd.f32 %v1944_v3, %v1901_v15  ;;  %v10239_v22 = vpop.f32.mrf.mxu0 }
 0x326   :  { %10494 = vmatpush3.bf16.msra.mxu0 %v2265_v16  ;;  %v12526_v29 = vpop.f32.mrf.mxu1 }
 0x327   :  { %v12520_v19 = vpack.c.bf16 %v1945_v17, %v1945_v17  ;;  %10505 = vmatprep.subr.bf16.mxu0 %v12259_v6  ;;  %v10240_v30 = vpop.f32.mrf.mxu0 }
 0x328   :  { %v10241_v43 = vadd.f32 %v10240_v30, %v10239_v22 }
 0x329   :  { %v2311_v21 = vsel %vm2263_vm2, %v12520_v19, 0 }
 0x32a   :  { %10500 = vmatpush3.bf16.msra.mxu1 %v2311_v21 }
 0x32b   :  { %10511 = vmatprep.subr.bf16.mxu1 %v12259_v6 }
 0x340   :  { %v2024_v59 = vpop.f32.mrf.mxu1 }
 0x341   :  { %v12528_v36 = vadd.f32 %v10238_v14, %v2024_v59 }
 0x342   :  { %v10479_v38 = vpop.f32.mrf.mxu1 }
 0x344   :  { %v2027_v34 = vpop.f32.mrf.mxu1 }
 0x345   :  { %v12530_v47 = vadd.f32 %v10241_v43, %v2027_v34 }
 0x346   :  { %v10480_v32 = vpop.f32.mrf.mxu1 }
 0x38f   :  { %v2179_v50 = vpop.f32.mrf.mxu0 }
 0x390   :  { %v2231_v53 = vmul.f32 0.125, %v2179_v50 }
 0x391   :  { %v10485_v42 = vpop.f32.mrf.mxu0 }
 0x392   :  { %v2233_v54 = vsel %vm12534_vm3, %v2231_v53, -inf }
 0x393   :  { %v2182_v55 = vpop.f32.mrf.mxu0  ;;  %v2225_v56 = vpop.f32.mrf.mxu1  ;;  %v2236_v60 = vsel %vm2235_vm4, %v2233_v54, -inf }
 0x394   :  { %v2232_v61 = vmul.f32 0.125, %v2225_v56  ;;  %2237 = vmax.xlane.f32.xlu0 %v2236_v60 }
 0x395   :  { %v10486_v1 = vpop.f32.mrf.mxu0  ;;  %v10491_v23 = vpop.f32.mrf.mxu1 }
 0x396   :  { %v2234_v2 = vsel %vm12534_vm3, %v2232_v61, -inf }
 0x397   :  { %v2228_v3 = vpop.f32.mrf.mxu1  ;;  %v2239_v7 = vsel %vm2235_vm4, %v2234_v2, -inf }
 0x398   :  { %2240 = vmax.xlane.f32.xlu1 %v2239_v7 }
 0x399   :  { %v10492_v8 = vpop.f32.mrf.mxu1 }
 0x3a9   :  { %2410 = vrot.lane.b32.xlu1 %v12484_v51, %s12261_s8 }
 0x41d   :  { %v2238_v10 = vpop.xlane.xlu0 %2237 }
 0x41e   :  { %v2242_v62 = vsub.f32 %v2233_v54, %v2238_v10 }
 0x420   :  { %v2244_v13 = vmul.f32 1.442695, %v2242_v62 }
 0x421   :  { %v2241_v14 = vpop.xlane.xlu1 %2240 }
 0x422   :  { %11948 = vpow2.f32 %v2244_v13  ;;  %v2243_v15 = vsub.f32 %v2234_v2, %v2241_v14 }
 0x424   :  { %v2246_v16 = vmul.f32 1.442695, %v2243_v15 }
 0x425   :  { %v2411_v51 = vpop.permute.xlu1 %2410 }
 0x426   :  { %11950 = vpow2.f32 %v2246_v16 }
 0x42f   :  { %v11949_v17 = vpop.eup %11948 }
 0x430   :  { %v2248_v21 = vsel %vm2235_vm4, %v11949_v17, 0.0 }
 0x431   :  { %2249 = vadd.xlane.f32.xlu0 %v2248_v21 }
 0x433   :  { %v11951_v22 = vpop.eup %11950 }
 0x434   :  { %v2251_v30 = vsel %vm2235_vm4, %v11951_v22, 0.0 }
 0x435   :  { %2252 = vadd.xlane.f32.xlu1 %v2251_v30 }
 0x446   :  { %2355 = vrot.lane.b32.xlu1 %v12489_v41, %s12261_s8 }
 0x447   :  { %2358 = vrot.lane.b32.xlu0 %v12478_v33, %s12261_s8 }
 0x44a   :  { %2407 = vrot.lane.b32.xlu1 %v12496_v58, %s12261_s8  ;;  %v2416_v58 = vsel %vm2138_vm1, %v2411_v51, 0 }
 0x4ba   :  { %v2250_v59 = vpop.xlane.xlu0 %2249 }
 0x4bb   :  { %11952 = vrcp.f32 %v2250_v59 }
 0x4be   :  { %v2253_v38 = vpop.xlane.xlu1 %2252  ;;  %v2359_v32 = vpop.permute.xlu0 %2358 }
 0x4bf   :  { %11954 = vrcp.f32 %v2253_v38  ;;  %v2364_v53 = vsel %vm2138_vm1, %v2359_v32, 0 }
 0x4c2   :  { %v2356_v42 = vpop.permute.xlu1 %2355 }
 0x4c6   :  { %v2408_v54 = vpop.permute.xlu1 %2407 }
 0x4c8   :  { %v11953_v43 = vpop.eup %11952 }
 0x4c9   :  { %v2256_v34 = vmul.f32 %v11953_v43, %v11949_v17 }
 0x4cb   :  { %v2258_v48 = vpack.c.bf16 %v2256_v34, %v2256_v34 }
 0x4cc   :  { %v11955_v50 = vpop.eup %11954 }
 0x4cd   :  { %10496 = vmatmul.mubr.msk.bf16.vlgmr.msra.gmra.mxu0 %vm2235_vm4, %v2258_v48  ;;  %v2257_v41 = vmul.f32 %v11955_v50, %v11951_v22 }
 0x4ce   :  { %10506 = vmatpush3.bf16.xpose.msra.mxu0 %v2364_v53  ;;  %10507 = vmatprep.mubr.msk.bf16.mxu0 %vm12260_vm0, %v12259_v6 }
 0x4cf   :  { %v2259_v33 = vpack.c.bf16 %v2257_v41, %v2257_v41  ;;  %10517 = vmatprep.subr.bf16.mxu0 %v12259_v6 }
 0x4d1   :  { %10502 = vmatmul.mubr.msk.bf16.vlgmr.msra.gmra.mxu1 %vm2235_vm4, %v2259_v33 }
 0x4d2   :  { %10512 = vmatpush3.bf16.xpose.msra.mxu1 %v2416_v58  ;;  %10513 = vmatprep.mubr.msk.bf16.mxu1 %vm12260_vm0, %v12259_v6 }
 0x4d3   :  { %10523 = vmatprep.subr.bf16.mxu1 %v12259_v6 }
 0x4d5   :  { %10508 = vmatmul.mubr.msk.bf16.vlgmr.msra.gmra.mxu0 %vm2138_vm1, %v2356_v42 }
 0x4d6   :  { %10519 = vmatprep.mubr.msk.bf16.mxu0 %vm12260_vm0, %v12259_v6 }
 0x4d9   :  { %10514 = vmatmul.mubr.msk.bf16.vlgmr.msra.gmra.mxu1 %vm2138_vm1, %v2408_v54 }
 0x4da   :  { %10525 = vmatprep.mubr.msk.bf16.mxu1 %vm12260_vm0, %v12259_v6 }
 0x58d   :  { %v2301_v55 = vpop.f32.mrf.mxu0 }
 0x58f   :  { %v10497_v56 = vpop.f32.mrf.mxu0 }
 0x591   :  { %v2304_v60 = vpop.f32.mrf.mxu0  ;;  %v2347_v61 = vpop.f32.mrf.mxu1 }
 0x592   :  { %v12570_v1 = vpack.c.bf16 %v2347_v61, %v2301_v55  ;;  %v11034_v60 = vld [vmem:[#allocation10 + $0xac] ss:$12 sps:$4 sm:$0xff]  }
 0x593   :  { %v10498_v23 = vpop.f32.mrf.mxu0  ;;  %v10503_v2 = vpop.f32.mrf.mxu1 }
 0x595   :  { %v2350_v3 = vpop.f32.mrf.mxu1  ;;  %v2400_v7 = vpop.f32.mrf.mxu0 }
 0x596   :  { %v2458_v8 = vmul.f32 0.125, %v2400_v7  ;;  %v11032_v7 = vld [vmem:[#allocation10 + $0xa8] ss:$12 sps:$4 sm:$0xff]  }
 0x597   :  { %v10504_v10 = vpop.f32.mrf.mxu1  ;;  %v10509_v62 = vpop.f32.mrf.mxu0 }
 0x598   :  { %v2460_v13 = vsel %vm12534_vm3, %v2458_v8, -inf  ;;  %v11038_v10 = vld [vmem:[#allocation10 + $0x94] ss:$12 sps:$4 sm:$0xff]  }
 0x599   :  { %v2403_v14 = vpop.f32.mrf.mxu0  ;;  %v2452_v15 = vpop.f32.mrf.mxu1  ;;  %v2462_v16 = vsel %vm2235_vm4, %v2460_v13, -inf }
 0x59a   :  { %v2459_v17 = vmul.f32 0.125, %v2452_v15  ;;  %2463 = vmax.xlane.f32.xlu0 %v2462_v16  ;;  %v11036_v14 = vld [vmem:[#allocation10 + $0x90] ss:$12 sps:$4 sm:$0xff]  }
 0x59b   :  { %v10510_v21 = vpop.f32.mrf.mxu0  ;;  %v10515_v22 = vpop.f32.mrf.mxu1  ;;  %v11042_v16 = vld [vmem:[#allocation10 + $0x7c] ss:$12 sps:$4 sm:$0xff]  }
 0x59c   :  { %v2461_v30 = vsel %vm12534_vm3, %v2459_v17, -inf  ;;  %v11039_v17 = vld [vmem:[#allocation10 + $0x98] ss:$12 sps:$4 sm:$0xff]   ;;  %v11043_v22 = vld [vmem:[#allocation10 + $0x80] ss:$12 sps:$4 sm:$0xff]  }
 0x59d   :  { %v2455_v51 = vpop.f32.mrf.mxu1  ;;  %v2465_v59 = vsel %vm2235_vm4, %v2461_v30, -inf  ;;  %v11040_v21 = vld [vmem:[#allocation10 + $0x78] ss:$12 sps:$4 sm:$0xff]  }
 0x59e   :  { %2466 = vmax.xlane.f32.xlu1 %v2465_v59  ;;  %v11044_v51 = vld [vmem:[#allocation10 + $0x60] ss:$12 sps:$4 sm:$0xff]   ;;  %v11047_v59 = vld [vmem:[#allocation10 + $0x68] ss:$12 sps:$4 sm:$0xff]  }
 0x59f   :  { %v10516_v38 = vpop.f32.mrf.mxu1 }
 0x5a0   :  { %v11050_v38 = vld [vmem:[#allocation10 + $0x4c] ss:$12 sps:$4 sm:$0xff]  }
 0x5af   :  { %2536 = vrot.lane.b32.xlu1 %v12520_v19, %s12261_s8 }
 0x623   :  { %v2464_v43 = vpop.xlane.xlu0 %2463 }
 0x624   :  { %v2468_v34 = vsub.f32 %v2460_v13, %v2464_v43 }
 0x626   :  { %v2470_v32 = vmul.f32 1.442695, %v2468_v34 }
 0x627   :  { %v2467_v48 = vpop.xlane.xlu1 %2466 }
 0x628   :  { %11956 = vpow2.f32 %v2470_v32  ;;  %v2469_v50 = vsub.f32 %v2461_v30, %v2467_v48  ;;  %v11046_v30 = vld [vmem:[#allocation10 + $0x64] ss:$12 sps:$4 sm:$0xff]  }
 0x62a   :  { %v2472_v53 = vmul.f32 1.442695, %v2469_v50  ;;  %v11048_v50 = vld [vmem:[#allocation10 + $0x48] ss:$12 sps:$4 sm:$0xff]  }
 0x62b   :  { %v2537_v41 = vpop.permute.xlu1 %2536 }
 0x62c   :  { %11958 = vpow2.f32 %v2472_v53  ;;  %v2542_v33 = vsel %vm2263_vm2, %v2537_v41, 0  ;;  %v11051_v53 = vld [vmem:[#allocation10 + $0x50] ss:$12 sps:$4 sm:$0xff]  }
 0x62d   :  { %10524 = vmatpush3.bf16.msra.mxu1 %v2542_v33  ;;  %v11054_v33 = vld [vmem:[#allocation10 + $0x34] ss:$12 sps:$4 sm:$0xff]  }
 0x62e   :  { %10529 = vmatprep.subr.bf16.mxu1 %v12259_v6 }
 0x635   :  { %v11957_v58 = vpop.eup %11956 }
 0x636   :  { %v2474_v42 = vsel %vm2235_vm4, %v11957_v58, 0.0 }
 0x637   :  { %2475 = vadd.xlane.f32.xlu0 %v2474_v42 }
 0x639   :  { %v11959_v54 = vpop.eup %11958 }
 0x63a   :  { %v2477_v19 = vsel %vm2235_vm4, %v11959_v54, 0.0 }
 0x63b   :  { %2478 = vadd.xlane.f32.xlu0 %v2477_v19  ;;  %v11052_v19 = vld [vmem:[#allocation10 + $0x30] ss:$12 sps:$4 sm:$0xff]  }
 0x651   :  { %2487 = vrot.lane.b32.xlu0 %v12514_v11, %s12261_s8  ;;  %v11035_v11 = vld [vmem:[#allocation10 + $0xb0] ss:$12 sps:$4 sm:$0xff]  }
 0x6c0   :  { %v2476_v55 = vpop.xlane.xlu0 %2475 }
 0x6c1   :  { %11960 = vrcp.f32 %v2476_v55  ;;  %v11055_v55 = vld [vmem:[#allocation10 + $0x38] ss:$12 sps:$4 sm:$0xff]  }
 0x6c4   :  { %v2479_v56 = vpop.xlane.xlu0 %2478 }
 0x6c5   :  { %11962 = vrcp.f32 %v2479_v56  ;;  %v11058_v56 = vld [vmem:[#allocation10 + $0x1c] ss:$12 sps:$4 sm:$0xff]  }
 0x6c8   :  { %v2488_v61 = vpop.permute.xlu0 %2487 }
 0x6c9   :  { %v2493_v23 = vsel %vm2263_vm2, %v2488_v61, 0  ;;  %v11056_v61 = vld [vmem:[#allocation10 + $0x18] ss:$12 sps:$4 sm:$0xff]  }
 0x6ca   :  { %10518 = vmatpush3.bf16.msra.mxu0 %v2493_v23  ;;  %v11059_v23 = vld [vmem:[#allocation10 + $0x20] ss:$12 sps:$4 sm:$0xff]  }
 0x6cb   :  { %2660 = vmatprep.subr.bf16.mxu0 %v11034_v60 }
 0x6ce   :  { %v11961_v2 = vpop.eup %11960 }
 0x6cf   :  { %v2482_v3 = vmul.f32 %v11961_v2, %v11957_v58  ;;  %v11062_v2 = vld [vmem:[#allocation10 + $0x4] ss:$12 sps:$4 sm:$0xff]  }
 0x6d1   :  { %v2484_v8 = vpack.c.bf16 %v2482_v3, %v2482_v3  ;;  %v11060_v3 = vld [vmem:[#allocation10] ss:$12 sps:$4 sm:$0xff]  }
 0x6d2   :  { %v11963_v62 = vpop.eup %11962 }
 0x6d3   :  { %10520 = vmatmul.mubr.msk.bf16.vlgmr.msra.gmra.mxu0 %vm2235_vm4, %v2484_v8  ;;  %v2483_v13 = vmul.f32 %v11963_v62, %v11959_v54  ;;  %v12606_v8 = vpack.c.bf16 %v12502_v40, %v12502_v40  ;;  %v1947_v40 = vadd.f32 %v12512_v5, %v12526_v29  ;;  %v12634_v5 = vpack.c.bf16 %v12516_v12, %v12516_v12 }
 0x6d4   :  { %2661 = vmatpush1.bf16.msra.mxu0 %v11032_v7  ;;  %2684 = vmatprep.mubr.bf16.mxu0 %v12258_v9  ;;  %v11063_v7 = vld [vmem:[#allocation10 + $0x8] ss:$12 sps:$4 sm:$0xff]  }
 0x6d5   :  { %v2485_v15 = vpack.c.bf16 %v2483_v13, %v2483_v13  ;;  %2662 = vmatprep.subr.bf16.mxu0 %v11038_v10  ;;  %v12610_v10 = vpack.c.bf16 %v12506_v63, %v12506_v63  ;;  %v2897_v62 = vsel %vm2138_vm1, %v12606_v8, 0  ;;  %v1689_v63 = vadd.f32 %v12474_v27, %v12472_v20 }
 0x6d6   :  { %v12636_v29 = vpack.c.bf16 %v1947_v40, %v1947_v40  ;;  %v3017_v27 = vsel %vm2263_vm2, %v12634_v5, 0 }
 0x6d7   :  { %10526 = vmatmul.mubr.msk.bf16.vlgmr.msra.gmra.mxu1 %vm2235_vm4, %v2485_v15  ;;  %v2943_v13 = vsel %vm2138_vm1, %v12610_v10, 0  ;;  %v12642_v20 = vpack.c.bf16 %v1689_v63, %v1689_v63 }
 0x6d8   :  { %10530 = vmatpush3.bf16.msra.mxu1 %v11035_v11  ;;  %2663 = vmatpush1.bf16.msra.mxu0 %v11036_v14  ;;  %v3063_v12 = vsel %vm2263_vm2, %v12636_v29, 0 }
 0x6d9   :  { %10531 = vmatprep.subr.bf16.mxu1 %v12259_v6  ;;  %2664 = vmatprep.subr.bf16.mxu0 %v11042_v16 }
 0x6da   :  { %10537 = vmatprep.mubr.msk.bf16.mxu1 %vm12260_vm0, %v12259_v6 }
 0x6dc   :  { %10532 = vmatpush3.bf16.msra.mxu1 %v11039_v17  ;;  %2665 = vmatpush1.bf16.msra.mxu0 %v11040_v21 }
 0x6dd   :  { %10533 = vmatprep.subr.bf16.mxu1 %v12259_v6  ;;  %2666 = vmatprep.subr.bf16.mxu0 %v11046_v30 }
 0x6e0   :  { %10534 = vmatpush3.bf16.msra.mxu1 %v11043_v22  ;;  %2667 = vmatpush1.bf16.msra.mxu0 %v11044_v51 }
 0x6e1   :  { %10535 = vmatprep.subr.bf16.mxu1 %v12259_v6  ;;  %2811 = vmatprep.subr.bf16.mxu0 %v11050_v38 }
 0x6e4   :  { %10536 = vmatpush3.bf16.msra.mxu1 %v11047_v59 }
 0x6e5   :  { %10541 = vmatprep.subr.bf16.mxu1 %v12259_v6 }
 0x793   :  { %v2529_v43 = vpop.f32.mrf.mxu0 }
 0x795   :  { %v10521_v34 = vpop.f32.mrf.mxu0 }
 0x797   :  { %v2532_v32 = vpop.f32.mrf.mxu0  ;;  %v2578_v48 = vpop.f32.mrf.mxu1 }
 0x798   :  { %v2584_v41 = vpack.c.bf16 %v2578_v48, %v2529_v43 }
 0x799   :  { %v10522_v58 = vpop.f32.mrf.mxu0  ;;  %v10527_v42 = vpop.f32.mrf.mxu1 }
 0x79a   :  { %9556 = vmatmul.mubr.msk.bf16.vlgmr.msra.gmra.mxu0 %vm2138_vm1, %v2584_v41  ;;  %10538 = vmatmul.mubr.msk.bf16.vlgmr.msra.gmra.mxu1 %vm2138_vm1, %v2584_v41 }
 0x79b   :  { %2812 = vmatpush1.bf16.msra.mxu0 %v11048_v50  ;;  %10542 = vmatpush3.bf16.msra.mxu1 %v11051_v53  ;;  %v2581_v54 = vpop.f32.mrf.mxu1 }
 0x79c   :  { %2813 = vmatprep.subr.bf16.mxu0 %v11054_v33  ;;  %10543 = vmatprep.subr.bf16.mxu1 %v12259_v6 }
 0x79d   :  { %v10528_v60 = vpop.f32.mrf.mxu1  ;;  %2835 = vmatprep.mubr.bf16.mxu0 %v12258_v9  ;;  %10549 = vmatprep.mubr.msk.bf16.mxu1 %vm12260_vm0, %v12259_v6 }
 0x79f   :  { %2814 = vmatpush1.bf16.msra.mxu0 %v11052_v19  ;;  %10544 = vmatpush3.bf16.msra.mxu1 %v11055_v55 }
 0x7a0   :  { %2815 = vmatprep.subr.bf16.mxu0 %v11058_v56  ;;  %10545 = vmatprep.subr.bf16.mxu1 %v12259_v6 }
 0x7a3   :  { %2816 = vmatpush1.bf16.msra.mxu0 %v11056_v61  ;;  %10546 = vmatpush3.bf16.msra.mxu1 %v11059_v23 }
 0x7a4   :  { %2817 = vmatprep.subr.bf16.mxu0 %v11062_v2  ;;  %10547 = vmatprep.subr.bf16.mxu1 %v12259_v6 }
 0x7a7   :  { %2818 = vmatpush1.bf16.msra.mxu0 %v11060_v3  ;;  %10548 = vmatpush3.bf16.msra.mxu1 %v11063_v7 }
 0x7a8   :  { %10553 = vmatprep.subr.bf16.mxu0 %v12259_v6  ;;  %10559 = vmatprep.subr.bf16.mxu1 %v12259_v6 }
 0x7aa   :  { %9570 = vmatmul.mubr.msk.bf16.vlgmr.msra.gmra.mxu0 %vm2138_vm1, %v12570_v1  ;;  %10550 = vmatmul.mubr.msk.bf16.vlgmr.msra.gmra.mxu1 %vm2138_vm1, %v12570_v1  ;;  %v12640_v1 = vpack.c.bf16 %v12470_v18, %v12470_v18 }
 0x7ab   :  { %10554 = vmatpush3.bf16.xpose.msra.mxu0 %v2897_v62  ;;  %10560 = vmatpush3.bf16.xpose.msra.mxu1 %v2943_v13 }
 0x7ac   :  { %10555 = vmatprep.mubr.msk.bf16.mxu0 %vm12260_vm0, %v12259_v6  ;;  %10561 = vmatprep.mubr.msk.bf16.mxu1 %vm12260_vm0, %v12259_v6 }
 0x7ad   :  { %10565 = vmatprep.subr.bf16.mxu0 %v12259_v6  ;;  %10571 = vmatprep.subr.bf16.mxu1 %v12259_v6 }
 0x7b2   :  { %10556 = vmatmul.mubr.msk.bf16.vlgmr.msra.gmra.mxu0 %vm2138_vm1, %v12640_v1  ;;  %10562 = vmatmul.mubr.msk.bf16.vlgmr.msra.gmra.mxu1 %vm2138_vm1, %v12642_v20 }
 0x7b3   :  { %10566 = vmatpush3.bf16.msra.mxu0 %v3017_v27  ;;  %10572 = vmatpush3.bf16.msra.mxu1 %v3063_v12 }
 0x7b4   :  { %10567 = vmatprep.mubr.msk.bf16.mxu0 %vm12260_vm0, %v12259_v6  ;;  %10573 = vmatprep.mubr.msk.bf16.mxu1 %vm12260_vm0, %v12259_v6 }
 0x7b5   :  { %10577 = vmatprep.subr.bf16.mxu1 %v12259_v6 }
 0x85a   :  { %v2729_v18 = vpop.f32.mrf.mxu1  ;;  %v2686_v11 = vpop.f32.mrf.mxu0 }
 0x85c   :  { %v10539_v14 = vpop.f32.mrf.mxu1  ;;  %v2688_v16 = vpop.f32.mrf.mxu0 }
 0x85e   :  { %v2732_v15 = vpop.f32.mrf.mxu1  ;;  %v2690_v21 = vpop.f32.mrf.mxu0 }
 0x860   :  { %v10540_v17 = vpop.f32.mrf.mxu1  ;;  %v2692_v22 = vpop.f32.mrf.mxu0 }
 0x86a   :  { %v2837_v30 = vpop.f32.mrf.mxu0  ;;  %v2880_v51 = vpop.f32.mrf.mxu1 }
 0x86b   :  { %v12657_v59 = vadd.f32 %v2837_v30, %v2686_v11  ;;  %v12659_v38 = vadd.f32 %v2880_v51, %v2729_v18  ;;  %v11066_v30 = vld [vmem:[#allocation10 + $0x10c] ss:$12 sps:$4 sm:$0xff]  }
 0x86c   :  { %v2839_v43 = vpop.f32.mrf.mxu0  ;;  %v10551_v34 = vpop.f32.mrf.mxu1  ;;  %3181 = vmatprep.subr.bf16.mxu0 %v11066_v30 }
 0x86d   :  { %v12661_v32 = vadd.f32 %v2839_v43, %v2688_v16 }
 0x86e   :  { %v2841_v48 = vpop.f32.mrf.mxu0  ;;  %v2883_v50 = vpop.f32.mrf.mxu1 }
 0x86f   :  { %v12663_v53 = vadd.f32 %v2841_v48, %v2690_v21  ;;  %v12665_v41 = vadd.f32 %v2883_v50, %v2732_v15 }
 0x870   :  { %v2843_v33 = vpop.f32.mrf.mxu0  ;;  %v10552_v58 = vpop.f32.mrf.mxu1 }
 0x871   :  { %v12667_v42 = vadd.f32 %v2843_v33, %v2692_v22 }
 0x872   :  { %v2933_v54 = vpop.f32.mrf.mxu0  ;;  %v2979_v19 = vpop.f32.mrf.mxu1 }
 0x873   :  { %v2985_v55 = vmul.f32 0.125, %v2933_v54  ;;  %v2986_v56 = vmul.f32 0.125, %v2979_v19  ;;  %v11067_v54 = vld [vmem:[#allocation10 + $0x110] ss:$12 sps:$4 sm:$0xff]  }
 0x874   :  { %v10557_v60 = vpop.f32.mrf.mxu0  ;;  %v10563_v61 = vpop.f32.mrf.mxu1 }
 0x875   :  { %v2987_v23 = vsel %vm12534_vm3, %v2985_v55, -inf  ;;  %v2988_v2 = vsel %vm12534_vm3, %v2986_v56, -inf  ;;  %v11074_v55 = vld [vmem:[#allocation10 + $0xdc] ss:$12 sps:$4 sm:$0xff]   ;;  %v11072_v56 = vld [vmem:[#allocation10 + $0xd8] ss:$12 sps:$4 sm:$0xff]  }
 0x876   :  { %v2936_v3 = vpop.f32.mrf.mxu0  ;;  %v2982_v7 = vpop.f32.mrf.mxu1  ;;  %v2989_v62 = vsel %vm2235_vm4, %v2987_v23, -inf  ;;  %v2992_v13 = vsel %vm2235_vm4, %v2988_v2, -inf  ;;  %v11075_v60 = vld [vmem:[#allocation10 + $0xe0] ss:$12 sps:$4 sm:$0xff]   ;;  %v11078_v61 = vld [vmem:[#allocation10 + $0xc4] ss:$12 sps:$4 sm:$0xff]  }
 0x877   :  { %2990 = vmax.xlane.f32.xlu1 %v2989_v62  ;;  %2993 = vmax.xlane.f32.xlu0 %v2992_v13 }
 0x878   :  { %v10558_v40 = vpop.f32.mrf.mxu0  ;;  %v10564_v63 = vpop.f32.mrf.mxu1 }
 0x900   :  { %v2991_v27 = vpop.xlane.xlu1 %2990  ;;  %v2994_v12 = vpop.xlane.xlu0 %2993 }
 0x901   :  { %v2995_v18 = vsub.f32 %v2987_v23, %v2991_v27  ;;  %v2996_v11 = vsub.f32 %v2988_v2, %v2994_v12  ;;  %v11076_v23 = vld [vmem:[#allocation10 + $0xc0] ss:$12 sps:$4 sm:$0xff]   ;;  %v11079_v2 = vld [vmem:[#allocation10 + $0xc8] ss:$12 sps:$4 sm:$0xff]  }
 0x903   :  { %v2997_v14 = vmul.f32 1.442695, %v2995_v18  ;;  %v2999_v15 = vmul.f32 1.442695, %v2996_v11 }
 0x905   :  { %11964 = vpow2.f32 %v2997_v14 }
 0x906   :  { %11966 = vpow2.f32 %v2999_v15 }
 0x912   :  { %v11965_v16 = vpop.eup %11964 }
 0x913   :  { %v11967_v17 = vpop.eup %11966  ;;  %v3001_v21 = vsel %vm2235_vm4, %v11965_v16, 0.0 }
 0x914   :  { %3002 = vadd.xlane.f32.xlu0 %v3001_v21  ;;  %v3004_v22 = vsel %vm2235_vm4, %v11967_v17, 0.0 }
 0x915   :  { %3005 = vadd.xlane.f32.xlu1 %v3004_v22 }
 0x926   :  { %3319 = vrot.lane.b32.xlu1 %v12610_v10, %s12261_s8  ;;  %v11064_v10 = vld [vmem:[#allocation10 + $0x108] ss:$12 sps:$4 sm:$0xff]  }
 0x92a   :  { %3264 = vrot.lane.b32.xlu1 %v12640_v1, %s12261_s8  ;;  %3267 = vrot.lane.b32.xlu0 %v12606_v8, %s12261_s8  ;;  %v11070_v1 = vld [vmem:[#allocation10 + $0xf4] ss:$12 sps:$4 sm:$0xff]   ;;  %v11068_v8 = vld [vmem:[#allocation10 + $0xf0] ss:$12 sps:$4 sm:$0xff]  }
 0x92e   :  { %3316 = vrot.lane.b32.xlu1 %v12642_v20, %s12261_s8  ;;  %v11071_v20 = vld [vmem:[#allocation10 + $0xf8] ss:$12 sps:$4 sm:$0xff]  }
 0x99d   :  { %v3003_v51 = vpop.xlane.xlu0 %3002 }
 0x99e   :  { %v3006_v43 = vpop.xlane.xlu1 %3005  ;;  %11968 = vrcp.f32 %v3003_v51 }
 0x99f   :  { %11970 = vrcp.f32 %v3006_v43 }
 0x9a1   :  { %v3268_v62 = vpop.permute.xlu0 %3267 }
 0x9a2   :  { %v3320_v3 = vpop.permute.xlu1 %3319  ;;  %v3273_v18 = vsel %vm2138_vm1, %v3268_v62, 0 }
 0x9a3   :  { %v3325_v12 = vsel %vm2138_vm1, %v3320_v3, 0 }
 0x9a6   :  { %v3265_v14 = vpop.permute.xlu1 %3264 }
 0x9aa   :  { %v3317_v21 = vpop.permute.xlu1 %3316 }
 0x9ab   :  { %v11969_v34 = vpop.eup %11968 }
 0x9ac   :  { %v11971_v48 = vpop.eup %11970  ;;  %v3009_v50 = vmul.f32 %v11969_v34, %v11965_v16 }
 0x9ad   :  { %v3010_v33 = vmul.f32 %v11971_v48, %v11967_v17 }
 0x9ae   :  { %v3011_v58 = vpack.c.bf16 %v3009_v50, %v3009_v50 }
 0x9af   :  { %v3012_v19 = vpack.c.bf16 %v3010_v33, %v3010_v33 }
 0x9b0   :  { %10568 = vmatmul.mubr.msk.bf16.vlgmr.msra.gmra.mxu0 %vm2235_vm4, %v3011_v58 }
 0x9b1   :  { %10574 = vmatmul.mubr.msk.bf16.vlgmr.msra.gmra.mxu1 %vm2235_vm4, %v3012_v19  ;;  %3182 = vmatpush1.bf16.msra.mxu0 %v11064_v10 }
 0x9b2   :  { %10578 = vmatpush3.bf16.msra.mxu1 %v11067_v54  ;;  %3183 = vmatprep.subr.bf16.mxu0 %v11070_v1 }
 0x9b3   :  { %10579 = vmatprep.subr.bf16.mxu1 %v12259_v6  ;;  %3205 = vmatprep.mubr.bf16.mxu0 %v12258_v9 }
 0x9b4   :  { %10585 = vmatprep.mubr.msk.bf16.mxu1 %vm12260_vm0, %v12259_v6 }
 0x9b5   :  { %3184 = vmatpush1.bf16.msra.mxu0 %v11068_v8 }
 0x9b6   :  { %10580 = vmatpush3.bf16.msra.mxu1 %v11071_v20  ;;  %3185 = vmatprep.subr.bf16.mxu0 %v11074_v55 }
 0x9b7   :  { %10581 = vmatprep.subr.bf16.mxu1 %v12259_v6 }
 0x9b9   :  { %3186 = vmatpush1.bf16.msra.mxu0 %v11072_v56 }
 0x9ba   :  { %10582 = vmatpush3.bf16.msra.mxu1 %v11075_v60  ;;  %3187 = vmatprep.subr.bf16.mxu0 %v11078_v61 }
 0x9bb   :  { %10583 = vmatprep.subr.bf16.mxu1 %v12259_v6 }
 0x9bd   :  { %3188 = vmatpush1.bf16.msra.mxu0 %v11076_v23 }
 0x9be   :  { %10584 = vmatpush3.bf16.msra.mxu1 %v11079_v2  ;;  %10589 = vmatprep.subr.bf16.mxu0 %v12259_v6 }
 0x9bf   :  { %10595 = vmatprep.subr.bf16.mxu1 %v12259_v6 }
 0xa70   :  { %v3053_v7 = vpop.f32.mrf.mxu0 }
 0xa71   :  { %v3099_v13 = vpop.f32.mrf.mxu1 }
 0xa72   :  { %v3105_v40 = vpack.c.bf16 %v3099_v13, %v3053_v7  ;;  %v10569_v63 = vpop.f32.mrf.mxu0 }
 0xa73   :  { %v10575_v27 = vpop.f32.mrf.mxu1 }
 0xa74   :  { %9588 = vmatmul.mubr.msk.bf16.vlgmr.msra.gmra.mxu0 %vm2138_vm1, %v3105_v40  ;;  %10586 = vmatmul.mubr.msk.bf16.vlgmr.msra.gmra.mxu1 %vm2138_vm1, %v3105_v40  ;;  %v3056_v11 = vpop.f32.mrf.mxu0 }
 0xa75   :  { %10590 = vmatpush3.bf16.xpose.msra.mxu0 %v3273_v18  ;;  %10596 = vmatpush3.bf16.xpose.msra.mxu1 %v3325_v12  ;;  %v3102_v15 = vpop.f32.mrf.mxu1 }
 0xa76   :  { %v10570_v16 = vpop.f32.mrf.mxu0  ;;  %10591 = vmatprep.mubr.msk.bf16.mxu0 %vm12260_vm0, %v12259_v6  ;;  %10597 = vmatprep.mubr.msk.bf16.mxu1 %vm12260_vm0, %v12259_v6 }
 0xa77   :  { %v10576_v17 = vpop.f32.mrf.mxu1  ;;  %10607 = vmatprep.subr.bf16.mxu1 %v12259_v6  ;;  %10601 = vmatprep.subr.bf16.mxu0 %v12259_v6 }
 0xa7c   :  { %10592 = vmatmul.mubr.msk.bf16.vlgmr.msra.gmra.mxu0 %vm2138_vm1, %v3265_v14  ;;  %10598 = vmatmul.mubr.msk.bf16.vlgmr.msra.gmra.mxu1 %vm2138_vm1, %v3317_v21  ;;  %v11082_v21 = vld [vmem:[#allocation10 + $0x16c] ss:$12 sps:$4 sm:$0xff]  }
 0xa7d   :  { %10603 = vmatprep.mubr.msk.bf16.mxu0 %vm12260_vm0, %v12259_v6  ;;  %10609 = vmatprep.mubr.msk.bf16.mxu1 %vm12260_vm0, %v12259_v6 }
 0xb34   :  { %v3207_v22 = vpop.f32.mrf.mxu0  ;;  %v3250_v30 = vpop.f32.mrf.mxu1 }
 0xb35   :  { %v12712_v51 = vadd.f32 %v3207_v22, %v12657_v59  ;;  %v12715_v43 = vadd.f32 %v3250_v30, %v12659_v38 }
 0xb36   :  { %v3209_v34 = vpop.f32.mrf.mxu0  ;;  %v10587_v48 = vpop.f32.mrf.mxu1 }
 0xb37   :  { %v12718_v50 = vadd.f32 %v3209_v34, %v12661_v32 }
 0xb38   :  { %v3211_v33 = vpop.f32.mrf.mxu0  ;;  %v3253_v10 = vpop.f32.mrf.mxu1 }
 0xb39   :  { %v12721_v58 = vadd.f32 %v3211_v33, %v12663_v53  ;;  %v12724_v54 = vadd.f32 %v3253_v10, %v12665_v41  ;;  %v11080_v33 = vld [vmem:[#allocation10 + $0x168] ss:$12 sps:$4 sm:$0xff]  }
 0xb3a   :  { %v3213_v1 = vpop.f32.mrf.mxu0  ;;  %v10588_v19 = vpop.f32.mrf.mxu1 }
 0xb3b   :  { %v12727_v59 = vadd.f32 %v3213_v1, %v12667_v42  ;;  %v11086_v1 = vld [vmem:[#allocation10 + $0x154] ss:$12 sps:$4 sm:$0xff]  }
 0xb3c   :  { %v3309_v38 = vpop.f32.mrf.mxu0  ;;  %v3361_v8 = vpop.f32.mrf.mxu1 }
 0xb3d   :  { %v3367_v20 = vmul.f32 0.125, %v3309_v38  ;;  %v3368_v55 = vmul.f32 0.125, %v3361_v8  ;;  %v11084_v8 = vld [vmem:[#allocation10 + $0x150] ss:$12 sps:$4 sm:$0xff]  }
 0xb3e   :  { %v10593_v56 = vpop.f32.mrf.mxu0  ;;  %v10599_v32 = vpop.f32.mrf.mxu1 }
 0xb3f   :  { %v3369_v60 = vsel %vm12534_vm3, %v3367_v20, -inf  ;;  %v3370_v53 = vsel %vm12534_vm3, %v3368_v55, -inf  ;;  %v11090_v55 = vld [vmem:[#allocation10 + $0x13c] ss:$12 sps:$4 sm:$0xff]   ;;  %v11087_v56 = vld [vmem:[#allocation10 + $0x158] ss:$12 sps:$4 sm:$0xff]  }
 0xb40   :  { %v3312_v61 = vpop.f32.mrf.mxu0  ;;  %v3364_v41 = vpop.f32.mrf.mxu1  ;;  %v3371_v23 = vsel %vm2235_vm4, %v3369_v60, -inf  ;;  %v3374_v2 = vsel %vm2235_vm4, %v3370_v53, -inf  ;;  %v11088_v32 = vld [vmem:[#allocation10 + $0x138] ss:$12 sps:$4 sm:$0xff]  }
 0xb41   :  { %3372 = vmax.xlane.f32.xlu0 %v3371_v23  ;;  %3375 = vmax.xlane.f32.xlu1 %v3374_v2  ;;  %v11092_v61 = vld [vmem:[#allocation10 + $0x120] ss:$12 sps:$4 sm:$0xff]   ;;  %v11095_v41 = vld [vmem:[#allocation10 + $0x128] ss:$12 sps:$4 sm:$0xff]   ;;  %v1861_v23 = vadd.f32 %v12510_v4, %v12508_v0 }
 0xb42   :  { %v10594_v42 = vpop.f32.mrf.mxu0  ;;  %v10600_v3 = vpop.f32.mrf.mxu1 }
 0xb43   :  { %v12758_v3 = vpack.c.bf16 %v12504_v57, %v12504_v57 }
 0xb52   :  { %3445 = vrot.lane.b32.xlu1 %v12636_v29, %s12261_s8 }
 0xbca   :  { %v3373_v7 = vpop.xlane.xlu0 %3372  ;;  %v3376_v62 = vpop.xlane.xlu1 %3375 }
 0xbcb   :  { %v3377_v13 = vsub.f32 %v3369_v60, %v3373_v7  ;;  %v3378_v40 = vsub.f32 %v3370_v53, %v3376_v62  ;;  %v11091_v60 = vld [vmem:[#allocation10 + $0x140] ss:$12 sps:$4 sm:$0xff]   ;;  %v11094_v53 = vld [vmem:[#allocation10 + $0x124] ss:$12 sps:$4 sm:$0xff]   ;;  %v12760_v7 = vpack.c.bf16 %v1861_v23, %v1861_v23 }
 0xbcd   :  { %v3379_v63 = vmul.f32 1.442695, %v3377_v13  ;;  %v3381_v27 = vmul.f32 1.442695, %v3378_v40  ;;  %v3707_v0 = vsel %vm2138_vm1, %v12760_v7, 0 }
 0xbce   :  { %v3446_v12 = vpop.permute.xlu1 %3445 }
 0xbcf   :  { %11972 = vpow2.f32 %v3379_v63  ;;  %v3451_v18 = vsel %vm2263_vm2, %v3446_v12, 0  ;;  %v3661_v12 = vsel %vm2138_vm1, %v12758_v3, 0 }
 0xbd0   :  { %10608 = vmatpush3.bf16.msra.mxu1 %v3451_v18  ;;  %11974 = vpow2.f32 %v3381_v27  ;;  %v12776_v18 = vpack.c.bf16 %v12528_v36, %v12528_v36 }
 0xbd1   :  { %10613 = vmatprep.subr.bf16.mxu1 %v12259_v6 }
 0xbdc   :  { %v11973_v11 = vpop.eup %11972 }
 0xbdd   :  { %v3383_v14 = vsel %vm2235_vm4, %v11973_v11, 0.0  ;;  %v11975_v15 = vpop.eup %11974 }
 0xbde   :  { %3384 = vadd.xlane.f32.xlu0 %v3383_v14  ;;  %v3386_v29 = vsel %vm2235_vm4, %v11975_v15, 0.0  ;;  %v3651_v14 = vpack.c.bf16 %v12476_v31, %v12476_v31 }
 0xbe2   :  { %3387 = vadd.xlane.f32.xlu0 %v3386_v29  ;;  %v3781_v29 = vsel %vm2263_vm2, %v12776_v18, 0 }
 0xbf8   :  { %3396 = vrot.lane.b32.xlu0 %v12634_v5, %s12261_s8  ;;  %v11083_v5 = vld [vmem:[#allocation10 + $0x170] ss:$12 sps:$4 sm:$0xff]  }
 0xc67   :  { %v3385_v16 = vpop.xlane.xlu0 %3384 }
 0xc68   :  { %11976 = vrcp.f32 %v3385_v16 }
 0xc6b   :  { %v3388_v17 = vpop.xlane.xlu0 %3387 }
 0xc6c   :  { %11978 = vrcp.f32 %v3388_v17 }
 0xc6f   :  { %v3397_v22 = vpop.permute.xlu0 %3396 }
 0xc70   :  { %v3402_v30 = vsel %vm2263_vm2, %v3397_v22, 0 }
 0xc71   :  { %10602 = vmatpush3.bf16.msra.mxu0 %v3402_v30 }
 0xc72   :  { %3569 = vmatprep.subr.bf16.mxu0 %v11082_v21 }
 0xc75   :  { %v11977_v34 = vpop.eup %11976 }
 0xc76   :  { %v3391_v48 = vmul.f32 %v11977_v34, %v11973_v11  ;;  %v12780_v11 = vpack.c.bf16 %v12530_v47, %v12530_v47 }
 0xc78   :  { %v3393_v10 = vpack.c.bf16 %v3391_v48, %v3391_v48  ;;  %v3827_v16 = vsel %vm2263_vm2, %v12780_v11, 0 }
 0xc79   :  { %v11979_v19 = vpop.eup %11978 }
 0xc7a   :  { %10604 = vmatmul.mubr.msk.bf16.vlgmr.msra.gmra.mxu0 %vm2235_vm4, %v3393_v10  ;;  %v3392_v38 = vmul.f32 %v11979_v19, %v11975_v15  ;;  %v3652_v15 = vpack.c.bf16 %v12480_v46, %v12480_v46 }
 0xc7b   :  { %3570 = vmatpush1.bf16.msra.mxu0 %v11080_v33  ;;  %3593 = vmatprep.mubr.bf16.mxu0 %v12258_v9 }
 0xc7c   :  { %v3394_v20 = vpack.c.bf16 %v3392_v38, %v3392_v38  ;;  %3571 = vmatprep.subr.bf16.mxu0 %v11086_v1 }
 0xc7e   :  { %10610 = vmatmul.mubr.msk.bf16.vlgmr.msra.gmra.mxu1 %vm2235_vm4, %v3394_v20 }
 0xc7f   :  { %10614 = vmatpush3.bf16.msra.mxu1 %v11083_v5  ;;  %3572 = vmatpush1.bf16.msra.mxu0 %v11084_v8 }
 0xc80   :  { %10615 = vmatprep.subr.bf16.mxu1 %v12259_v6  ;;  %3573 = vmatprep.subr.bf16.mxu0 %v11090_v55 }
 0xc81   :  { %10621 = vmatprep.mubr.msk.bf16.mxu1 %vm12260_vm0, %v12259_v6 }
 0xc83   :  { %10616 = vmatpush3.bf16.msra.mxu1 %v11087_v56  ;;  %3574 = vmatpush1.bf16.msra.mxu0 %v11088_v32 }
 0xc84   :  { %10617 = vmatprep.subr.bf16.mxu1 %v12259_v6  ;;  %3575 = vmatprep.subr.bf16.mxu0 %v11094_v53 }
 0xc87   :  { %10618 = vmatpush3.bf16.msra.mxu1 %v11091_v60  ;;  %3576 = vmatpush1.bf16.msra.mxu0 %v11092_v61 }
 0xc88   :  { %10619 = vmatprep.subr.bf16.mxu1 %v12259_v6  ;;  %10625 = vmatprep.subr.bf16.mxu0 %v12259_v6 }
 0xc8b   :  { %10620 = vmatpush3.bf16.msra.mxu1 %v11095_v41 }
 0xc8c   :  { %10631 = vmatprep.subr.bf16.mxu1 %v12259_v6 }
 0xd3a   :  { %v3438_v2 = vpop.f32.mrf.mxu0 }
 0xd3c   :  { %v10605_v42 = vpop.f32.mrf.mxu0 }
 0xd3e   :  { %v3441_v62 = vpop.f32.mrf.mxu0  ;;  %v3487_v13 = vpop.f32.mrf.mxu1 }
 0xd3f   :  { %v3493_v40 = vpack.c.bf16 %v3487_v13, %v3438_v2 }
 0xd40   :  { %v10606_v63 = vpop.f32.mrf.mxu0  ;;  %v10611_v27 = vpop.f32.mrf.mxu1 }
 0xd41   :  { %9606 = vmatmul.mubr.msk.bf16.vlgmr.msra.gmra.mxu0 %vm2138_vm1, %v3493_v40  ;;  %10622 = vmatmul.mubr.msk.bf16.vlgmr.msra.gmra.mxu1 %vm2138_vm1, %v3493_v40  ;;  %v11098_v27 = vld [vmem:[#allocation10 + $0x1cc] ss:$12 sps:$4 sm:$0xff]  }
 0xd42   :  { %10626 = vmatpush3.bf16.xpose.msra.mxu0 %v3661_v12  ;;  %10632 = vmatpush3.bf16.xpose.msra.mxu1 %v3707_v0  ;;  %v3490_v57 = vpop.f32.mrf.mxu1 }
 0xd43   :  { %10627 = vmatprep.mubr.msk.bf16.mxu0 %vm12260_vm0, %v12259_v6  ;;  %10633 = vmatprep.mubr.msk.bf16.mxu1 %vm12260_vm0, %v12259_v6 }
 0xd44   :  { %v10612_v4 = vpop.f32.mrf.mxu1  ;;  %10637 = vmatprep.subr.bf16.mxu0 %v12259_v6  ;;  %10643 = vmatprep.subr.bf16.mxu1 %v12259_v6 }
 0xd49   :  { %10628 = vmatmul.mubr.msk.bf16.vlgmr.msra.gmra.mxu0 %vm2138_vm1, %v3651_v14  ;;  %10634 = vmatmul.mubr.msk.bf16.vlgmr.msra.gmra.mxu1 %vm2138_vm1, %v3652_v15 }
 0xd4a   :  { %10638 = vmatpush3.bf16.msra.mxu0 %v3781_v29  ;;  %10644 = vmatpush3.bf16.msra.mxu1 %v3827_v16 }
 0xd4b   :  { %10639 = vmatprep.mubr.msk.bf16.mxu0 %vm12260_vm0, %v12259_v6  ;;  %10645 = vmatprep.mubr.msk.bf16.mxu1 %vm12260_vm0, %v12259_v6 }
 0xd4c   :  { %10649 = vmatprep.subr.bf16.mxu1 %v12259_v6  ;;  %3945 = vmatprep.subr.bf16.mxu0 %v11098_v27 }
 0xe01   :  { %v3595_v31 = vpop.f32.mrf.mxu0  ;;  %v3638_v46 = vpop.f32.mrf.mxu1 }
 0xe02   :  { %v12798_v36 = vadd.f32 %v3595_v31, %v12712_v51  ;;  %v12801_v47 = vadd.f32 %v3638_v46, %v12715_v43  ;;  %v11096_v31 = vld [vmem:[#allocation10 + $0x1c8] ss:$12 sps:$4 sm:$0xff]  }
 0xe03   :  { %v3597_v17 = vpop.f32.mrf.mxu0  ;;  %v10623_v21 = vpop.f32.mrf.mxu1 }
 0xe04   :  { %v12804_v22 = vadd.f32 %v3597_v17, %v12718_v50  ;;  %v11102_v17 = vld [vmem:[#allocation10 + $0x1b4] ss:$12 sps:$4 sm:$0xff]   ;;  %v11106_v21 = vld [vmem:[#allocation10 + $0x19c] ss:$12 sps:$4 sm:$0xff]  }
 0xe05   :  { %v3599_v30 = vpop.f32.mrf.mxu0  ;;  %v3641_v34 = vpop.f32.mrf.mxu1 }
 0xe06   :  { %v12807_v48 = vadd.f32 %v3599_v30, %v12721_v58  ;;  %v12810_v33 = vadd.f32 %v3641_v34, %v12724_v54  ;;  %v11104_v30 = vld [vmem:[#allocation10 + $0x198] ss:$12 sps:$4 sm:$0xff]   ;;  %v11107_v34 = vld [vmem:[#allocation10 + $0x1a0] ss:$12 sps:$4 sm:$0xff]  }
 0xe07   :  { %v3601_v10 = vpop.f32.mrf.mxu0  ;;  %v10624_v1 = vpop.f32.mrf.mxu1 }
 0xe08   :  { %v12813_v51 = vadd.f32 %v3601_v10, %v12727_v59  ;;  %v11110_v10 = vld [vmem:[#allocation10 + $0x184] ss:$12 sps:$4 sm:$0xff]   ;;  %v11108_v1 = vld [vmem:[#allocation10 + $0x180] ss:$12 sps:$4 sm:$0xff]  }
 0xe09   :  { %v3697_v43 = vpop.f32.mrf.mxu0  ;;  %v3743_v19 = vpop.f32.mrf.mxu1 }
 0xe0a   :  { %v3749_v38 = vmul.f32 0.125, %v3697_v43  ;;  %v3750_v5 = vmul.f32 0.125, %v3743_v19  ;;  %v11111_v43 = vld [vmem:[#allocation10 + $0x188] ss:$12 sps:$4 sm:$0xff]  }
 0xe0b   :  { %v10629_v8 = vpop.f32.mrf.mxu0  ;;  %v10635_v50 = vpop.f32.mrf.mxu1 }
 0xe0c   :  { %v3751_v20 = vsel %vm12534_vm3, %v3749_v38, -inf  ;;  %v3752_v58 = vsel %vm12534_vm3, %v3750_v5, -inf }
 0xe0d   :  { %v3700_v55 = vpop.f32.mrf.mxu0  ;;  %v3746_v54 = vpop.f32.mrf.mxu1  ;;  %v3753_v56 = vsel %vm2235_vm4, %v3751_v20, -inf  ;;  %v3756_v32 = vsel %vm2235_vm4, %v3752_v58, -inf }
 0xe0e   :  { %3754 = vmax.xlane.f32.xlu1 %v3753_v56  ;;  %3757 = vmax.xlane.f32.xlu0 %v3756_v32 }
 0xe0f   :  { %v10630_v59 = vpop.f32.mrf.mxu0  ;;  %v10636_v60 = vpop.f32.mrf.mxu1 }
 0xe97   :  { %v3755_v53 = vpop.xlane.xlu1 %3754  ;;  %v3758_v61 = vpop.xlane.xlu0 %3757 }
 0xe98   :  { %v3759_v41 = vsub.f32 %v3751_v20, %v3755_v53  ;;  %v3760_v23 = vsub.f32 %v3752_v58, %v3758_v61 }
 0xe9a   :  { %v3761_v2 = vmul.f32 1.442695, %v3759_v41  ;;  %v3763_v42 = vmul.f32 1.442695, %v3760_v23 }
 0xe9c   :  { %11980 = vpow2.f32 %v3761_v2 }
 0xe9d   :  { %11982 = vpow2.f32 %v3763_v42 }
 0xea9   :  { %v11981_v62 = vpop.eup %11980 }
 0xeaa   :  { %v11983_v13 = vpop.eup %11982  ;;  %v3765_v40 = vsel %vm2235_vm4, %v11981_v62, 0.0 }
 0xeab   :  { %3766 = vadd.xlane.f32.xlu0 %v3765_v40  ;;  %v3768_v63 = vsel %vm2235_vm4, %v11983_v13, 0.0 }
 0xeac   :  { %3769 = vadd.xlane.f32.xlu1 %v3768_v63 }
 0xebd   :  { %4083 = vrot.lane.b32.xlu1 %v12760_v7, %s12261_s8  ;;  %v11099_v7 = vld [vmem:[#allocation10 + $0x1d0] ss:$12 sps:$4 sm:$0xff]  }
 0xec1   :  { %4028 = vrot.lane.b32.xlu1 %v3651_v14, %s12261_s8  ;;  %4031 = vrot.lane.b32.xlu0 %v12758_v3, %s12261_s8  ;;  %v11100_v3 = vld [vmem:[#allocation10 + $0x1b0] ss:$12 sps:$4 sm:$0xff]  }
 0xec5   :  { %4080 = vrot.lane.b32.xlu1 %v3652_v15, %s12261_s8  ;;  %v11103_v15 = vld [vmem:[#allocation10 + $0x1b8] ss:$12 sps:$4 sm:$0xff]  }
 0xf34   :  { %v3767_v12 = vpop.xlane.xlu0 %3766 }
 0xf35   :  { %v3770_v0 = vpop.xlane.xlu1 %3769  ;;  %11984 = vrcp.f32 %v3767_v12 }
 0xf36   :  { %11986 = vrcp.f32 %v3770_v0 }
 0xf38   :  { %v4032_v5 = vpop.permute.xlu0 %4031 }
 0xf39   :  { %v4084_v19 = vpop.permute.xlu1 %4083  ;;  %v4037_v54 = vsel %vm2138_vm1, %v4032_v5, 0 }
 0xf3a   :  { %v4089_v55 = vsel %vm2138_vm1, %v4084_v19, 0 }
 0xf3d   :  { %v4029_v32 = vpop.permute.xlu1 %4028 }
 0xf41   :  { %v4081_v61 = vpop.permute.xlu1 %4080 }
 0xf42   :  { %v11985_v57 = vpop.eup %11984 }
 0xf43   :  { %v11987_v4 = vpop.eup %11986  ;;  %v3773_v29 = vmul.f32 %v11985_v57, %v11981_v62 }
 0xf44   :  { %v3774_v16 = vmul.f32 %v11987_v4, %v11983_v13 }
 0xf45   :  { %v3775_v46 = vpack.c.bf16 %v3773_v29, %v3773_v29 }
 0xf46   :  { %v3776_v14 = vpack.c.bf16 %v3774_v16, %v3774_v16 }
 0xf47   :  { %10640 = vmatmul.mubr.msk.bf16.vlgmr.msra.gmra.mxu0 %vm2235_vm4, %v3775_v46 }
 0xf48   :  { %10646 = vmatmul.mubr.msk.bf16.vlgmr.msra.gmra.mxu1 %vm2235_vm4, %v3776_v14  ;;  %3946 = vmatpush1.bf16.msra.mxu0 %v11096_v31 }
 0xf49   :  { %10650 = vmatpush3.bf16.msra.mxu1 %v11099_v7  ;;  %3947 = vmatprep.subr.bf16.mxu0 %v11102_v17 }
 0xf4a   :  { %10651 = vmatprep.subr.bf16.mxu1 %v12259_v6  ;;  %3969 = vmatprep.mubr.bf16.mxu0 %v12258_v9 }
 0xf4b   :  { %10657 = vmatprep.mubr.msk.bf16.mxu1 %vm12260_vm0, %v12259_v6 }
 0xf4c   :  { %3948 = vmatpush1.bf16.msra.mxu0 %v11100_v3 }
 0xf4d   :  { %10652 = vmatpush3.bf16.msra.mxu1 %v11103_v15  ;;  %3949 = vmatprep.subr.bf16.mxu0 %v11106_v21 }
 0xf4e   :  { %10653 = vmatprep.subr.bf16.mxu1 %v12259_v6 }
 0xf50   :  { %3950 = vmatpush1.bf16.msra.mxu0 %v11104_v30 }
 0xf51   :  { %10654 = vmatpush3.bf16.msra.mxu1 %v11107_v34  ;;  %3951 = vmatprep.subr.bf16.mxu0 %v11110_v10 }
 0xf52   :  { %10655 = vmatprep.subr.bf16.mxu1 %v12259_v6 }
 0xf54   :  { %3952 = vmatpush1.bf16.msra.mxu0 %v11108_v1 }
 0xf55   :  { %10656 = vmatpush3.bf16.msra.mxu1 %v11111_v43  ;;  %10661 = vmatprep.subr.bf16.mxu0 %v12259_v6 }
 0xf56   :  { %10667 = vmatprep.subr.bf16.mxu1 %v12259_v6 }
0x1007   :  { %v3817_v38 = vpop.f32.mrf.mxu0 }
0x1008   :  { %v3863_v8 = vpop.f32.mrf.mxu1 }
0x1009   :  { %v3869_v50 = vpack.c.bf16 %v3863_v8, %v3817_v38  ;;  %v10641_v20 = vpop.f32.mrf.mxu0 }
0x100a   :  { %v10647_v58 = vpop.f32.mrf.mxu1 }
0x100b   :  { %9624 = vmatmul.mubr.msk.bf16.vlgmr.msra.gmra.mxu0 %vm2138_vm1, %v3869_v50  ;;  %10658 = vmatmul.mubr.msk.bf16.vlgmr.msra.gmra.mxu1 %vm2138_vm1, %v3869_v50  ;;  %v3820_v56 = vpop.f32.mrf.mxu0  ;;  %v11114_v58 = vld [vmem:[#allocation10 + $0x22c] ss:$12 sps:$4 sm:$0xff]  }
0x100c   :  { %10662 = vmatpush3.bf16.xpose.msra.mxu0 %v4037_v54  ;;  %10668 = vmatpush3.bf16.xpose.msra.mxu1 %v4089_v55  ;;  %v3866_v59 = vpop.f32.mrf.mxu1 }
0x100d   :  { %v10642_v60 = vpop.f32.mrf.mxu0  ;;  %10663 = vmatprep.mubr.msk.bf16.mxu0 %vm12260_vm0, %v12259_v6  ;;  %10669 = vmatprep.mubr.msk.bf16.mxu1 %vm12260_vm0, %v12259_v6  ;;  %v11112_v59 = vld [vmem:[#allocation10 + $0x228] ss:$12 sps:$4 sm:$0xff]  }
0x100e   :  { %v10648_v53 = vpop.f32.mrf.mxu1  ;;  %10679 = vmatprep.subr.bf16.mxu1 %v12259_v6  ;;  %10673 = vmatprep.subr.bf16.mxu0 %v12259_v6 }
0x100f   :  { %v11118_v53 = vld [vmem:[#allocation10 + $0x214] ss:$12 sps:$4 sm:$0xff]  }
0x1013   :  { %10664 = vmatmul.mubr.msk.bf16.vlgmr.msra.gmra.mxu0 %vm2138_vm1, %v4029_v32  ;;  %10670 = vmatmul.mubr.msk.bf16.vlgmr.msra.gmra.mxu1 %vm2138_vm1, %v4081_v61 }
0x1014   :  { %10675 = vmatprep.mubr.msk.bf16.mxu0 %vm12260_vm0, %v12259_v6  ;;  %10681 = vmatprep.mubr.msk.bf16.mxu1 %vm12260_vm0, %v12259_v6 }
0x10cb   :  { %v3971_v41 = vpop.f32.mrf.mxu0  ;;  %v4014_v23 = vpop.f32.mrf.mxu1 }
0x10cc   :  { %v12856_v2 = vadd.f32 %v3971_v41, %v12798_v36  ;;  %v12859_v42 = vadd.f32 %v4014_v23, %v12801_v47  ;;  %v11116_v23 = vld [vmem:[#allocation10 + $0x210] ss:$12 sps:$4 sm:$0xff]  }
0x10cd   :  { %v3973_v62 = vpop.f32.mrf.mxu0  ;;  %v10659_v13 = vpop.f32.mrf.mxu1 }
0x10ce   :  { %v12862_v40 = vadd.f32 %v3973_v62, %v12804_v22  ;;  %v11122_v13 = vld [vmem:[#allocation10 + $0x1fc] ss:$12 sps:$4 sm:$0xff]  }
0x10cf   :  { %v3975_v63 = vpop.f32.mrf.mxu0  ;;  %v4017_v27 = vpop.f32.mrf.mxu1 }
0x10d0   :  { %v12865_v12 = vadd.f32 %v3975_v63, %v12807_v48  ;;  %v12868_v0 = vadd.f32 %v4017_v27, %v12810_v33  ;;  %v11119_v63 = vld [vmem:[#allocation10 + $0x218] ss:$12 sps:$4 sm:$0xff]  }
0x10d1   :  { %v3977_v57 = vpop.f32.mrf.mxu0  ;;  %v10660_v4 = vpop.f32.mrf.mxu1  ;;  %v11120_v27 = vld [vmem:[#allocation10 + $0x1f8] ss:$12 sps:$4 sm:$0xff]  }
0x10d2   :  { %v12871_v36 = vadd.f32 %v3977_v57, %v12813_v51  ;;  %v11123_v57 = vld [vmem:[#allocation10 + $0x200] ss:$12 sps:$4 sm:$0xff]  }
0x10d3   :  { %v4073_v47 = vpop.f32.mrf.mxu0  ;;  %v4125_v29 = vpop.f32.mrf.mxu1  ;;  %v11124_v4 = vld [vmem:[#allocation10 + $0x1e0] ss:$12 sps:$4 sm:$0xff]  }
0x10d4   :  { %v4131_v16 = vmul.f32 0.125, %v4073_v47  ;;  %v4132_v31 = vmul.f32 0.125, %v4125_v29  ;;  %v11126_v47 = vld [vmem:[#allocation10 + $0x1e4] ss:$12 sps:$4 sm:$0xff]   ;;  %v11127_v29 = vld [vmem:[#allocation10 + $0x1e8] ss:$12 sps:$4 sm:$0xff]  }
0x10d5   :  { %v10665_v46 = vpop.f32.mrf.mxu0  ;;  %v10671_v22 = vpop.f32.mrf.mxu1 }
0x10d6   :  { %v4133_v7 = vsel %vm12534_vm3, %v4131_v16, -inf  ;;  %v4134_v48 = vsel %vm12534_vm3, %v4132_v31, -inf }
0x10d7   :  { %v4076_v17 = vpop.f32.mrf.mxu0  ;;  %v4128_v33 = vpop.f32.mrf.mxu1  ;;  %v4135_v14 = vsel %vm2235_vm4, %v4133_v7, -inf  ;;  %v4138_v3 = vsel %vm2235_vm4, %v4134_v48, -inf }
0x10d8   :  { %4136 = vmax.xlane.f32.xlu0 %v4135_v14  ;;  %4139 = vmax.xlane.f32.xlu1 %v4138_v3  ;;  %v4421_v3 = vld [vmem:[#allocation11] sm:$0x7] }
0x10d9   :  { %v10666_v51 = vpop.f32.mrf.mxu0  ;;  %v10672_v15 = vpop.f32.mrf.mxu1 }
0x10e9   :  { %4209 = vrot.lane.b32.xlu1 %v12780_v11, %s12261_s8 }
0x1161   :  { %v4137_v21 = vpop.xlane.xlu0 %4136  ;;  %v4140_v30 = vpop.xlane.xlu1 %4139 }
0x1162   :  { %v4141_v34 = vsub.f32 %v4133_v7, %v4137_v21  ;;  %v4142_v10 = vsub.f32 %v4134_v48, %v4140_v30 }
0x1164   :  { %v4143_v1 = vmul.f32 1.442695, %v4141_v34  ;;  %v4145_v52 = vmul.f32 1.442695, %v4142_v10  ;;  %v12000_v10 = vld [vmem:[#allocation2] sm:$0xff] }
0x1165   :  { %v4210_v43 = vpop.permute.xlu1 %4209 }
0x1166   :  { %11988 = vpow2.f32 %v4143_v1  ;;  %v4215_v19 = vsel %vm2263_vm2, %v4210_v43, 0 }
0x1167   :  { %10680 = vmatpush3.bf16.msra.mxu1 %v4215_v19  ;;  %11990 = vpow2.f32 %v4145_v52  ;;  %v4426_v52 = vrot.slane %v4421_v3, %v12392_v28  ;;  %v4430_v19 = vrot.slane %v4421_v3, %v12386_v25 }
0x1168   :  { %10685 = vmatprep.subr.bf16.mxu1 %v12259_v6 }
0x1173   :  { %v11989_v38 = vpop.eup %11988 }
0x1174   :  { %v4147_v5 = vsel %vm2235_vm4, %v11989_v38, 0.0  ;;  %v11991_v8 = vpop.eup %11990 }
0x1175   :  { %4148 = vadd.xlane.f32.xlu0 %v4147_v5  ;;  %v4150_v11 = vsel %vm2235_vm4, %v11991_v8, 0.0 }
0x1179   :  { %4151 = vadd.xlane.f32.xlu0 %v4150_v11 }
0x118f   :  { %4160 = vrot.lane.b32.xlu0 %v12776_v18, %s12261_s8  ;;  %v11115_v18 = vld [vmem:[#allocation10 + $0x230] ss:$12 sps:$4 sm:$0xff]  }
0x11fe   :  { %v4149_v50 = vpop.xlane.xlu0 %4148 }
0x11ff   :  { %11992 = vrcp.f32 %v4149_v50  ;;  %v4434_v50 = vrot.slane %v4421_v3, %v12389_v26  ;;  %v11148_v3 = vld [vmem:[#allocation13 + $0x64] ss:$48 sps:$4 sm:$0xff]  }
0x1202   :  { %v4152_v20 = vpop.xlane.xlu0 %4151 }
0x1203   :  { %11994 = vrcp.f32 %v4152_v20  ;;  %v12002_v20 = vld [vmem:[#allocation2 + $0x8] sm:$0xff] }
0x1206   :  { %v4161_v55 = vpop.permute.xlu0 %4160 }
0x1207   :  { %v4166_v54 = vsel %vm2263_vm2, %v4161_v55, 0 }
0x1208   :  { %10674 = vmatpush3.bf16.msra.mxu0 %v4166_v54 }
0x1209   :  { %4333 = vmatprep.subr.bf16.mxu0 %v11114_v58 }
0x120c   :  { %v11993_v56 = vpop.eup %11992 }
0x120d   :  { %v4155_v32 = vmul.f32 %v11993_v56, %v11989_v38 }
0x120f   :  { %v4157_v60 = vpack.c.bf16 %v4155_v32, %v4155_v32 }
0x1210   :  { %v11995_v61 = vpop.eup %11994 }
0x1211   :  { %10676 = vmatmul.mubr.msk.bf16.vlgmr.msra.gmra.mxu0 %vm2235_vm4, %v4157_v60  ;;  %v4156_v41 = vmul.f32 %v11995_v61, %v11991_v8  ;;  %v12001_v8 = vld [vmem:[#allocation2 + $0x10] sm:$0xff]  ;;  %v12004_v61 = vld [vmem:[#allocation2 + $0x28] sm:$0xff] }
0x1212   :  { %4334 = vmatpush1.bf16.msra.mxu0 %v11112_v59  ;;  %4357 = vmatprep.mubr.bf16.mxu0 %v12258_v9 }
0x1213   :  { %v4158_v62 = vpack.c.bf16 %v4156_v41, %v4156_v41  ;;  %4335 = vmatprep.subr.bf16.mxu0 %v11118_v53 }
0x1215   :  { %10682 = vmatmul.mubr.msk.bf16.vlgmr.msra.gmra.mxu1 %vm2235_vm4, %v4158_v62 }
0x1216   :  { %10686 = vmatpush3.bf16.msra.mxu1 %v11115_v18  ;;  %4336 = vmatpush1.bf16.msra.mxu0 %v11116_v23  ;;  %v12005_v18 = vld [vmem:[#allocation2 + $0x20] sm:$0xff] }
0x1217   :  { %10687 = vmatprep.subr.bf16.mxu1 %v12259_v6  ;;  %4337 = vmatprep.subr.bf16.mxu0 %v11122_v13 }
0x1218   :  { %10693 = vmatprep.mubr.msk.bf16.mxu1 %vm12260_vm0, %v12259_v6 }
0x121a   :  { %10688 = vmatpush3.bf16.msra.mxu1 %v11119_v63  ;;  %4338 = vmatpush1.bf16.msra.mxu0 %v11120_v27 }
0x121b   :  { %10689 = vmatprep.subr.bf16.mxu1 %v12259_v6  ;;  %4339 = vmatprep.subr.bf16.mxu0 %v11126_v47  ;;  %v11133_v47 = vld [vmem:[#allocation13 + $0x244] ss:$48 sps:$4 sm:$0xff]  }
0x121e   :  { %10690 = vmatpush3.bf16.msra.mxu1 %v11123_v57  ;;  %4340 = vmatpush1.bf16.msra.mxu0 %v11124_v4  ;;  %v11128_v57 = vld [vmem:[#allocation13 + $0x2a0] ss:$48 sps:$4 sm:$0xff]   ;;  %v11130_v4 = vld [vmem:[#allocation13 + $0x2a4] ss:$48 sps:$4 sm:$0xff]  }
0x121f   :  { %10691 = vmatprep.subr.bf16.mxu1 %v12259_v6  ;;  %6293 = vmatprep.subr.bf16.mxu0 %v11130_v4  ;;  %v11170_v4 = vld [vmem:[#allocation13 + $0x780] ss:$48 sps:$4 sm:$0xff]  }
0x1222   :  { %10692 = vmatpush3.bf16.msra.mxu1 %v11127_v29  ;;  %v11131_v29 = vld [vmem:[#allocation13 + $0x240] ss:$48 sps:$4 sm:$0xff]  }
0x12d1   :  { %v4202_v16 = vpop.f32.mrf.mxu0 }
0x12d3   :  { %v10677_v31 = vpop.f32.mrf.mxu0 }
0x12d4   :  { %v11152_v31 = vld [vmem:[#allocation13 + $0x8a0] ss:$48 sps:$4 sm:$0xff]  }
0x12d5   :  { %v4205_v46 = vpop.f32.mrf.mxu0  ;;  %v4251_v22 = vpop.f32.mrf.mxu1 }
0x12d6   :  { %v4257_v7 = vpack.c.bf16 %v4251_v22, %v4202_v16  ;;  %v11136_v16 = vld [vmem:[#allocation13 + $0x1e4] ss:$48 sps:$4 sm:$0xff]   ;;  %v11134_v22 = vld [vmem:[#allocation13 + $0x1e0] ss:$48 sps:$4 sm:$0xff]  }
0x12d7   :  { %v10678_v48 = vpop.f32.mrf.mxu0  ;;  %v10683_v17 = vpop.f32.mrf.mxu1  ;;  %v11154_v46 = vld [vmem:[#allocation13 + $0x8a4] ss:$48 sps:$4 sm:$0xff]  }
0x12d8   :  { %9642 = vmatmul.mubr.msk.bf16.vlgmr.msra.gmra.mxu0 %vm2138_vm1, %v4257_v7  ;;  %10694 = vmatmul.mubr.msk.bf16.vlgmr.msra.gmra.mxu1 %vm2138_vm1, %v4257_v7  ;;  %v11139_v7 = vld [vmem:[#allocation13 + $0x184] ss:$48 sps:$4 sm:$0xff]   ;;  %v11137_v48 = vld [vmem:[#allocation13 + $0x180] ss:$48 sps:$4 sm:$0xff]  }
0x12d9   :  { %v4254_v33 = vpop.f32.mrf.mxu1  ;;  %6368 = vmatprep.mubr.bf16.mxu1 %v12258_v9  ;;  %6294 = vmatpush1.bf16.msra.mxu0 %v11128_v57  ;;  %v11142_v17 = vld [vmem:[#allocation13 + $0x124] ss:$48 sps:$4 sm:$0xff]   ;;  %v11167_v57 = vld [vmem:[#allocation13 + $0x4e0] ss:$48 sps:$4 sm:$0xff]  }
0x12da   :  { %6295 = vmatprep.subr.bf16.mxu0 %v11133_v47  ;;  %6336 = vmatprep.subr.bf16.mxu1 %v11154_v46  ;;  %v11140_v33 = vld [vmem:[#allocation13 + $0x120] ss:$48 sps:$4 sm:$0xff]   ;;  %v11172_v47 = vld [vmem:[#allocation13 + $0x784] ss:$48 sps:$4 sm:$0xff]  }
0x12db   :  { %v10684_v14 = vpop.f32.mrf.mxu1  ;;  %6337 = vmatpush1.bf16.msra.mxu1 %v11152_v31  ;;  %v11178_v31 = vld [vmem:[#allocation13 + $0x724] ss:$48 sps:$4 sm:$0xff]  }
0x12dc   :  { %v11145_v14 = vld [vmem:[#allocation13 + $0xc4] ss:$48 sps:$4 sm:$0xff]  }
0x12dd   :  { %6296 = vmatpush1.bf16.msra.mxu0 %v11131_v29  ;;  %v11173_v29 = vld [vmem:[#allocation13 + $0x480] ss:$48 sps:$4 sm:$0xff]   ;;  %v11181_v46 = vld [vmem:[#allocation13 + $0x424] ss:$48 sps:$4 sm:$0xff]  }
0x12de   :  { %6297 = vmatprep.subr.bf16.mxu0 %v11136_v16  ;;  %v11175_v16 = vld [vmem:[#allocation13 + $0x484] ss:$48 sps:$4 sm:$0xff]  }
0x12e1   :  { %6298 = vmatpush1.bf16.msra.mxu0 %v11134_v22  ;;  %v11176_v22 = vld [vmem:[#allocation13 + $0x720] ss:$48 sps:$4 sm:$0xff]  }
0x12e2   :  { %6299 = vmatprep.subr.bf16.mxu0 %v11139_v7  ;;  %v11179_v7 = vld [vmem:[#allocation13 + $0x420] ss:$48 sps:$4 sm:$0xff]  }
0x12e5   :  { %6300 = vmatpush1.bf16.msra.mxu0 %v11137_v48  ;;  %v11184_v48 = vld [vmem:[#allocation13 + $0x6c4] ss:$48 sps:$4 sm:$0xff]  }
0x12e6   :  { %6301 = vmatprep.subr.bf16.mxu0 %v11142_v17  ;;  %v11187_v17 = vld [vmem:[#allocation13 + $0x3c4] ss:$48 sps:$4 sm:$0xff]  }
0x12e9   :  { %6302 = vmatpush1.bf16.msra.mxu0 %v11140_v33  ;;  %v11182_v33 = vld [vmem:[#allocation13 + $0x6c0] ss:$48 sps:$4 sm:$0xff]  }
0x12ea   :  { %6303 = vmatprep.subr.bf16.mxu0 %v11145_v14  ;;  %v11185_v14 = vld [vmem:[#allocation13 + $0x3c0] ss:$48 sps:$4 sm:$0xff]  }
0x1398   :  { %v4359_v6 = vpop.f32.mrf.mxu0  ;;  %v4402_v51 = vpop.f32.mrf.mxu1 }
0x1399   :  { %v4409_v15 = vadd.f32 %v4359_v6, %v12856_v2  ;;  %v4411_v21 = vadd.f32 %v4402_v51, %v12859_v42  ;;  %v11143_v6 = vld [vmem:[#allocation13 + $0xc0] ss:$48 sps:$4 sm:$0xff]  }
0x139a   :  { %v4361_v30 = vpop.f32.mrf.mxu0  ;;  %v10695_v34 = vpop.f32.mrf.mxu1  ;;  %6304 = vmatpush1.bf16.msra.mxu0 %v11143_v6  ;;  %v11146_v51 = vld [vmem:[#allocation13 + $0x60] ss:$48 sps:$4 sm:$0xff]   ;;  %v11190_v6 = vld [vmem:[#allocation13 + $0x664] ss:$48 sps:$4 sm:$0xff]  }
0x139b   :  { %v4415_v1 = vadd.f32 %v12000_v10, %v4409_v15  ;;  %v4410_v43 = vadd.f32 %v4361_v30, %v12862_v40  ;;  %v4417_v11 = vadd.f32 %v12001_v8, %v4411_v21  ;;  %v12003_v40 = vld [vmem:[#allocation2 + $0x18] sm:$0xff]  ;;  %6305 = vmatprep.subr.bf16.mxu0 %v11148_v3  ;;  %v11151_v15 = vld [vmem:[#allocation13 + $0x4] ss:$48 sps:$4 sm:$0xff]  }
0x139c   :  { %v4363_v38 = vpop.f32.mrf.mxu0  ;;  %v4405_v5 = vpop.f32.mrf.mxu1  ;;  %v11149_v21 = vld [vmem:[#allocation13] ss:$48 sps:$4 sm:$0xff]   ;;  %v11157_v30 = vld [vmem:[#allocation13 + $0x5a4] ss:$48 sps:$4 sm:$0xff]  }
0x139d   :  { %v4416_v2 = vadd.f32 %v12002_v20, %v4410_v43  ;;  %v4412_v42 = vadd.f32 %v4363_v38, %v12865_v12  ;;  %v4414_v58 = vadd.f32 %v4405_v5, %v12868_v0  ;;  %v12907_v56 = vadd.f32 %v4426_v52, %v4415_v1  ;;  %v11155_v34 = vld [vmem:[#allocation13 + $0x5a0] ss:$48 sps:$4 sm:$0xff]   ;;  %v11193_v3 = vld [vmem:[#allocation13 + $0x364] ss:$48 sps:$4 sm:$0xff]  }
0x139e   :  { %v4365_v55 = vpop.f32.mrf.mxu0  ;;  %v10696_v54 = vpop.f32.mrf.mxu1  ;;  %v12912_v53 = vadd.f32 %v4434_v50, %v4417_v11  ;;  %6306 = vmatpush1.bf16.msra.mxu0 %v11146_v51  ;;  %v11188_v51 = vld [vmem:[#allocation13 + $0x660] ss:$48 sps:$4 sm:$0xff]  }
0x139f   :  { %v12909_v32 = vadd.f32 %v4430_v19, %v4416_v2  ;;  %v4418_v59 = vadd.f32 %v12003_v40, %v4412_v42  ;;  %v4413_v60 = vadd.f32 %v4365_v55, %v12871_v36  ;;  %v4420_v41 = vadd.f32 %v12004_v61, %v4414_v58  ;;  %6307 = vmatprep.subr.bf16.mxu0 %v11151_v15  ;;  %v11191_v15 = vld [vmem:[#allocation13 + $0x360] ss:$48 sps:$4 sm:$0xff]  }
0x13a1   :  { %v4419_v23 = vadd.f32 %v12005_v18, %v4413_v60  ;;  %v4444_v12 = vadd.f32 %v12909_v32, %v12907_v56  ;;  %v12916_v0 = vadd.f32 %v4426_v52, %v4418_v59  ;;  %v12921_v63 = vadd.f32 %v4434_v50, %v4420_v41  ;;  %v11160_v41 = vld [vmem:[#allocation13 + $0x844] ss:$48 sps:$4 sm:$0xff]   ;;  %v11158_v18 = vld [vmem:[#allocation13 + $0x840] ss:$48 sps:$4 sm:$0xff]  }
0x13a2   :  { %6308 = vmatpush1.bf16.msra.mxu0 %v11149_v21  ;;  %6338 = vmatprep.subr.bf16.mxu1 %v11160_v41  ;;  %v11196_v21 = vld [vmem:[#allocation13 + $0x604] ss:$48 sps:$4 sm:$0xff]  }
0x13a3   :  { %v12918_v62 = vadd.f32 %v4430_v19, %v4419_v23  ;;  %v4445_v13 = vadd.f32 %v4444_v12, %v12912_v53  ;;  %6309 = vmatprep.subr.bf16.mxu0 %v11157_v30  ;;  %v11163_v23 = vld [vmem:[#allocation13 + $0x544] ss:$48 sps:$4 sm:$0xff]   ;;  %v11161_v12 = vld [vmem:[#allocation13 + $0x540] ss:$48 sps:$4 sm:$0xff]   ;;  %6339 = vmatpush1.bf16.msra.mxu1 %v11158_v18 }
0x13a4   :  { %v11199_v30 = vld [vmem:[#allocation13 + $0x304] ss:$48 sps:$4 sm:$0xff]  }
0x13a5   :  { %4446 = vadd.xlane.f32.xlu1 %v4445_v13  ;;  %v4448_v36 = vadd.f32 %v12918_v62, %v12916_v0  ;;  %v11166_v13 = vld [vmem:[#allocation13 + $0x7e4] ss:$48 sps:$4 sm:$0xff]  }
0x13a6   :  { %6310 = vmatpush2.bf16.msra.mxu0 %v11155_v34  ;;  %6340 = vmatprep.subr.bf16.mxu1 %v11166_v13  ;;  %v11194_v34 = vld [vmem:[#allocation13 + $0x600] ss:$48 sps:$4 sm:$0xff]  }
0x13a7   :  { %v4449_v27 = vadd.f32 %v4448_v36, %v12921_v63  ;;  %6311 = vmatprep.subr.bf16.mxu0 %v11163_v23  ;;  %v11164_v36 = vld [vmem:[#allocation13 + $0x7e0] ss:$48 sps:$4 sm:$0xff]  }
0x13a8   :  { %6341 = vmatpush1.bf16.msra.mxu1 %v11164_v36 }
0x13a9   :  { %4450 = vadd.xlane.f32.xlu0 %v4449_v27  ;;  %v11169_v27 = vld [vmem:[#allocation13 + $0x4e4] ss:$48 sps:$4 sm:$0xff]   ;;  %6342 = vmatprep.subr.bf16.mxu1 %v11172_v47 }
0x13aa   :  { %6312 = vmatpush2.bf16.msra.mxu0 %v11161_v12 }
0x13ab   :  { %6313 = vmatprep.subr.bf16.mxu0 %v11169_v27 }
0x13ac   :  { %6343 = vmatpush1.bf16.msra.mxu1 %v11170_v4  ;;  %v11200_v4 = vld [vmem:[#allocation13 + $0x2a8] ss:$48 sps:$4 sm:$0xff]  }
0x13ad   :  { %6344 = vmatprep.subr.bf16.mxu1 %v11178_v31  ;;  %v11211_v31 = vld [vmem:[#allocation13 + $0x84c] ss:$48 sps:$4 sm:$0xff]  }
0x13ae   :  { %6314 = vmatpush2.bf16.msra.mxu0 %v11167_v57 }
0x13af   :  { %6315 = vmatprep.subr.bf16.mxu0 %v11175_v16 }
0x13b0   :  { %6345 = vmatpush1.bf16.msra.mxu1 %v11176_v22  ;;  %v11212_v22 = vld [vmem:[#allocation13 + $0x1e8] ss:$48 sps:$4 sm:$0xff]  }
0x13b1   :  { %6346 = vmatprep.subr.bf16.mxu1 %v11184_v48  ;;  %v11220_v48 = vld [vmem:[#allocation13 + $0x18c] ss:$48 sps:$4 sm:$0xff]  }
0x13b2   :  { %6316 = vmatpush2.bf16.msra.mxu0 %v11173_v29 }
0x13b3   :  { %6317 = vmatprep.subr.bf16.mxu0 %v11181_v46  ;;  %v11217_v46 = vld [vmem:[#allocation13 + $0x7ec] ss:$48 sps:$4 sm:$0xff]  }
0x13b4   :  { %6347 = vmatpush1.bf16.msra.mxu1 %v11182_v33  ;;  %v11218_v33 = vld [vmem:[#allocation13 + $0x188] ss:$48 sps:$4 sm:$0xff]  }
0x13b5   :  { %6348 = vmatprep.subr.bf16.mxu1 %v11190_v6  ;;  %v11226_v6 = vld [vmem:[#allocation13 + $0x12c] ss:$48 sps:$4 sm:$0xff]  }
0x13b6   :  { %6318 = vmatpush2.bf16.msra.mxu0 %v11179_v7  ;;  %v11215_v7 = vld [vmem:[#allocation13 + $0x7e8] ss:$48 sps:$4 sm:$0xff]  }
0x13b7   :  { %6319 = vmatprep.subr.bf16.mxu0 %v11187_v17  ;;  %v11223_v17 = vld [vmem:[#allocation13 + $0x78c] ss:$48 sps:$4 sm:$0xff]  }
0x13b8   :  { %6349 = vmatpush1.bf16.msra.mxu1 %v11188_v51  ;;  %v11224_v51 = vld [vmem:[#allocation13 + $0x128] ss:$48 sps:$4 sm:$0xff]  }
0x13b9   :  { %6350 = vmatprep.subr.bf16.mxu1 %v11196_v21  ;;  %v11232_v21 = vld [vmem:[#allocation13 + $0xcc] ss:$48 sps:$4 sm:$0xff]  }
0x13ba   :  { %6320 = vmatpush2.bf16.msra.mxu0 %v11185_v14  ;;  %v11221_v14 = vld [vmem:[#allocation13 + $0x788] ss:$48 sps:$4 sm:$0xff]  }
0x13bb   :  { %6321 = vmatprep.subr.bf16.mxu0 %v11193_v3  ;;  %v11229_v3 = vld [vmem:[#allocation13 + $0x72c] ss:$48 sps:$4 sm:$0xff]  }
0x13bc   :  { %6351 = vmatpush1.bf16.msra.mxu1 %v11194_v34  ;;  %v11230_v34 = vld [vmem:[#allocation13 + $0xc8] ss:$48 sps:$4 sm:$0xff]  }
0x13be   :  { %6322 = vmatpush2.bf16.msra.mxu0 %v11191_v15  ;;  %v11227_v15 = vld [vmem:[#allocation13 + $0x728] ss:$48 sps:$4 sm:$0xff]  }
0x13bf   :  { %6323 = vmatprep.subr.bf16.mxu0 %v11199_v30  ;;  %v11235_v30 = vld [vmem:[#allocation13 + $0x6cc] ss:$48 sps:$4 sm:$0xff]  }
0x142e   :  { %v4447_v10 = vpop.xlane.xlu1 %4446 }
0x142f   :  { %v4452_v1 = vmul.f32 0.0026041667, %v4447_v10  ;;  %v11197_v10 = vld [vmem:[#allocation13 + $0x300] ss:$48 sps:$4 sm:$0xff]  }
0x1430   :  { %6324 = vmatpush2.bf16.msra.mxu0 %v11197_v10  ;;  %v11233_v10 = vld [vmem:[#allocation13 + $0x6c8] ss:$48 sps:$4 sm:$0xff]  }
0x1431   :  { %v12927_v52 = vsub.f32 %v12907_v56, %v4452_v1  ;;  %v12930_v43 = vsub.f32 %v12909_v32, %v4452_v1  ;;  %v12933_v19 = vsub.f32 %v12912_v53, %v4452_v1  ;;  %v11202_v1 = vld [vmem:[#allocation13 + $0x2ac] ss:$48 sps:$4 sm:$0xff]  }
0x1432   :  { %v4451_v38 = vpop.xlane.xlu0 %4450  ;;  %6379 = vmatprep.subr.bf16.mxu1 %v11202_v1  ;;  %v11238_v1 = vld [vmem:[#allocation13 + $0x6c] ss:$48 sps:$4 sm:$0xff]  }
0x1433   :  { %v4453_v5 = vmul.f32 0.0026041667, %v4451_v38  ;;  %v4460_v8 = vmul.f32 %v12927_v52, %v12927_v52  ;;  %v4461_v11 = vmul.f32 %v12930_v43, %v12930_v43  ;;  %v4462_v50 = vmul.f32 %v12933_v19, %v12933_v19  ;;  %v11205_v38 = vld [vmem:[#allocation13 + $0x8ac] ss:$48 sps:$4 sm:$0xff]  }
0x1434   :  { %6422 = vmatprep.subr.bf16.mxu0 %v11205_v38  ;;  %v11241_v38 = vld [vmem:[#allocation13 + $0x66c] ss:$48 sps:$4 sm:$0xff]  }
0x1435   :  { %v12942_v20 = vsub.f32 %v12916_v0, %v4453_v5  ;;  %v12945_v2 = vsub.f32 %v12918_v62, %v4453_v5  ;;  %v12948_v42 = vsub.f32 %v12921_v63, %v4453_v5  ;;  %v4466_v58 = vadd.f32 %v4461_v11, %v4460_v8 }
0x1437   :  { %v4467_v55 = vadd.f32 %v4466_v58, %v4462_v50  ;;  %v4463_v54 = vmul.f32 %v12942_v20, %v12942_v20  ;;  %v4464_v40 = vmul.f32 %v12945_v2, %v12945_v2  ;;  %v4465_v59 = vmul.f32 %v12948_v42, %v12948_v42 }
0x1439   :  { %4468 = vadd.xlane.f32.xlu0 %v4467_v55  ;;  %v4470_v60 = vadd.f32 %v4464_v40, %v4463_v54 }
0x143b   :  { %v4471_v61 = vadd.f32 %v4470_v60, %v4465_v59 }
0x143d   :  { %4472 = vadd.xlane.f32.xlu1 %v4471_v61 }
0x14c2   :  { %v4469_v5 = vpop.xlane.xlu0 %4468 }
0x14c3   :  { %v4474_v8 = vmul.f32 0.0026041667, %v4469_v5  ;;  %v11236_v5 = vld [vmem:[#allocation13 + $0x68] ss:$48 sps:$4 sm:$0xff]  }
0x14c5   :  { %v4476_v11 = vadd.f32 1e-05, %v4474_v8  ;;  %v11239_v8 = vld [vmem:[#allocation13 + $0x668] ss:$48 sps:$4 sm:$0xff]  }
0x14c6   :  { %v4473_v50 = vpop.xlane.xlu1 %4472 }
0x14c7   :  { %11996 = vrsqrt.f32 %v4476_v11  ;;  %v4475_v58 = vmul.f32 0.0026041667, %v4473_v50  ;;  %v11244_v11 = vld [vmem:[#allocation13 + $0xc] ss:$48 sps:$4 sm:$0xff]  }
0x14c8   :  { %v11247_v50 = vld [vmem:[#allocation13 + $0x60c] ss:$48 sps:$4 sm:$0xff]  }
0x14c9   :  { %v4477_v55 = vadd.f32 1e-05, %v4475_v58  ;;  %v11242_v58 = vld [vmem:[#allocation13 + $0x8] ss:$48 sps:$4 sm:$0xff]  }
0x14cb   :  { %11998 = vrsqrt.f32 %v4477_v55  ;;  %v11245_v55 = vld [vmem:[#allocation13 + $0x608] ss:$48 sps:$4 sm:$0xff]  }
0x14d4   :  { %v11997_v54 = vpop.eup %11996 }
0x14d5   :  { %v4481_v40 = vmul.f32 %v11997_v54, %v12930_v43  ;;  %v4482_v59 = vmul.f32 %v11997_v54, %v12933_v19  ;;  %v4480_v60 = vmul.f32 %v11997_v54, %v12927_v52  ;;  %v11250_v54 = vld [vmem:[#allocation13 + $0x5ac] ss:$48 sps:$4 sm:$0xff]  }
0x14d7   :  { %v4487_v18 = vmul.f32 %v4481_v40, %v12396_v35  ;;  %v4488_v12 = vmul.f32 %v4482_v59, %v12400_v37  ;;  %v4486_v36 = vmul.f32 %v4480_v60, %v12404_v39  ;;  %v11253_v40 = vld [vmem:[#allocation13 + $0x2b4] ss:$48 sps:$4 sm:$0xff]   ;;  %v11248_v59 = vld [vmem:[#allocation13 + $0x5a8] ss:$48 sps:$4 sm:$0xff]   ;;  %v11251_v60 = vld [vmem:[#allocation13 + $0x2b0] ss:$48 sps:$4 sm:$0xff]  }
0x14d8   :  { %v11999_v61 = vpop.eup %11998 }
0x14d9   :  { %v4484_v41 = vmul.f32 %v11999_v61, %v12945_v2  ;;  %v4485_v23 = vmul.f32 %v11999_v61, %v12948_v42  ;;  %v4483_v13 = vmul.f32 %v11999_v61, %v12942_v20  ;;  %v4493_v52 = vadd.f32 %v4487_v18, %v12407_v44  ;;  %v11256_v61 = vld [vmem:[#allocation13 + $0x54c] ss:$48 sps:$4 sm:$0xff]   ;;  %v11254_v18 = vld [vmem:[#allocation13 + $0x548] ss:$48 sps:$4 sm:$0xff]  }
0x14da   :  { %v4494_v57 = vadd.f32 %v4488_v12, %v12410_v45  ;;  %v4492_v47 = vadd.f32 %v4486_v36, %v12419_v49  ;;  %v11262_v12 = vld [vmem:[#allocation13 + $0x4ec] ss:$48 sps:$4 sm:$0xff]   ;;  %v11260_v36 = vld [vmem:[#allocation13 + $0x4e8] ss:$48 sps:$4 sm:$0xff]  }
0x14db   :  { %v4490_v27 = vmul.f32 %v4484_v41, %v12396_v35  ;;  %v4491_v43 = vmul.f32 %v4485_v23, %v12400_v37  ;;  %v4489_v19 = vmul.f32 %v4483_v13, %v12404_v39  ;;  %v11203_v37 = vld [vmem:[#allocation13 + $0x8a8] ss:$48 sps:$4 sm:$0xff]   ;;  %v11208_v39 = vld [vmem:[#allocation13 + $0x24c] ss:$48 sps:$4 sm:$0xff]   ;;  %v11259_v41 = vld [vmem:[#allocation13 + $0x254] ss:$48 sps:$4 sm:$0xff]  }
0x14dc   :  { %v11257_v23 = vld [vmem:[#allocation13 + $0x250] ss:$48 sps:$4 sm:$0xff]   ;;  %v11265_v13 = vld [vmem:[#allocation13 + $0x1f4] ss:$48 sps:$4 sm:$0xff]  }
0x14dd   :  { %v4496_v2 = vadd.f32 %v4490_v27, %v12407_v44  ;;  %v4497_v42 = vadd.f32 %v4491_v43, %v12410_v45  ;;  %v4495_v20 = vadd.f32 %v4489_v19, %v12419_v49  ;;  %v11206_v44 = vld [vmem:[#allocation13 + $0x248] ss:$48 sps:$4 sm:$0xff]   ;;  %v11214_v49 = vld [vmem:[#allocation13 + $0x1ec] ss:$48 sps:$4 sm:$0xff]   ;;  %v11263_v27 = vld [vmem:[#allocation13 + $0x1f0] ss:$48 sps:$4 sm:$0xff]  }
0x14de   :  { %v11209_v45 = vld [vmem:[#allocation13 + $0x848] ss:$48 sps:$4 sm:$0xff]   ;;  %v11268_v43 = vld [vmem:[#allocation13 + $0x48c] ss:$48 sps:$4 sm:$0xff]   ;;  %v11271_v19 = vld [vmem:[#allocation13 + $0x194] ss:$48 sps:$4 sm:$0xff]  }
0x14df   :  { %v12974_v29 = vpack.c.bf16 %v4496_v2, %v4493_v52  ;;  %v12976_v35 = vpack.c.bf16 %v4497_v42, %v4494_v57  ;;  %v12978_v16 = vpack.c.bf16 %v4495_v20, %v4492_v47  ;;  %v11266_v52 = vld [vmem:[#allocation13 + $0x488] ss:$48 sps:$4 sm:$0xff]   ;;  %v11269_v2 = vld [vmem:[#allocation13 + $0x190] ss:$48 sps:$4 sm:$0xff]   ;;  %v11274_v57 = vld [vmem:[#allocation13 + $0x42c] ss:$48 sps:$4 sm:$0xff]  }
0x14e0   :  { %v11277_v42 = vld [vmem:[#allocation13 + $0x134] ss:$48 sps:$4 sm:$0xff]   ;;  %v11275_v47 = vld [vmem:[#allocation13 + $0x130] ss:$48 sps:$4 sm:$0xff]   ;;  %v11280_v20 = vld [vmem:[#allocation13 + $0x3cc] ss:$48 sps:$4 sm:$0xff]  }
0x14e1   :  { %6325 = vmatprep.mubr.bf16.mxu0 %v12974_v29  ;;  %6369 = vmatmul.mubr.bf16.vlgmr.msra.gmra.mxu1 %v12976_v35 }
0x14e2   :  { %6380 = vmatpush1.bf16.msra.mxu1 %v11200_v4  ;;  %6326 = vmatmul.mubr.bf16.vlgmr.msra.gmra.mxu0 %v12978_v16  ;;  %v11272_v4 = vld [vmem:[#allocation13 + $0x428] ss:$48 sps:$4 sm:$0xff]  }
0x14e3   :  { %6411 = vmatprep.mubr.bf16.mxu1 %v12974_v29  ;;  %6423 = vmatpush1.bf16.msra.mxu0 %v11203_v37  ;;  %v11283_v37 = vld [vmem:[#allocation13 + $0xd4] ss:$48 sps:$4 sm:$0xff]  }
0x14e4   :  { %6381 = vmatprep.subr.bf16.mxu1 %v11208_v39  ;;  %6424 = vmatprep.subr.bf16.mxu0 %v11211_v31  ;;  %v11278_v39 = vld [vmem:[#allocation13 + $0x3c8] ss:$48 sps:$4 sm:$0xff]   ;;  %v11281_v31 = vld [vmem:[#allocation13 + $0xd0] ss:$48 sps:$4 sm:$0xff]  }
0x14e5   :  { %6454 = vmatprep.mubr.bf16.mxu0 %v12258_v9 }
0x14e6   :  { %6382 = vmatpush1.bf16.msra.mxu1 %v11206_v44  ;;  %v11286_v44 = vld [vmem:[#allocation13 + $0x36c] ss:$48 sps:$4 sm:$0xff]  }
0x14e7   :  { %6425 = vmatpush1.bf16.msra.mxu0 %v11209_v45  ;;  %6383 = vmatprep.subr.bf16.mxu1 %v11214_v49  ;;  %v11289_v45 = vld [vmem:[#allocation13 + $0x74] ss:$48 sps:$4 sm:$0xff]   ;;  %v11284_v49 = vld [vmem:[#allocation13 + $0x368] ss:$48 sps:$4 sm:$0xff]  }
0x14e8   :  { %6426 = vmatprep.subr.bf16.mxu0 %v11217_v46  ;;  %v11287_v46 = vld [vmem:[#allocation13 + $0x70] ss:$48 sps:$4 sm:$0xff]  }
0x14ea   :  { %6384 = vmatpush1.bf16.msra.mxu1 %v11212_v22  ;;  %v11292_v22 = vld [vmem:[#allocation13 + $0x30c] ss:$48 sps:$4 sm:$0xff]  }
0x14eb   :  { %6427 = vmatpush1.bf16.msra.mxu0 %v11215_v7  ;;  %6385 = vmatprep.subr.bf16.mxu1 %v11220_v48  ;;  %v11295_v7 = vld [vmem:[#allocation13 + $0x14] ss:$48 sps:$4 sm:$0xff]   ;;  %v11290_v48 = vld [vmem:[#allocation13 + $0x308] ss:$48 sps:$4 sm:$0xff]  }
0x14ec   :  { %6428 = vmatprep.subr.bf16.mxu0 %v11223_v17  ;;  %v11293_v17 = vld [vmem:[#allocation13 + $0x10] ss:$48 sps:$4 sm:$0xff]  }
0x14ee   :  { %6386 = vmatpush1.bf16.msra.mxu1 %v11218_v33  ;;  %v11298_v33 = vld [vmem:[#allocation13 + $0x8b4] ss:$48 sps:$4 sm:$0xff]  }
0x14ef   :  { %6429 = vmatpush1.bf16.msra.mxu0 %v11221_v14  ;;  %6387 = vmatprep.subr.bf16.mxu1 %v11226_v6  ;;  %v11301_v14 = vld [vmem:[#allocation13 + $0x5b4] ss:$48 sps:$4 sm:$0xff]   ;;  %v11296_v6 = vld [vmem:[#allocation13 + $0x8b0] ss:$48 sps:$4 sm:$0xff]  }
0x14f0   :  { %6430 = vmatprep.subr.bf16.mxu0 %v11229_v3  ;;  %v11299_v3 = vld [vmem:[#allocation13 + $0x5b0] ss:$48 sps:$4 sm:$0xff]  }
0x14f2   :  { %6388 = vmatpush1.bf16.msra.mxu1 %v11224_v51  ;;  %v11304_v51 = vld [vmem:[#allocation13 + $0x854] ss:$48 sps:$4 sm:$0xff]  }
0x14f3   :  { %6431 = vmatpush1.bf16.msra.mxu0 %v11227_v15  ;;  %6389 = vmatprep.subr.bf16.mxu1 %v11232_v21  ;;  %v11307_v15 = vld [vmem:[#allocation13 + $0x554] ss:$48 sps:$4 sm:$0xff]   ;;  %v11302_v21 = vld [vmem:[#allocation13 + $0x850] ss:$48 sps:$4 sm:$0xff]  }
0x14f4   :  { %6432 = vmatprep.subr.bf16.mxu0 %v11235_v30  ;;  %v11305_v30 = vld [vmem:[#allocation13 + $0x550] ss:$48 sps:$4 sm:$0xff]  }
0x14f6   :  { %6390 = vmatpush1.bf16.msra.mxu1 %v11230_v34  ;;  %v11310_v34 = vld [vmem:[#allocation13 + $0x7f4] ss:$48 sps:$4 sm:$0xff]  }
0x14f7   :  { %6433 = vmatpush1.bf16.msra.mxu0 %v11233_v10  ;;  %6391 = vmatprep.subr.bf16.mxu1 %v11238_v1  ;;  %v11313_v10 = vld [vmem:[#allocation13 + $0x4f4] ss:$48 sps:$4 sm:$0xff]   ;;  %v11308_v1 = vld [vmem:[#allocation13 + $0x7f0] ss:$48 sps:$4 sm:$0xff]  }
0x14f8   :  { %6434 = vmatprep.subr.bf16.mxu0 %v11241_v38  ;;  %v11311_v38 = vld [vmem:[#allocation13 + $0x4f0] ss:$48 sps:$4 sm:$0xff]  }
0x14fa   :  { %6392 = vmatpush1.bf16.msra.mxu1 %v11236_v5  ;;  %v11316_v5 = vld [vmem:[#allocation13 + $0x794] ss:$48 sps:$4 sm:$0xff]  }
0x14fb   :  { %6435 = vmatpush1.bf16.msra.mxu0 %v11239_v8  ;;  %6393 = vmatprep.subr.bf16.mxu1 %v11244_v11  ;;  %v11319_v8 = vld [vmem:[#allocation13 + $0x494] ss:$48 sps:$4 sm:$0xff]   ;;  %v11314_v11 = vld [vmem:[#allocation13 + $0x790] ss:$48 sps:$4 sm:$0xff]  }
0x14fc   :  { %6436 = vmatprep.subr.bf16.mxu0 %v11247_v50  ;;  %v11317_v50 = vld [vmem:[#allocation13 + $0x490] ss:$48 sps:$4 sm:$0xff]  }
0x14fe   :  { %6394 = vmatpush1.bf16.msra.mxu1 %v11242_v58  ;;  %v11322_v58 = vld [vmem:[#allocation13 + $0x734] ss:$48 sps:$4 sm:$0xff]  }
0x14ff   :  { %6437 = vmatpush1.bf16.msra.mxu0 %v11245_v55  ;;  %6395 = vmatprep.subr.bf16.mxu1 %v11250_v54  ;;  %v11325_v55 = vld [vmem:[#allocation13 + $0x434] ss:$48 sps:$4 sm:$0xff]   ;;  %v11320_v54 = vld [vmem:[#allocation13 + $0x730] ss:$48 sps:$4 sm:$0xff]  }
0x1500   :  { %6465 = vmatprep.subr.bf16.mxu0 %v11253_v40  ;;  %v11323_v40 = vld [vmem:[#allocation13 + $0x430] ss:$48 sps:$4 sm:$0xff]  }
0x1502   :  { %6396 = vmatpush2.bf16.msra.mxu1 %v11248_v59  ;;  %6455 = vmatmul.mubr.bf16.vlgmr.msra.gmra.mxu0 %v12976_v35  ;;  %v11328_v59 = vld [vmem:[#allocation13 + $0x6d4] ss:$48 sps:$4 sm:$0xff]  }
0x1503   :  { %6466 = vmatpush1.bf16.msra.mxu0 %v11251_v60  ;;  %6497 = vmatprep.mubr.bf16.mxu0 %v12974_v29  ;;  %v11331_v60 = vld [vmem:[#allocation13 + $0x3d4] ss:$48 sps:$4 sm:$0xff]  }
0x1504   :  { %6397 = vmatprep.subr.bf16.mxu1 %v11256_v61  ;;  %6467 = vmatprep.subr.bf16.mxu0 %v11259_v41  ;;  %v11326_v61 = vld [vmem:[#allocation13 + $0x6d0] ss:$48 sps:$4 sm:$0xff]  }
0x1505   :  { %v11329_v41 = vld [vmem:[#allocation13 + $0x3d0] ss:$48 sps:$4 sm:$0xff]  }
0x1506   :  { %6398 = vmatpush2.bf16.msra.mxu1 %v11254_v18  ;;  %v11334_v18 = vld [vmem:[#allocation13 + $0x674] ss:$48 sps:$4 sm:$0xff]  }
0x1507   :  { %6468 = vmatpush1.bf16.msra.mxu0 %v11257_v23  ;;  %6399 = vmatprep.subr.bf16.mxu1 %v11262_v12  ;;  %v11337_v23 = vld [vmem:[#allocation13 + $0x374] ss:$48 sps:$4 sm:$0xff]   ;;  %v11332_v12 = vld [vmem:[#allocation13 + $0x670] ss:$48 sps:$4 sm:$0xff]  }
0x1508   :  { %6469 = vmatprep.subr.bf16.mxu0 %v11265_v13  ;;  %v11335_v13 = vld [vmem:[#allocation13 + $0x370] ss:$48 sps:$4 sm:$0xff]  }
0x150a   :  { %6400 = vmatpush2.bf16.msra.mxu1 %v11260_v36  ;;  %v11340_v36 = vld [vmem:[#allocation13 + $0x614] ss:$48 sps:$4 sm:$0xff]  }
0x150b   :  { %6470 = vmatpush1.bf16.msra.mxu0 %v11263_v27  ;;  %6401 = vmatprep.subr.bf16.mxu1 %v11268_v43  ;;  %v11343_v27 = vld [vmem:[#allocation13 + $0x314] ss:$48 sps:$4 sm:$0xff]   ;;  %v11338_v43 = vld [vmem:[#allocation13 + $0x610] ss:$48 sps:$4 sm:$0xff]  }
0x150c   :  { %6471 = vmatprep.subr.bf16.mxu0 %v11271_v19  ;;  %v11341_v19 = vld [vmem:[#allocation13 + $0x310] ss:$48 sps:$4 sm:$0xff]  }
0x150e   :  { %6402 = vmatpush2.bf16.msra.mxu1 %v11266_v52  ;;  %v11346_v52 = vld [vmem:[#allocation13 + $0x2bc] ss:$48 sps:$4 sm:$0xff]  }
0x150f   :  { %6472 = vmatpush1.bf16.msra.mxu0 %v11269_v2  ;;  %6403 = vmatprep.subr.bf16.mxu1 %v11274_v57  ;;  %v11349_v2 = vld [vmem:[#allocation13 + $0x8bc] ss:$48 sps:$4 sm:$0xff]   ;;  %v11344_v57 = vld [vmem:[#allocation13 + $0x2b8] ss:$48 sps:$4 sm:$0xff]  }
0x1510   :  { %6473 = vmatprep.subr.bf16.mxu0 %v11277_v42  ;;  %v11347_v42 = vld [vmem:[#allocation13 + $0x8b8] ss:$48 sps:$4 sm:$0xff]  }
0x1512   :  { %6404 = vmatpush2.bf16.msra.mxu1 %v11272_v4  ;;  %v11352_v4 = vld [vmem:[#allocation13 + $0x25c] ss:$48 sps:$4 sm:$0xff]  }
0x1513   :  { %6474 = vmatpush1.bf16.msra.mxu0 %v11275_v47  ;;  %6405 = vmatprep.subr.bf16.mxu1 %v11280_v20  ;;  %v11355_v47 = vld [vmem:[#allocation13 + $0x85c] ss:$48 sps:$4 sm:$0xff]   ;;  %v11350_v20 = vld [vmem:[#allocation13 + $0x258] ss:$48 sps:$4 sm:$0xff]  }
0x1514   :  { %6475 = vmatprep.subr.bf16.mxu0 %v11283_v37  ;;  %v11353_v37 = vld [vmem:[#allocation13 + $0x858] ss:$48 sps:$4 sm:$0xff]  }
0x1516   :  { %6406 = vmatpush2.bf16.msra.mxu1 %v11278_v39  ;;  %v11358_v39 = vld [vmem:[#allocation13 + $0x1fc] ss:$48 sps:$4 sm:$0xff]  }
0x1517   :  { %6476 = vmatpush1.bf16.msra.mxu0 %v11281_v31  ;;  %6407 = vmatprep.subr.bf16.mxu1 %v11286_v44  ;;  %v11361_v31 = vld [vmem:[#allocation13 + $0x7fc] ss:$48 sps:$4 sm:$0xff]   ;;  %v11356_v44 = vld [vmem:[#allocation13 + $0x1f8] ss:$48 sps:$4 sm:$0xff]  }
0x1518   :  { %6477 = vmatprep.subr.bf16.mxu0 %v11289_v45  ;;  %v11359_v45 = vld [vmem:[#allocation13 + $0x7f8] ss:$48 sps:$4 sm:$0xff]  }
0x151a   :  { %6408 = vmatpush2.bf16.msra.mxu1 %v11284_v49  ;;  %v11364_v49 = vld [vmem:[#allocation13 + $0x19c] ss:$48 sps:$4 sm:$0xff]  }
0x151b   :  { %6478 = vmatpush1.bf16.msra.mxu0 %v11287_v46  ;;  %6409 = vmatprep.subr.bf16.mxu1 %v11292_v22  ;;  %v11367_v46 = vld [vmem:[#allocation13 + $0x79c] ss:$48 sps:$4 sm:$0xff]   ;;  %v11362_v22 = vld [vmem:[#allocation13 + $0x198] ss:$48 sps:$4 sm:$0xff]  }
0x151c   :  { %6479 = vmatprep.subr.bf16.mxu0 %v11295_v7  ;;  %v11365_v7 = vld [vmem:[#allocation13 + $0x798] ss:$48 sps:$4 sm:$0xff]  }
0x151e   :  { %6410 = vmatpush2.bf16.msra.mxu1 %v11290_v48  ;;  %v11370_v48 = vld [vmem:[#allocation13 + $0x13c] ss:$48 sps:$4 sm:$0xff]  }
0x151f   :  { %6480 = vmatpush1.bf16.msra.mxu0 %v11293_v17  ;;  %6508 = vmatprep.subr.bf16.mxu1 %v11298_v33  ;;  %v11373_v17 = vld [vmem:[#allocation13 + $0x73c] ss:$48 sps:$4 sm:$0xff]   ;;  %v11368_v33 = vld [vmem:[#allocation13 + $0x138] ss:$48 sps:$4 sm:$0xff]  }
0x1520   :  { %6481 = vmatprep.subr.bf16.mxu0 %v11301_v14  ;;  %v11371_v14 = vld [vmem:[#allocation13 + $0x738] ss:$48 sps:$4 sm:$0xff]  }
0x1521   :  { %6412 = vmatmul.mubr.bf16.vlgmr.msra.gmra.mxu1 %v12978_v16 }
0x1522   :  { %6509 = vmatpush1.bf16.msra.mxu1 %v11296_v6  ;;  %6540 = vmatprep.mubr.bf16.mxu1 %v12258_v9  ;;  %v11376_v6 = vld [vmem:[#allocation13 + $0xdc] ss:$48 sps:$4 sm:$0xff]  }
0x1523   :  { %6482 = vmatpush2.bf16.msra.mxu0 %v11299_v3  ;;  %6510 = vmatprep.subr.bf16.mxu1 %v11304_v51  ;;  %v11379_v3 = vld [vmem:[#allocation13 + $0x6dc] ss:$48 sps:$4 sm:$0xff]   ;;  %v11374_v51 = vld [vmem:[#allocation13 + $0xd8] ss:$48 sps:$4 sm:$0xff]  }
0x1524   :  { %6483 = vmatprep.subr.bf16.mxu0 %v11307_v15  ;;  %v11377_v15 = vld [vmem:[#allocation13 + $0x6d8] ss:$48 sps:$4 sm:$0xff]  }
0x1526   :  { %6511 = vmatpush1.bf16.msra.mxu1 %v11302_v21  ;;  %v11382_v21 = vld [vmem:[#allocation13 + $0x7c] ss:$48 sps:$4 sm:$0xff]  }
0x1527   :  { %6484 = vmatpush2.bf16.msra.mxu0 %v11305_v30  ;;  %6512 = vmatprep.subr.bf16.mxu1 %v11310_v34  ;;  %v11385_v30 = vld [vmem:[#allocation13 + $0x67c] ss:$48 sps:$4 sm:$0xff]   ;;  %v11380_v34 = vld [vmem:[#allocation13 + $0x78] ss:$48 sps:$4 sm:$0xff]  }
0x1528   :  { %6485 = vmatprep.subr.bf16.mxu0 %v11313_v10  ;;  %v11383_v10 = vld [vmem:[#allocation13 + $0x678] ss:$48 sps:$4 sm:$0xff]  }
0x152a   :  { %6513 = vmatpush1.bf16.msra.mxu1 %v11308_v1  ;;  %v11388_v1 = vld [vmem:[#allocation13 + $0x1c] ss:$48 sps:$4 sm:$0xff]  }
0x152b   :  { %6486 = vmatpush2.bf16.msra.mxu0 %v11311_v38  ;;  %6514 = vmatprep.subr.bf16.mxu1 %v11316_v5  ;;  %v11391_v38 = vld [vmem:[#allocation13 + $0x61c] ss:$48 sps:$4 sm:$0xff]   ;;  %v11386_v5 = vld [vmem:[#allocation13 + $0x18] ss:$48 sps:$4 sm:$0xff]  }
0x152c   :  { %6487 = vmatprep.subr.bf16.mxu0 %v11319_v8  ;;  %v11389_v8 = vld [vmem:[#allocation13 + $0x618] ss:$48 sps:$4 sm:$0xff]  }
0x152e   :  { %6515 = vmatpush1.bf16.msra.mxu1 %v11314_v11  ;;  %v11394_v11 = vld [vmem:[#allocation13 + $0x5bc] ss:$48 sps:$4 sm:$0xff]  }
0x152f   :  { %6488 = vmatpush2.bf16.msra.mxu0 %v11317_v50  ;;  %6516 = vmatprep.subr.bf16.mxu1 %v11322_v58  ;;  %v11397_v50 = vld [vmem:[#allocation13 + $0x2c4] ss:$48 sps:$4 sm:$0xff]   ;;  %v11392_v58 = vld [vmem:[#allocation13 + $0x5b8] ss:$48 sps:$4 sm:$0xff]  }
0x1530   :  { %6489 = vmatprep.subr.bf16.mxu0 %v11325_v55  ;;  %v11395_v55 = vld [vmem:[#allocation13 + $0x2c0] ss:$48 sps:$4 sm:$0xff]  }
0x1532   :  { %6517 = vmatpush1.bf16.msra.mxu1 %v11320_v54  ;;  %v11400_v54 = vld [vmem:[#allocation13 + $0x55c] ss:$48 sps:$4 sm:$0xff]  }
0x1533   :  { %6490 = vmatpush2.bf16.msra.mxu0 %v11323_v40  ;;  %6518 = vmatprep.subr.bf16.mxu1 %v11328_v59  ;;  %v11403_v40 = vld [vmem:[#allocation13 + $0x264] ss:$48 sps:$4 sm:$0xff]   ;;  %v11398_v59 = vld [vmem:[#allocation13 + $0x558] ss:$48 sps:$4 sm:$0xff]  }
0x1534   :  { %6491 = vmatprep.subr.bf16.mxu0 %v11331_v60  ;;  %v11401_v60 = vld [vmem:[#allocation13 + $0x260] ss:$48 sps:$4 sm:$0xff]  }
0x1536   :  { %6519 = vmatpush1.bf16.msra.mxu1 %v11326_v61  ;;  %v11406_v61 = vld [vmem:[#allocation13 + $0x4fc] ss:$48 sps:$4 sm:$0xff]  }
0x1537   :  { %6492 = vmatpush2.bf16.msra.mxu0 %v11329_v41  ;;  %6520 = vmatprep.subr.bf16.mxu1 %v11334_v18  ;;  %v11409_v41 = vld [vmem:[#allocation13 + $0x204] ss:$48 sps:$4 sm:$0xff]   ;;  %v11404_v18 = vld [vmem:[#allocation13 + $0x4f8] ss:$48 sps:$4 sm:$0xff]  }
0x1538   :  { %6493 = vmatprep.subr.bf16.mxu0 %v11337_v23  ;;  %v11407_v23 = vld [vmem:[#allocation13 + $0x200] ss:$48 sps:$4 sm:$0xff]  }
0x153a   :  { %6521 = vmatpush1.bf16.msra.mxu1 %v11332_v12  ;;  %v11412_v12 = vld [vmem:[#allocation13 + $0x49c] ss:$48 sps:$4 sm:$0xff]  }
0x153b   :  { %6494 = vmatpush2.bf16.msra.mxu0 %v11335_v13  ;;  %6522 = vmatprep.subr.bf16.mxu1 %v11340_v36  ;;  %v11415_v13 = vld [vmem:[#allocation13 + $0x1a4] ss:$48 sps:$4 sm:$0xff]   ;;  %v11410_v36 = vld [vmem:[#allocation13 + $0x498] ss:$48 sps:$4 sm:$0xff]  }
0x153c   :  { %6495 = vmatprep.subr.bf16.mxu0 %v11343_v27  ;;  %v11413_v27 = vld [vmem:[#allocation13 + $0x1a0] ss:$48 sps:$4 sm:$0xff]  }
0x153e   :  { %6523 = vmatpush1.bf16.msra.mxu1 %v11338_v43  ;;  %v11418_v43 = vld [vmem:[#allocation13 + $0x43c] ss:$48 sps:$4 sm:$0xff]  }
0x153f   :  { %6496 = vmatpush2.bf16.msra.mxu0 %v11341_v19  ;;  %6551 = vmatprep.subr.bf16.mxu1 %v11346_v52  ;;  %v11421_v19 = vld [vmem:[#allocation13 + $0x144] ss:$48 sps:$4 sm:$0xff]   ;;  %v11416_v52 = vld [vmem:[#allocation13 + $0x438] ss:$48 sps:$4 sm:$0xff]  }
0x1540   :  { %6594 = vmatprep.subr.bf16.mxu0 %v11349_v2  ;;  %v11419_v2 = vld [vmem:[#allocation13 + $0x140] ss:$48 sps:$4 sm:$0xff]  }
0x1541   :  { %6541 = vmatmul.mubr.bf16.vlgmr.msra.gmra.mxu1 %v12976_v35 }
0x1542   :  { %6498 = vmatmul.mubr.bf16.vlgmr.msra.gmra.mxu0 %v12978_v16  ;;  %6552 = vmatpush1.bf16.msra.mxu1 %v11344_v57  ;;  %v11424_v57 = vld [vmem:[#allocation13 + $0x3dc] ss:$48 sps:$4 sm:$0xff]  }
0x1543   :  { %6583 = vmatprep.mubr.bf16.mxu1 %v12974_v29  ;;  %6595 = vmatpush1.bf16.msra.mxu0 %v11347_v42  ;;  %v11427_v42 = vld [vmem:[#allocation13 + $0xe4] ss:$48 sps:$4 sm:$0xff]  }
0x1544   :  { %6553 = vmatprep.subr.bf16.mxu1 %v11352_v4  ;;  %6596 = vmatprep.subr.bf16.mxu0 %v11355_v47  ;;  %v11422_v4 = vld [vmem:[#allocation13 + $0x3d8] ss:$48 sps:$4 sm:$0xff]   ;;  %v11425_v47 = vld [vmem:[#allocation13 + $0xe0] ss:$48 sps:$4 sm:$0xff]  }
0x1545   :  { %6626 = vmatprep.mubr.bf16.mxu0 %v12258_v9 }
0x1546   :  { %6554 = vmatpush1.bf16.msra.mxu1 %v11350_v20  ;;  %v11430_v20 = vld [vmem:[#allocation13 + $0x37c] ss:$48 sps:$4 sm:$0xff]  }
0x1547   :  { %6597 = vmatpush1.bf16.msra.mxu0 %v11353_v37  ;;  %6555 = vmatprep.subr.bf16.mxu1 %v11358_v39  ;;  %v11433_v37 = vld [vmem:[#allocation13 + $0x84] ss:$48 sps:$4 sm:$0xff]   ;;  %v11428_v39 = vld [vmem:[#allocation13 + $0x378] ss:$48 sps:$4 sm:$0xff]  }
0x1548   :  { %6598 = vmatprep.subr.bf16.mxu0 %v11361_v31  ;;  %v11431_v31 = vld [vmem:[#allocation13 + $0x80] ss:$48 sps:$4 sm:$0xff]  }
0x154a   :  { %6556 = vmatpush1.bf16.msra.mxu1 %v11356_v44  ;;  %v11436_v44 = vld [vmem:[#allocation13 + $0x31c] ss:$48 sps:$4 sm:$0xff]  }
0x154b   :  { %6599 = vmatpush1.bf16.msra.mxu0 %v11359_v45  ;;  %6557 = vmatprep.subr.bf16.mxu1 %v11364_v49  ;;  %v11439_v45 = vld [vmem:[#allocation13 + $0x24] ss:$48 sps:$4 sm:$0xff]   ;;  %v11434_v49 = vld [vmem:[#allocation13 + $0x318] ss:$48 sps:$4 sm:$0xff]  }
0x154c   :  { %6600 = vmatprep.subr.bf16.mxu0 %v11367_v46  ;;  %v11437_v46 = vld [vmem:[#allocation13 + $0x20] ss:$48 sps:$4 sm:$0xff]  }
0x154e   :  { %6558 = vmatpush1.bf16.msra.mxu1 %v11362_v22  ;;  %v11442_v22 = vld [vmem:[#allocation13 + $0x8c4] ss:$48 sps:$4 sm:$0xff]  }
0x154f   :  { %6601 = vmatpush1.bf16.msra.mxu0 %v11365_v7  ;;  %6559 = vmatprep.subr.bf16.mxu1 %v11370_v48  ;;  %v11445_v7 = vld [vmem:[#allocation13 + $0x5c4] ss:$48 sps:$4 sm:$0xff]   ;;  %v11440_v48 = vld [vmem:[#allocation13 + $0x8c0] ss:$48 sps:$4 sm:$0xff]  }
0x1550   :  { %6602 = vmatprep.subr.bf16.mxu0 %v11373_v17  ;;  %v11443_v17 = vld [vmem:[#allocation13 + $0x5c0] ss:$48 sps:$4 sm:$0xff]  }
0x1552   :  { %6560 = vmatpush1.bf16.msra.mxu1 %v11368_v33  ;;  %v11448_v33 = vld [vmem:[#allocation13 + $0x864] ss:$48 sps:$4 sm:$0xff]  }
0x1553   :  { %6603 = vmatpush1.bf16.msra.mxu0 %v11371_v14  ;;  %6561 = vmatprep.subr.bf16.mxu1 %v11376_v6  ;;  %v11451_v14 = vld [vmem:[#allocation13 + $0x564] ss:$48 sps:$4 sm:$0xff]   ;;  %v11446_v6 = vld [vmem:[#allocation13 + $0x860] ss:$48 sps:$4 sm:$0xff]  }
0x1554   :  { %6604 = vmatprep.subr.bf16.mxu0 %v11379_v3  ;;  %v11449_v3 = vld [vmem:[#allocation13 + $0x560] ss:$48 sps:$4 sm:$0xff]  }
0x1556   :  { %6562 = vmatpush1.bf16.msra.mxu1 %v11374_v51  ;;  %v11454_v51 = vld [vmem:[#allocation13 + $0x804] ss:$48 sps:$4 sm:$0xff]  }
0x1557   :  { %6605 = vmatpush1.bf16.msra.mxu0 %v11377_v15  ;;  %6563 = vmatprep.subr.bf16.mxu1 %v11382_v21  ;;  %v11457_v15 = vld [vmem:[#allocation13 + $0x504] ss:$48 sps:$4 sm:$0xff]   ;;  %v11452_v21 = vld [vmem:[#allocation13 + $0x800] ss:$48 sps:$4 sm:$0xff]  }
0x1558   :  { %6606 = vmatprep.subr.bf16.mxu0 %v11385_v30  ;;  %v11455_v30 = vld [vmem:[#allocation13 + $0x500] ss:$48 sps:$4 sm:$0xff]  }
0x155a   :  { %6564 = vmatpush1.bf16.msra.mxu1 %v11380_v34  ;;  %v11460_v34 = vld [vmem:[#allocation13 + $0x7a4] ss:$48 sps:$4 sm:$0xff]  }
0x155b   :  { %6607 = vmatpush1.bf16.msra.mxu0 %v11383_v10  ;;  %6565 = vmatprep.subr.bf16.mxu1 %v11388_v1  ;;  %v11463_v10 = vld [vmem:[#allocation13 + $0x4a4] ss:$48 sps:$4 sm:$0xff]   ;;  %v11458_v1 = vld [vmem:[#allocation13 + $0x7a0] ss:$48 sps:$4 sm:$0xff]  }
0x155c   :  { %6608 = vmatprep.subr.bf16.mxu0 %v11391_v38  ;;  %v11461_v38 = vld [vmem:[#allocation13 + $0x4a0] ss:$48 sps:$4 sm:$0xff]  }
0x155e   :  { %6566 = vmatpush1.bf16.msra.mxu1 %v11386_v5  ;;  %v11466_v5 = vld [vmem:[#allocation13 + $0x744] ss:$48 sps:$4 sm:$0xff]  }
0x155f   :  { %6609 = vmatpush1.bf16.msra.mxu0 %v11389_v8  ;;  %6567 = vmatprep.subr.bf16.mxu1 %v11394_v11  ;;  %v11469_v8 = vld [vmem:[#allocation13 + $0x444] ss:$48 sps:$4 sm:$0xff]   ;;  %v11464_v11 = vld [vmem:[#allocation13 + $0x740] ss:$48 sps:$4 sm:$0xff]  }
0x1560   :  { %6637 = vmatprep.subr.bf16.mxu0 %v11397_v50  ;;  %v11467_v50 = vld [vmem:[#allocation13 + $0x440] ss:$48 sps:$4 sm:$0xff]  }
0x1562   :  { %6568 = vmatpush2.bf16.msra.mxu1 %v11392_v58  ;;  %6627 = vmatmul.mubr.bf16.vlgmr.msra.gmra.mxu0 %v12976_v35  ;;  %v11472_v58 = vld [vmem:[#allocation13 + $0x6e4] ss:$48 sps:$4 sm:$0xff]  }
0x1563   :  { %6638 = vmatpush1.bf16.msra.mxu0 %v11395_v55  ;;  %6669 = vmatprep.mubr.bf16.mxu0 %v12974_v29  ;;  %v11475_v55 = vld [vmem:[#allocation13 + $0x3e4] ss:$48 sps:$4 sm:$0xff]  }
0x1564   :  { %6569 = vmatprep.subr.bf16.mxu1 %v11400_v54  ;;  %6639 = vmatprep.subr.bf16.mxu0 %v11403_v40  ;;  %v11470_v54 = vld [vmem:[#allocation13 + $0x6e0] ss:$48 sps:$4 sm:$0xff]  }
0x1565   :  { %v11473_v40 = vld [vmem:[#allocation13 + $0x3e0] ss:$48 sps:$4 sm:$0xff]  }
0x1566   :  { %6570 = vmatpush2.bf16.msra.mxu1 %v11398_v59  ;;  %v11478_v59 = vld [vmem:[#allocation13 + $0x684] ss:$48 sps:$4 sm:$0xff]  }
0x1567   :  { %6640 = vmatpush1.bf16.msra.mxu0 %v11401_v60  ;;  %6571 = vmatprep.subr.bf16.mxu1 %v11406_v61  ;;  %v11481_v60 = vld [vmem:[#allocation13 + $0x384] ss:$48 sps:$4 sm:$0xff]   ;;  %v11476_v61 = vld [vmem:[#allocation13 + $0x680] ss:$48 sps:$4 sm:$0xff]  }
0x1568   :  { %6641 = vmatprep.subr.bf16.mxu0 %v11409_v41  ;;  %v11479_v41 = vld [vmem:[#allocation13 + $0x380] ss:$48 sps:$4 sm:$0xff]  }
0x156a   :  { %6572 = vmatpush2.bf16.msra.mxu1 %v11404_v18  ;;  %v11484_v18 = vld [vmem:[#allocation13 + $0x624] ss:$48 sps:$4 sm:$0xff]  }
0x156b   :  { %6642 = vmatpush1.bf16.msra.mxu0 %v11407_v23  ;;  %6573 = vmatprep.subr.bf16.mxu1 %v11412_v12  ;;  %v11487_v23 = vld [vmem:[#allocation13 + $0x324] ss:$48 sps:$4 sm:$0xff]   ;;  %v11482_v12 = vld [vmem:[#allocation13 + $0x620] ss:$48 sps:$4 sm:$0xff]  }
0x156c   :  { %6643 = vmatprep.subr.bf16.mxu0 %v11415_v13  ;;  %v11485_v13 = vld [vmem:[#allocation13 + $0x320] ss:$48 sps:$4 sm:$0xff]  }
0x156e   :  { %6574 = vmatpush2.bf16.msra.mxu1 %v11410_v36  ;;  %v11490_v36 = vld [vmem:[#allocation13 + $0x2cc] ss:$48 sps:$4 sm:$0xff]  }
0x156f   :  { %6644 = vmatpush1.bf16.msra.mxu0 %v11413_v27  ;;  %6575 = vmatprep.subr.bf16.mxu1 %v11418_v43  ;;  %v11493_v27 = vld [vmem:[#allocation13 + $0x8cc] ss:$48 sps:$4 sm:$0xff]   ;;  %v12997_v43 = vld [vmem:[#allocation14] sm:$0xff] }
0x1570   :  { %6645 = vmatprep.subr.bf16.mxu0 %v11421_v19  ;;  %v11488_v19 = vld [vmem:[#allocation13 + $0x2c8] ss:$48 sps:$4 sm:$0xff]  }
0x1572   :  { %6576 = vmatpush2.bf16.msra.mxu1 %v11416_v52  ;;  %v11491_v52 = vld [vmem:[#allocation13 + $0x8c8] ss:$48 sps:$4 sm:$0xff]  }
0x1573   :  { %6646 = vmatpush1.bf16.msra.mxu0 %v11419_v2  ;;  %6577 = vmatprep.subr.bf16.mxu1 %v11424_v57  ;;  %v4796_v2 = vrot.slane %v12997_v43, %v12392_v28  ;;  %v11496_v57 = vld [vmem:[#allocation13 + $0x26c] ss:$48 sps:$4 sm:$0xff]  }
0x1574   :  { %6647 = vmatprep.subr.bf16.mxu0 %v11427_v42  ;;  %v11499_v42 = vld [vmem:[#allocation13 + $0x86c] ss:$48 sps:$4 sm:$0xff]  }
0x1576   :  { %6578 = vmatpush2.bf16.msra.mxu1 %v11422_v4 }
0x1577   :  { %6648 = vmatpush1.bf16.msra.mxu0 %v11425_v47  ;;  %6579 = vmatprep.subr.bf16.mxu1 %v11430_v20  ;;  %v11494_v20 = vld [vmem:[#allocation13 + $0x268] ss:$48 sps:$4 sm:$0xff]  }
0x1578   :  { %6649 = vmatprep.subr.bf16.mxu0 %v11433_v37 }
0x157a   :  { %6580 = vmatpush2.bf16.msra.mxu1 %v11428_v39  ;;  %v11497_v39 = vld [vmem:[#allocation13 + $0x868] ss:$48 sps:$4 sm:$0xff]  }
0x157b   :  { %6650 = vmatpush1.bf16.msra.mxu0 %v11431_v31  ;;  %6581 = vmatprep.subr.bf16.mxu1 %v11436_v44  ;;  %v11502_v31 = vld [vmem:[#allocation13 + $0x20c] ss:$48 sps:$4 sm:$0xff]  }
0x157c   :  { %6651 = vmatprep.subr.bf16.mxu0 %v11439_v45 }
0x157e   :  { %6582 = vmatpush2.bf16.msra.mxu1 %v11434_v49  ;;  %v11505_v49 = vld [vmem:[#allocation13 + $0x80c] ss:$48 sps:$4 sm:$0xff]  }
0x157f   :  { %6652 = vmatpush1.bf16.msra.mxu0 %v11437_v46  ;;  %6680 = vmatprep.subr.bf16.mxu1 %v11442_v22 }
0x1580   :  { %6653 = vmatprep.subr.bf16.mxu0 %v11445_v7  ;;  %v11500_v7 = vld [vmem:[#allocation13 + $0x208] ss:$48 sps:$4 sm:$0xff]  }
0x1581   :  { %6584 = vmatmul.mubr.bf16.vlgmr.msra.gmra.mxu1 %v12978_v16 }
0x1582   :  { %6681 = vmatpush1.bf16.msra.mxu1 %v11440_v48  ;;  %6712 = vmatprep.mubr.bf16.mxu1 %v12258_v9 }
0x1583   :  { %6654 = vmatpush2.bf16.msra.mxu0 %v11443_v17  ;;  %6682 = vmatprep.subr.bf16.mxu1 %v11448_v33  ;;  %v11503_v17 = vld [vmem:[#allocation13 + $0x808] ss:$48 sps:$4 sm:$0xff]  }
0x1584   :  { %6655 = vmatprep.subr.bf16.mxu0 %v11451_v14  ;;  %v11511_v14 = vld [vmem:[#allocation13 + $0x7ac] ss:$48 sps:$4 sm:$0xff]  }
0x1586   :  { %6683 = vmatpush1.bf16.msra.mxu1 %v11446_v6 }
0x1587   :  { %6656 = vmatpush2.bf16.msra.mxu0 %v11449_v3  ;;  %6684 = vmatprep.subr.bf16.mxu1 %v11454_v51  ;;  %v11506_v3 = vld [vmem:[#allocation13 + $0x1a8] ss:$48 sps:$4 sm:$0xff]  }
0x1588   :  { %6657 = vmatprep.subr.bf16.mxu0 %v11457_v15 }
0x158a   :  { %6685 = vmatpush1.bf16.msra.mxu1 %v11452_v21  ;;  %v11509_v21 = vld [vmem:[#allocation13 + $0x7a8] ss:$48 sps:$4 sm:$0xff]  }
0x158b   :  { %6658 = vmatpush2.bf16.msra.mxu0 %v11455_v30  ;;  %6686 = vmatprep.subr.bf16.mxu1 %v11460_v34  ;;  %v11517_v30 = vld [vmem:[#allocation13 + $0x74c] ss:$48 sps:$4 sm:$0xff]  }
0x158c   :  { %6659 = vmatprep.subr.bf16.mxu0 %v11463_v10  ;;  %v11512_v10 = vld [vmem:[#allocation13 + $0x148] ss:$48 sps:$4 sm:$0xff]  }
0x158e   :  { %6687 = vmatpush1.bf16.msra.mxu1 %v11458_v1  ;;  %v11515_v1 = vld [vmem:[#allocation13 + $0x748] ss:$48 sps:$4 sm:$0xff]  }
0x158f   :  { %6660 = vmatpush2.bf16.msra.mxu0 %v11461_v38  ;;  %6688 = vmatprep.subr.bf16.mxu1 %v11466_v5  ;;  %v11520_v38 = vld [vmem:[#allocation13 + $0xec] ss:$48 sps:$4 sm:$0xff]  }
0x1590   :  { %6661 = vmatprep.subr.bf16.mxu0 %v11469_v8  ;;  %v11523_v5 = vld [vmem:[#allocation13 + $0x6ec] ss:$48 sps:$4 sm:$0xff]  }
0x1592   :  { %6689 = vmatpush1.bf16.msra.mxu1 %v11464_v11  ;;  %v11518_v11 = vld [vmem:[#allocation13 + $0xe8] ss:$48 sps:$4 sm:$0xff]  }
0x1593   :  { %6662 = vmatpush2.bf16.msra.mxu0 %v11467_v50  ;;  %6690 = vmatprep.subr.bf16.mxu1 %v11472_v58  ;;  %v4800_v50 = vrot.slane %v12997_v43, %v12386_v25  ;;  %v11521_v58 = vld [vmem:[#allocation13 + $0x6e8] ss:$48 sps:$4 sm:$0xff]  }
0x1594   :  { %6663 = vmatprep.subr.bf16.mxu0 %v11475_v55  ;;  %v11526_v55 = vld [vmem:[#allocation13 + $0x8c] ss:$48 sps:$4 sm:$0xff]  }
0x1596   :  { %6691 = vmatpush1.bf16.msra.mxu1 %v11470_v54  ;;  %v11529_v54 = vld [vmem:[#allocation13 + $0x68c] ss:$48 sps:$4 sm:$0xff]  }
0x1597   :  { %6664 = vmatpush2.bf16.msra.mxu0 %v11473_v40  ;;  %6692 = vmatprep.subr.bf16.mxu1 %v11478_v59  ;;  %v11524_v59 = vld [vmem:[#allocation13 + $0x88] ss:$48 sps:$4 sm:$0xff]  }
0x1598   :  { %6665 = vmatprep.subr.bf16.mxu0 %v11481_v60 }
0x159a   :  { %6693 = vmatpush1.bf16.msra.mxu1 %v11476_v61  ;;  %v11527_v61 = vld [vmem:[#allocation13 + $0x688] ss:$48 sps:$4 sm:$0xff]  }
0x159b   :  { %6666 = vmatpush2.bf16.msra.mxu0 %v11479_v41  ;;  %6694 = vmatprep.subr.bf16.mxu1 %v11484_v18  ;;  %v11532_v41 = vld [vmem:[#allocation13 + $0x2c] ss:$48 sps:$4 sm:$0xff]  }
0x159c   :  { %6667 = vmatprep.subr.bf16.mxu0 %v11487_v23  ;;  %v11535_v23 = vld [vmem:[#allocation13 + $0x62c] ss:$48 sps:$4 sm:$0xff]  }
0x159e   :  { %6695 = vmatpush1.bf16.msra.mxu1 %v11482_v12 }
0x159f   :  { %6668 = vmatpush2.bf16.msra.mxu0 %v11485_v13  ;;  %6723 = vmatprep.subr.bf16.mxu1 %v11490_v36  ;;  %v11530_v13 = vld [vmem:[#allocation13 + $0x28] ss:$48 sps:$4 sm:$0xff]  }
0x15a0   :  { %6766 = vmatprep.subr.bf16.mxu0 %v11493_v27  ;;  %v11533_v27 = vld [vmem:[#allocation13 + $0x628] ss:$48 sps:$4 sm:$0xff]  }
0x15a1   :  { %6713 = vmatmul.mubr.bf16.vlgmr.msra.gmra.mxu1 %v12976_v35  ;;  %v6370_v4 = vpop.f32.mrf.mxu1 }
0x15a2   :  { %6670 = vmatmul.mubr.bf16.vlgmr.msra.gmra.mxu0 %v12978_v16  ;;  %6724 = vmatpush1.bf16.msra.mxu1 %v11488_v19  ;;  %v6327_v47 = vpop.f32.mrf.mxu0  ;;  %v11538_v19 = vld [vmem:[#allocation13 + $0x5cc] ss:$48 sps:$4 sm:$0xff]  }
0x15a3   :  { %6755 = vmatprep.mubr.bf16.mxu1 %v12974_v29  ;;  %v6328_v37 = vadd.f32 %v6327_v47, %v4796_v2  ;;  %6767 = vmatpush1.bf16.msra.mxu0 %v11491_v52  ;;  %v6372_v44 = vpop.f32.mrf.mxu1  ;;  %v11508_v29 = vld [vmem:[#allocation13 + $0x1ac] ss:$48 sps:$4 sm:$0xff]   ;;  %v11541_v52 = vld [vmem:[#allocation16 + $0xac] ss:$12 sps:$4 sm:$0xff]  }
0x15a4   :  { %v6329_v45 = vpop.f32.mrf.mxu0  ;;  %6725 = vmatprep.subr.bf16.mxu1 %v11496_v57  ;;  %6768 = vmatprep.subr.bf16.mxu0 %v11499_v42  ;;  %v11536_v57 = vld [vmem:[#allocation13 + $0x5c8] ss:$48 sps:$4 sm:$0xff]   ;;  %v11544_v47 = vld [vmem:[#allocation13 + $0x56c] ss:$48 sps:$4 sm:$0xff]  }
0x15a5   :  { %v6371_v46 = vadd.f32 %v6370_v4, %v6328_v37  ;;  %6798 = vmatprep.mubr.bf16.mxu0 %v12258_v9  ;;  %v6374_v33 = vpop.f32.mrf.mxu1  ;;  %v11514_v9 = vld [vmem:[#allocation13 + $0x14c] ss:$48 sps:$4 sm:$0xff]   ;;  %v6330_v60 = vadd.f32 %v6329_v45, %v4800_v50  ;;  %v11539_v4 = vld [vmem:[#allocation16 + $0xa8] ss:$12 sps:$4 sm:$0xff]  }
0x15a6   :  { %6726 = vmatpush1.bf16.msra.mxu1 %v11494_v20  ;;  %v6331_v22 = vpop.f32.mrf.mxu0  ;;  %v11547_v20 = vld [vmem:[#allocation16 + $0x94] ss:$12 sps:$4 sm:$0xff]   ;;  %v11553_v45 = vld [vmem:[#allocation16 + $0x7c] ss:$12 sps:$4 sm:$0xff]  }
0x15a7   :  { %v6332_v48 = vadd.f32 %v6331_v22, %v4796_v2  ;;  %6769 = vmatpush1.bf16.msra.mxu0 %v11497_v39  ;;  %6727 = vmatprep.subr.bf16.mxu1 %v11502_v31  ;;  %v6809_v51 = vmax.f32 %v6371_v46, 0.0  ;;  %v6376_v18 = vpop.f32.mrf.mxu1  ;;  %v6373_v36 = vadd.f32 %v6372_v44, %v6330_v60  ;;  %v11542_v39 = vld [vmem:[#allocation13 + $0x568] ss:$48 sps:$4 sm:$0xff]   ;;  %v11550_v44 = vld [vmem:[#allocation13 + $0x50c] ss:$48 sps:$4 sm:$0xff]  }
0x15a8   :  { %6770 = vmatprep.subr.bf16.mxu0 %v11505_v49  ;;  %v6333_v8 = vpop.f32.mrf.mxu0  ;;  %v11545_v31 = vld [vmem:[#allocation16 + $0x90] ss:$12 sps:$4 sm:$0xff]   ;;  %v11551_v46 = vld [vmem:[#allocation16 + $0x78] ss:$12 sps:$4 sm:$0xff]  }
0x15a9   :  { %v6375_v6 = vadd.f32 %v6374_v33, %v6332_v48  ;;  %v6334_v40 = vadd.f32 %v6333_v8, %v4800_v50  ;;  %v6810_v42 = vmax.f32 %v6373_v36, 0.0  ;;  %v11548_v49 = vld [vmem:[#allocation13 + $0x508] ss:$48 sps:$4 sm:$0xff]   ;;  %v11556_v22 = vld [vmem:[#allocation13 + $0x4ac] ss:$48 sps:$4 sm:$0xff]  }
0x15aa   :  { %6728 = vmatpush1.bf16.msra.mxu1 %v11500_v7  ;;  %v11559_v7 = vld [vmem:[#allocation16 + $0x64] ss:$12 sps:$4 sm:$0xff]   ;;  %v11554_v48 = vld [vmem:[#allocation13 + $0x4a8] ss:$48 sps:$4 sm:$0xff]  }
0x15ab   :  { %v6821_v15 = vmax.f32 %v6375_v6, 0.0  ;;  %6771 = vmatpush1.bf16.msra.mxu0 %v11503_v17  ;;  %6729 = vmatprep.subr.bf16.mxu1 %v11508_v29  ;;  %v6377_v12 = vadd.f32 %v6376_v18, %v6334_v40  ;;  %v11562_v17 = vld [vmem:[#allocation13 + $0x44c] ss:$48 sps:$4 sm:$0xff]   ;;  %v11565_v29 = vld [vmem:[#allocation16 + $0x4c] ss:$12 sps:$4 sm:$0xff]  }
0x15ac   :  { %6772 = vmatprep.subr.bf16.mxu0 %v11511_v14  ;;  %v11560_v33 = vld [vmem:[#allocation13 + $0x448] ss:$48 sps:$4 sm:$0xff]   ;;  %v11563_v14 = vld [vmem:[#allocation16 + $0x48] ss:$12 sps:$4 sm:$0xff]   ;;  %v11568_v6 = vld [vmem:[#allocation13 + $0x3ec] ss:$48 sps:$4 sm:$0xff]  }
0x15ad   :  { %v13005_v34 = vpack.c.bf16 %v6821_v15, %v6809_v51  ;;  %v6822_v2 = vmax.f32 %v6377_v12, 0.0  ;;  %v11566_v51 = vld [vmem:[#allocation13 + $0x3e8] ss:$48 sps:$4 sm:$0xff]   ;;  %v11587_v40 = vld [vmem:[#allocation16 + $0x168] ss:$12 sps:$4 sm:$0xff]  }
0x15ae   :  { %6730 = vmatpush1.bf16.msra.mxu1 %v11506_v3  ;;  %v11571_v3 = vld [vmem:[#allocation16 + $0x34] ss:$12 sps:$4 sm:$0xff]   ;;  %v11569_v15 = vld [vmem:[#allocation16 + $0x30] ss:$12 sps:$4 sm:$0xff]   ;;  %v11589_v50 = vld [vmem:[#allocation16 + $0x16c] ss:$12 sps:$4 sm:$0xff]  }
0x15af   :  { %6773 = vmatpush1.bf16.msra.mxu0 %v11509_v21  ;;  %6731 = vmatprep.subr.bf16.mxu1 %v11514_v9  ;;  %v13009_v37 = vpack.c.bf16 %v6822_v2, %v6810_v42  ;;  %v11574_v21 = vld [vmem:[#allocation13 + $0x38c] ss:$48 sps:$4 sm:$0xff]   ;;  %v11577_v9 = vld [vmem:[#allocation16 + $0x1c] ss:$12 sps:$4 sm:$0xff]  }
0x15b0   :  { %6774 = vmatprep.subr.bf16.mxu0 %v11517_v30  ;;  %v11572_v30 = vld [vmem:[#allocation13 + $0x388] ss:$48 sps:$4 sm:$0xff]  }
0x15b1   :  { %v11581_v8 = vld [vmem:[#allocation16] ss:$12 sps:$4 sm:$0xff]   ;;  %v11598_v36 = vld [vmem:[#allocation16 + $0x1fc] ss:$12 sps:$4 sm:$0xff]  }
0x15b2   :  { %6732 = vmatpush1.bf16.msra.mxu1 %v11512_v10  ;;  %v11575_v10 = vld [vmem:[#allocation16 + $0x18] ss:$12 sps:$4 sm:$0xff]  }
0x15b3   :  { %6775 = vmatpush1.bf16.msra.mxu0 %v11515_v1  ;;  %6733 = vmatprep.subr.bf16.mxu1 %v11520_v38  ;;  %v11580_v1 = vld [vmem:[#allocation13 + $0x32c] ss:$48 sps:$4 sm:$0xff]  }
0x15b4   :  { %6776 = vmatprep.subr.bf16.mxu0 %v11523_v5  ;;  %v11583_v38 = vld [vmem:[#allocation16 + $0x4] ss:$12 sps:$4 sm:$0xff]   ;;  %v11578_v5 = vld [vmem:[#allocation13 + $0x328] ss:$48 sps:$4 sm:$0xff]  }
0x15b6   :  { %6734 = vmatpush1.bf16.msra.mxu1 %v11518_v11  ;;  %v11586_v11 = vld [vmem:[#allocation16 + $0x22c] ss:$12 sps:$4 sm:$0xff]  }
0x15b7   :  { %6777 = vmatpush1.bf16.msra.mxu0 %v11521_v58  ;;  %6735 = vmatprep.subr.bf16.mxu1 %v11526_v55  ;;  %v4807_v58 = vsub.s32 3, %v12383_v24 }
0x15b8   :  { %6778 = vmatprep.subr.bf16.mxu0 %v11529_v54  ;;  %v11584_v54 = vld [vmem:[#allocation16 + $0x228] ss:$12 sps:$4 sm:$0xff]  }
0x15b9   :  { %v4808_v60 = vrot.slane %v12997_v43, %v4807_v58 }
0x15ba   :  { %6736 = vmatpush1.bf16.msra.mxu1 %v11524_v59  ;;  %v11592_v59 = vld [vmem:[#allocation16 + $0x214] ss:$12 sps:$4 sm:$0xff]  }
0x15bb   :  { %6779 = vmatpush1.bf16.msra.mxu0 %v11527_v61  ;;  %6737 = vmatprep.subr.bf16.mxu1 %v11532_v41  ;;  %v11595_v61 = vld [vmem:[#allocation16 + $0x154] ss:$12 sps:$4 sm:$0xff]  }
0x15bc   :  { %6780 = vmatprep.subr.bf16.mxu0 %v11535_v23  ;;  %v11590_v23 = vld [vmem:[#allocation16 + $0x210] ss:$12 sps:$4 sm:$0xff]  }
0x15be   :  { %6738 = vmatpush1.bf16.msra.mxu1 %v11530_v13  ;;  %v11593_v13 = vld [vmem:[#allocation16 + $0x150] ss:$12 sps:$4 sm:$0xff]  }
0x15bf   :  { %6781 = vmatpush1.bf16.msra.mxu0 %v11533_v27  ;;  %6739 = vmatprep.subr.bf16.mxu1 %v11538_v19  ;;  %v11601_v19 = vld [vmem:[#allocation16 + $0x13c] ss:$12 sps:$4 sm:$0xff]  }
0x15c0   :  { %8782 = vmatprep.subr.bf16.mxu0 %v11541_v52 }
0x15c2   :  { %6740 = vmatpush2.bf16.msra.mxu1 %v11536_v57  ;;  %6799 = vmatmul.mubr.bf16.vlgmr.msra.gmra.mxu0 %v12976_v35  ;;  %v11557_v35 = vld [vmem:[#allocation16 + $0x60] ss:$12 sps:$4 sm:$0xff]   ;;  %v13014_v55 = vpop.f32.mrf.mxu0  ;;  %v11596_v57 = vld [vmem:[#allocation16 + $0x1f8] ss:$12 sps:$4 sm:$0xff]  }
0x15c3   :  { %8783 = vmatpush1.bf16.msra.mxu0 %v11539_v4  ;;  %8814 = vmatprep.mubr.bf16.mxu0 %v13009_v37  ;;  %v11604_v4 = vld [vmem:[#allocation16 + $0x1e4] ss:$12 sps:$4 sm:$0xff]  }
0x15c4   :  { %6741 = vmatprep.subr.bf16.mxu1 %v11544_v47  ;;  %8784 = vmatprep.subr.bf16.mxu0 %v11547_v20  ;;  %v6458_v41 = vpop.f32.mrf.mxu0 }
0x15c6   :  { %6742 = vmatpush2.bf16.msra.mxu1 %v11542_v39  ;;  %v13022_v52 = vpop.f32.mrf.mxu0  ;;  %v11607_v39 = vld [vmem:[#allocation16 + $0x124] ss:$12 sps:$4 sm:$0xff]  }
0x15c7   :  { %8785 = vmatpush1.bf16.msra.mxu0 %v11545_v31  ;;  %6743 = vmatprep.subr.bf16.mxu1 %v11550_v44 }
0x15c8   :  { %8786 = vmatprep.subr.bf16.mxu0 %v11553_v45  ;;  %v6462_v31 = vpop.f32.mrf.mxu0  ;;  %v11602_v45 = vld [vmem:[#allocation16 + $0x1e0] ss:$12 sps:$4 sm:$0xff]  }
0x15ca   :  { %6744 = vmatpush2.bf16.msra.mxu1 %v11548_v49  ;;  %v11605_v49 = vld [vmem:[#allocation16 + $0x120] ss:$12 sps:$4 sm:$0xff]  }
0x15cb   :  { %8787 = vmatpush1.bf16.msra.mxu0 %v11551_v46  ;;  %6745 = vmatprep.subr.bf16.mxu1 %v11556_v22  ;;  %v11610_v46 = vld [vmem:[#allocation16 + $0x1cc] ss:$12 sps:$4 sm:$0xff]  }
0x15cc   :  { %8788 = vmatprep.subr.bf16.mxu0 %v11559_v7 }
0x15ce   :  { %6746 = vmatpush2.bf16.msra.mxu1 %v11554_v48  ;;  %v11613_v48 = vld [vmem:[#allocation16 + $0x10c] ss:$12 sps:$4 sm:$0xff]  }
0x15cf   :  { %8789 = vmatpush1.bf16.msra.mxu0 %v11557_v35  ;;  %6747 = vmatprep.subr.bf16.mxu1 %v11562_v17  ;;  %v11608_v17 = vld [vmem:[#allocation16 + $0x1c8] ss:$12 sps:$4 sm:$0xff]  }
0x15d0   :  { %8790 = vmatprep.subr.bf16.mxu0 %v11565_v29  ;;  %v11611_v29 = vld [vmem:[#allocation16 + $0x108] ss:$12 sps:$4 sm:$0xff]  }
0x15d2   :  { %6748 = vmatpush2.bf16.msra.mxu1 %v11560_v33  ;;  %v11616_v33 = vld [vmem:[#allocation16 + $0x1b4] ss:$12 sps:$4 sm:$0xff]  }
0x15d3   :  { %8791 = vmatpush1.bf16.msra.mxu0 %v11563_v14  ;;  %6749 = vmatprep.subr.bf16.mxu1 %v11568_v6  ;;  %v11619_v14 = vld [vmem:[#allocation16 + $0xf4] ss:$12 sps:$4 sm:$0xff]   ;;  %v11614_v6 = vld [vmem:[#allocation16 + $0x1b0] ss:$12 sps:$4 sm:$0xff]  }
0x15d4   :  { %8792 = vmatprep.subr.bf16.mxu0 %v11571_v3  ;;  %v11617_v3 = vld [vmem:[#allocation16 + $0xf0] ss:$12 sps:$4 sm:$0xff]  }
0x15d6   :  { %6750 = vmatpush2.bf16.msra.mxu1 %v11566_v51  ;;  %v11622_v51 = vld [vmem:[#allocation16 + $0x19c] ss:$12 sps:$4 sm:$0xff]  }
0x15d7   :  { %8793 = vmatpush1.bf16.msra.mxu0 %v11569_v15  ;;  %6751 = vmatprep.subr.bf16.mxu1 %v11574_v21  ;;  %v11625_v15 = vld [vmem:[#allocation16 + $0xdc] ss:$12 sps:$4 sm:$0xff]   ;;  %v11620_v21 = vld [vmem:[#allocation16 + $0x198] ss:$12 sps:$4 sm:$0xff]  }
0x15d8   :  { %8794 = vmatprep.subr.bf16.mxu0 %v11577_v9  ;;  %v11623_v9 = vld [vmem:[#allocation16 + $0xd8] ss:$12 sps:$4 sm:$0xff]  }
0x15da   :  { %6752 = vmatpush2.bf16.msra.mxu1 %v11572_v30  ;;  %v11628_v30 = vld [vmem:[#allocation16 + $0x184] ss:$12 sps:$4 sm:$0xff]  }
0x15db   :  { %8795 = vmatpush1.bf16.msra.mxu0 %v11575_v10  ;;  %6753 = vmatprep.subr.bf16.mxu1 %v11580_v1  ;;  %v11631_v10 = vld [vmem:[#allocation16 + $0xc4] ss:$12 sps:$4 sm:$0xff]   ;;  %v11626_v1 = vld [vmem:[#allocation16 + $0x180] ss:$12 sps:$4 sm:$0xff]  }
0x15dc   :  { %8796 = vmatprep.subr.bf16.mxu0 %v11583_v38  ;;  %v11629_v38 = vld [vmem:[#allocation16 + $0xc0] ss:$12 sps:$4 sm:$0xff]  }
0x15de   :  { %6754 = vmatpush2.bf16.msra.mxu1 %v11578_v5  ;;  %v11634_v5 = vld [vmem:[#allocation16 + $0x2ec] ss:$12 sps:$4 sm:$0xff]  }
0x15df   :  { %8797 = vmatpush1.bf16.msra.mxu0 %v11581_v8  ;;  %8825 = vmatprep.subr.bf16.mxu1 %v11586_v11  ;;  %v11637_v8 = vld [vmem:[#allocation16 + $0x3ac] ss:$12 sps:$4 sm:$0xff]   ;;  %v4815_v11 = vsub.s32 5, %v12383_v24 }
0x15e0   :  { %8798 = vmatprep.subr.bf16.mxu0 %v11589_v50  ;;  %v11632_v50 = vld [vmem:[#allocation16 + $0x2e8] ss:$12 sps:$4 sm:$0xff]  }
0x15e1   :  { %v13019_v18 = vpop.f32.mrf.mxu1  ;;  %6756 = vmatmul.mubr.bf16.vlgmr.msra.gmra.mxu1 %v12978_v16  ;;  %v11599_v16 = vld [vmem:[#allocation16 + $0x138] ss:$12 sps:$4 sm:$0xff]  }
0x15e2   :  { %8826 = vmatpush1.bf16.msra.mxu1 %v11584_v54  ;;  %v11635_v54 = vld [vmem:[#allocation16 + $0x3a8] ss:$12 sps:$4 sm:$0xff]  }
0x15e3   :  { %v6415_v12 = vpop.f32.mrf.mxu1  ;;  %8799 = vmatpush2.bf16.msra.mxu0 %v11587_v40  ;;  %8827 = vmatprep.subr.bf16.mxu1 %v11592_v59  ;;  %v11640_v40 = vld [vmem:[#allocation16 + $0x2d4] ss:$12 sps:$4 sm:$0xff]  }
0x15e4   :  { %v6416_v27 = vadd.f32 %v6415_v12, %v4808_v60  ;;  %8800 = vmatprep.subr.bf16.mxu0 %v11595_v61  ;;  %v11643_v59 = vld [vmem:[#allocation16 + $0x394] ss:$12 sps:$4 sm:$0xff]   ;;  %v4816_v61 = vrot.slane %v12997_v43, %v4815_v11 }
0x15e5   :  { %v13024_v2 = vpop.f32.mrf.mxu1 }
0x15e6   :  { %8828 = vmatpush1.bf16.msra.mxu1 %v11590_v23  ;;  %v6459_v47 = vadd.f32 %v6458_v41, %v6416_v27  ;;  %v11638_v23 = vld [vmem:[#allocation16 + $0x2d0] ss:$12 sps:$4 sm:$0xff]  }
0x15e7   :  { %v6419_v42 = vpop.f32.mrf.mxu1  ;;  %8801 = vmatpush2.bf16.msra.mxu0 %v11593_v13  ;;  %8829 = vmatprep.subr.bf16.mxu1 %v11598_v36  ;;  %v11641_v13 = vld [vmem:[#allocation16 + $0x390] ss:$12 sps:$4 sm:$0xff]  }
0x15e8   :  { %v6420_v20 = vadd.f32 %v6419_v42, %v4808_v60  ;;  %8802 = vmatprep.subr.bf16.mxu0 %v11601_v19  ;;  %v6812_v22 = vmax.f32 %v6459_v47, 0.0  ;;  %v11646_v36 = vld [vmem:[#allocation16 + $0x2bc] ss:$12 sps:$4 sm:$0xff]   ;;  %v11647_v47 = vld [vmem:[#allocation16 + $0x378] ss:$12 sps:$4 sm:$0xff]  }
0x15e9   :  { %v11649_v19 = vld [vmem:[#allocation16 + $0x37c] ss:$12 sps:$4 sm:$0xff]  }
0x15ea   :  { %v6463_v44 = vadd.f32 %v6462_v31, %v6420_v20  ;;  %8830 = vmatpush1.bf16.msra.mxu1 %v11596_v57  ;;  %v11652_v20 = vld [vmem:[#allocation16 + $0x2a4] ss:$12 sps:$4 sm:$0xff]  }
0x15eb   :  { %8803 = vmatpush2.bf16.msra.mxu0 %v11599_v16  ;;  %8831 = vmatprep.subr.bf16.mxu1 %v11604_v4  ;;  %v11644_v4 = vld [vmem:[#allocation16 + $0x2b8] ss:$12 sps:$4 sm:$0xff]  }
0x15ec   :  { %v6824_v7 = vmax.f32 %v6463_v44, 0.0  ;;  %8804 = vmatprep.subr.bf16.mxu0 %v11607_v39  ;;  %v11655_v31 = vld [vmem:[#allocation16 + $0x364] ss:$12 sps:$4 sm:$0xff]  }
0x15ee   :  { %8832 = vmatpush1.bf16.msra.mxu1 %v11602_v45  ;;  %v13026_v35 = vpack.c.bf16 %v6824_v7, %v6812_v22  ;;  %v11653_v7 = vld [vmem:[#allocation16 + $0x360] ss:$12 sps:$4 sm:$0xff]  }
0x15ef   :  { %8805 = vmatpush2.bf16.msra.mxu0 %v11605_v49  ;;  %8833 = vmatprep.subr.bf16.mxu1 %v11610_v46  ;;  %v11650_v46 = vld [vmem:[#allocation16 + $0x2a0] ss:$12 sps:$4 sm:$0xff]  }
0x15f0   :  { %8857 = vmatprep.mubr.bf16.mxu1 %v13026_v35  ;;  %8806 = vmatprep.subr.bf16.mxu0 %v11613_v48  ;;  %v11658_v48 = vld [vmem:[#allocation16 + $0x28c] ss:$12 sps:$4 sm:$0xff]  }
0x15f2   :  { %8834 = vmatpush1.bf16.msra.mxu1 %v11608_v17  ;;  %v11661_v17 = vld [vmem:[#allocation16 + $0x34c] ss:$12 sps:$4 sm:$0xff]  }
0x15f3   :  { %8807 = vmatpush2.bf16.msra.mxu0 %v11611_v29  ;;  %8835 = vmatprep.subr.bf16.mxu1 %v11616_v33 }
0x15f4   :  { %8808 = vmatprep.subr.bf16.mxu0 %v11619_v14  ;;  %v11656_v14 = vld [vmem:[#allocation16 + $0x288] ss:$12 sps:$4 sm:$0xff]  }
0x15f6   :  { %8836 = vmatpush1.bf16.msra.mxu1 %v11614_v6 }
0x15f7   :  { %8809 = vmatpush2.bf16.msra.mxu0 %v11617_v3  ;;  %8837 = vmatprep.subr.bf16.mxu1 %v11622_v51  ;;  %v11659_v3 = vld [vmem:[#allocation16 + $0x348] ss:$12 sps:$4 sm:$0xff]  }
0x15f8   :  { %8810 = vmatprep.subr.bf16.mxu0 %v11625_v15  ;;  %v11664_v51 = vld [vmem:[#allocation16 + $0x274] ss:$12 sps:$4 sm:$0xff]  }
0x15f9   :  { %v11667_v15 = vld [vmem:[#allocation16 + $0x334] ss:$12 sps:$4 sm:$0xff]  }
0x15fa   :  { %8838 = vmatpush1.bf16.msra.mxu1 %v11620_v21  ;;  %v4804_v21 = vrot.slane %v12997_v43, %v12389_v26 }
0x15fb   :  { %8811 = vmatpush2.bf16.msra.mxu0 %v11623_v9  ;;  %8839 = vmatprep.subr.bf16.mxu1 %v11628_v30  ;;  %v11662_v9 = vld [vmem:[#allocation16 + $0x270] ss:$12 sps:$4 sm:$0xff]  }
0x15fc   :  { %8812 = vmatprep.subr.bf16.mxu0 %v11631_v10  ;;  %v6418_v30 = vadd.f32 %v13024_v2, %v4804_v21  ;;  %v11665_v10 = vld [vmem:[#allocation16 + $0x330] ss:$12 sps:$4 sm:$0xff]  }
0x15fe   :  { %8840 = vmatpush1.bf16.msra.mxu1 %v11626_v1  ;;  %v11670_v1 = vld [vmem:[#allocation16 + $0x25c] ss:$12 sps:$4 sm:$0xff]   ;;  %v6461_v11 = vadd.f32 %v13022_v52, %v6418_v30 }
0x15ff   :  { %8813 = vmatpush2.bf16.msra.mxu0 %v11629_v38  ;;  %8841 = vmatprep.subr.bf16.mxu1 %v11634_v5  ;;  %v11673_v38 = vld [vmem:[#allocation16 + $0x31c] ss:$12 sps:$4 sm:$0xff]   ;;  %v6414_v5 = vadd.f32 %v13019_v18, %v4804_v21  ;;  %v11685_v18 = vld [vmem:[#allocation16 + $0x46c] ss:$12 sps:$4 sm:$0xff]  }
0x1600   :  { %8868 = vmatprep.subr.bf16.mxu0 %v11637_v8  ;;  %v11668_v8 = vld [vmem:[#allocation16 + $0x258] ss:$12 sps:$4 sm:$0xff]   ;;  %v11680_v52 = vld [vmem:[#allocation16 + $0x528] ss:$12 sps:$4 sm:$0xff]  }
0x1601   :  { %v13030_v60 = vpop.f32.mrf.mxu1  ;;  %v6457_v2 = vadd.f32 %v13014_v55, %v6414_v5  ;;  %v11691_v55 = vld [vmem:[#allocation16 + $0x454] ss:$12 sps:$4 sm:$0xff]   ;;  %v11718_v21 = vld [vmem:[#allocation16 + $0x49c] ss:$12 sps:$4 sm:$0xff]   ;;  %v11724_v5 = vld [vmem:[#allocation16 + $0x484] ss:$12 sps:$4 sm:$0xff]  }
0x1602   :  { %v13033_v41 = vpop.f32.mrf.mxu0  ;;  %8815 = vmatmul.mubr.bf16.vlgmr.msra.gmra.mxu0 %v13005_v34  ;;  %8842 = vmatpush2.bf16.msra.mxu1 %v11632_v50  ;;  %v11671_v50 = vld [vmem:[#allocation16 + $0x318] ss:$12 sps:$4 sm:$0xff]   ;;  %v11721_v30 = vld [vmem:[#allocation16 + $0x3dc] ss:$12 sps:$4 sm:$0xff]  }
0x1603   :  { %v6544_v12 = vpop.f32.mrf.mxu1  ;;  %8869 = vmatpush1.bf16.msra.mxu0 %v11635_v54  ;;  %8843 = vmatprep.subr.bf16.mxu1 %v11640_v40  ;;  %v11676_v54 = vld [vmem:[#allocation16 + $0x244] ss:$12 sps:$4 sm:$0xff]  }
0x1604   :  { %v6501_v27 = vpop.f32.mrf.mxu0  ;;  %8870 = vmatprep.subr.bf16.mxu0 %v11643_v59  ;;  %v11679_v40 = vld [vmem:[#allocation16 + $0x304] ss:$12 sps:$4 sm:$0xff]   ;;  %v11674_v59 = vld [vmem:[#allocation16 + $0x240] ss:$12 sps:$4 sm:$0xff]  }
0x1605   :  { %v6502_v57 = vadd.f32 %v6501_v27, %v4816_v61  ;;  %v13036_v42 = vpop.f32.mrf.mxu1  ;;  %v11683_v27 = vld [vmem:[#allocation16 + $0x468] ss:$12 sps:$4 sm:$0xff]  }
0x1606   :  { %v13038_v16 = vpop.f32.mrf.mxu0  ;;  %8844 = vmatpush2.bf16.msra.mxu1 %v11638_v23  ;;  %v11677_v23 = vld [vmem:[#allocation16 + $0x300] ss:$12 sps:$4 sm:$0xff]  }
0x1607   :  { %8871 = vmatpush1.bf16.msra.mxu0 %v11641_v13  ;;  %8845 = vmatprep.subr.bf16.mxu1 %v11646_v36  ;;  %v6545_v44 = vadd.f32 %v6544_v12, %v6502_v57  ;;  %v6548_v49 = vpop.f32.mrf.mxu1  ;;  %v11682_v12 = vld [vmem:[#allocation16 + $0x52c] ss:$12 sps:$4 sm:$0xff]   ;;  %v6811_v13 = vmax.f32 %v6457_v2, 0.0  ;;  %v11686_v57 = vld [vmem:[#allocation16 + $0x510] ss:$12 sps:$4 sm:$0xff]  }
0x1608   :  { %v6505_v39 = vpop.f32.mrf.mxu0  ;;  %8872 = vmatprep.subr.bf16.mxu0 %v11649_v19  ;;  %v11688_v19 = vld [vmem:[#allocation16 + $0x514] ss:$12 sps:$4 sm:$0xff]  }
0x1609   :  { %v6506_v45 = vadd.f32 %v6505_v39, %v4816_v61  ;;  %v6814_v29 = vmax.f32 %v6545_v44, 0.0  ;;  %v6823_v61 = vmax.f32 %v6461_v11, 0.0  ;;  %v11692_v39 = vld [vmem:[#allocation16 + $0x4f8] ss:$12 sps:$4 sm:$0xff]  }
0x160a   :  { %8846 = vmatpush2.bf16.msra.mxu1 %v11644_v4  ;;  %v11689_v4 = vld [vmem:[#allocation16 + $0x450] ss:$12 sps:$4 sm:$0xff]  }
0x160b   :  { %v6549_v22 = vadd.f32 %v6548_v49, %v6506_v45  ;;  %8873 = vmatpush1.bf16.msra.mxu0 %v11647_v47  ;;  %8847 = vmatprep.subr.bf16.mxu1 %v11652_v20  ;;  %v13049_v36 = vpack.c.bf16 %v6823_v61, %v6811_v13  ;;  %v11694_v47 = vld [vmem:[#allocation16 + $0x4fc] ss:$12 sps:$4 sm:$0xff]   ;;  %v11700_v44 = vld [vmem:[#allocation16 + $0x4e4] ss:$12 sps:$4 sm:$0xff]   ;;  %v11698_v49 = vld [vmem:[#allocation16 + $0x4e0] ss:$12 sps:$4 sm:$0xff]  }
0x160c   :  { %8874 = vmatprep.subr.bf16.mxu0 %v11655_v31  ;;  %v11697_v20 = vld [vmem:[#allocation16 + $0x43c] ss:$12 sps:$4 sm:$0xff]   ;;  %v11695_v31 = vld [vmem:[#allocation16 + $0x438] ss:$12 sps:$4 sm:$0xff]  }
0x160d   :  { %v6826_v33 = vmax.f32 %v6549_v22, 0.0  ;;  %v11703_v45 = vld [vmem:[#allocation16 + $0x424] ss:$12 sps:$4 sm:$0xff]   ;;  %v11706_v22 = vld [vmem:[#allocation16 + $0x4cc] ss:$12 sps:$4 sm:$0xff]  }
0x160e   :  { %8848 = vmatpush2.bf16.msra.mxu1 %v11650_v46  ;;  %v11701_v46 = vld [vmem:[#allocation16 + $0x420] ss:$12 sps:$4 sm:$0xff]   ;;  %v11727_v11 = vld [vmem:[#allocation16 + $0x3c4] ss:$12 sps:$4 sm:$0xff]  }
0x160f   :  { %8875 = vmatpush1.bf16.msra.mxu0 %v11653_v7  ;;  %8849 = vmatprep.subr.bf16.mxu1 %v11658_v48  ;;  %v13040_v6 = vpack.c.bf16 %v6826_v33, %v6814_v29  ;;  %v11709_v7 = vld [vmem:[#allocation16 + $0x40c] ss:$12 sps:$4 sm:$0xff]   ;;  %v4811_v48 = vsub.s32 4, %v12383_v24  ;;  %v11707_v29 = vld [vmem:[#allocation16 + $0x408] ss:$12 sps:$4 sm:$0xff]  }
0x1610   :  { %8876 = vmatprep.subr.bf16.mxu0 %v11661_v17  ;;  %v11704_v17 = vld [vmem:[#allocation16 + $0x4c8] ss:$12 sps:$4 sm:$0xff]  }
0x1611   :  { %8900 = vmatprep.mubr.bf16.mxu0 %v13040_v6  ;;  %v11712_v33 = vld [vmem:[#allocation16 + $0x4b4] ss:$12 sps:$4 sm:$0xff]  }
0x1612   :  { %8850 = vmatpush2.bf16.msra.mxu1 %v11656_v14  ;;  %v11715_v14 = vld [vmem:[#allocation16 + $0x3f4] ss:$12 sps:$4 sm:$0xff]  }
0x1613   :  { %8877 = vmatpush1.bf16.msra.mxu0 %v11659_v3  ;;  %8851 = vmatprep.subr.bf16.mxu1 %v11664_v51  ;;  %v4812_v3 = vrot.slane %v12997_v43, %v4811_v48  ;;  %v11710_v51 = vld [vmem:[#allocation16 + $0x4b0] ss:$12 sps:$4 sm:$0xff]  }
0x1614   :  { %8878 = vmatprep.subr.bf16.mxu0 %v11667_v15  ;;  %v11713_v15 = vld [vmem:[#allocation16 + $0x3f0] ss:$12 sps:$4 sm:$0xff]  }
0x1616   :  { %8852 = vmatpush2.bf16.msra.mxu1 %v11662_v9  ;;  %v6504_v9 = vadd.f32 %v13038_v16, %v4812_v3  ;;  %v11725_v16 = vld [vmem:[#allocation16 + $0x3c0] ss:$12 sps:$4 sm:$0xff]  }
0x1617   :  { %8879 = vmatpush1.bf16.msra.mxu0 %v11665_v10  ;;  %8853 = vmatprep.subr.bf16.mxu1 %v11670_v1  ;;  %v6500_v10 = vadd.f32 %v13033_v41, %v4812_v3  ;;  %v11716_v1 = vld [vmem:[#allocation16 + $0x498] ss:$12 sps:$4 sm:$0xff]   ;;  %v11749_v3 = vld [vmem:[#allocation16 + $0x660] ss:$12 sps:$4 sm:$0xff]  }
0x1618   :  { %8880 = vmatprep.subr.bf16.mxu0 %v11673_v38  ;;  %v11719_v38 = vld [vmem:[#allocation16 + $0x3d8] ss:$12 sps:$4 sm:$0xff]  }
0x1619   :  { %v11733_v41 = vld [vmem:[#allocation16 + $0x6ac] ss:$12 sps:$4 sm:$0xff]  }
0x161a   :  { %8854 = vmatpush2.bf16.msra.mxu1 %v11668_v8  ;;  %v6547_v8 = vadd.f32 %v13036_v42, %v6504_v9  ;;  %v11728_v42 = vld [vmem:[#allocation16 + $0x5e8] ss:$12 sps:$4 sm:$0xff]   ;;  %v11757_v9 = vld [vmem:[#allocation16 + $0x64c] ss:$12 sps:$4 sm:$0xff]  }
0x161b   :  { %8881 = vmatpush1.bf16.msra.mxu0 %v11671_v50  ;;  %8855 = vmatprep.subr.bf16.mxu1 %v11676_v54  ;;  %v6543_v50 = vadd.f32 %v13030_v60, %v6500_v10  ;;  %v11722_v54 = vld [vmem:[#allocation16 + $0x480] ss:$12 sps:$4 sm:$0xff]  }
0x161c   :  { %8882 = vmatprep.subr.bf16.mxu0 %v11679_v40  ;;  %v11730_v40 = vld [vmem:[#allocation16 + $0x5ec] ss:$12 sps:$4 sm:$0xff]   ;;  %v6825_v2 = vmax.f32 %v6547_v8, 0.0  ;;  %v11736_v60 = vld [vmem:[#allocation16 + $0x5d4] ss:$12 sps:$4 sm:$0xff]  }
0x161d   :  { %v11763_v8 = vld [vmem:[#allocation16 + $0x634] ss:$12 sps:$4 sm:$0xff]  }
0x161e   :  { %8856 = vmatpush2.bf16.msra.mxu1 %v11674_v59  ;;  %v4823_v59 = vsub.s32 7, %v12383_v24 }
0x161f   :  { %8883 = vmatpush1.bf16.msra.mxu0 %v11677_v23  ;;  %8911 = vmatprep.subr.bf16.mxu1 %v11682_v12  ;;  %v6813_v23 = vmax.f32 %v6543_v50, 0.0  ;;  %v11731_v12 = vld [vmem:[#allocation16 + $0x6a8] ss:$12 sps:$4 sm:$0xff]   ;;  %v11758_v50 = vld [vmem:[#allocation16 + $0x570] ss:$12 sps:$4 sm:$0xff]  }
0x1620   :  { %8884 = vmatprep.subr.bf16.mxu0 %v11685_v18  ;;  %v4824_v13 = vrot.slane %v12997_v43, %v4823_v59  ;;  %v11764_v59 = vld [vmem:[#allocation16 + $0x558] ss:$12 sps:$4 sm:$0xff]  }
0x1621   :  { %8858 = vmatmul.mubr.bf16.vlgmr.msra.gmra.mxu1 %v13049_v36  ;;  %v13061_v18 = vpack.c.bf16 %v6825_v2, %v6813_v23  ;;  %v11769_v2 = vld [vmem:[#allocation16 + $0x61c] ss:$12 sps:$4 sm:$0xff]  }
0x1622   :  { %8912 = vmatpush1.bf16.msra.mxu1 %v11680_v52  ;;  %v13059_v61 = vpop.f32.mrf.mxu0  ;;  %v11739_v52 = vld [vmem:[#allocation16 + $0x694] ss:$12 sps:$4 sm:$0xff]  }
0x1623   :  { %8885 = vmatpush2.bf16.msra.mxu0 %v11683_v27  ;;  %8913 = vmatprep.subr.bf16.mxu1 %v11688_v19 }
0x1624   :  { %8886 = vmatprep.subr.bf16.mxu0 %v11691_v55  ;;  %v6630_v27 = vpop.f32.mrf.mxu0  ;;  %v11734_v55 = vld [vmem:[#allocation16 + $0x5d0] ss:$12 sps:$4 sm:$0xff]  }
0x1626   :  { %8914 = vmatpush1.bf16.msra.mxu1 %v11686_v57 }
0x1627   :  { %8887 = vmatpush2.bf16.msra.mxu0 %v11689_v4  ;;  %8915 = vmatprep.subr.bf16.mxu1 %v11694_v47  ;;  %v11737_v4 = vld [vmem:[#allocation16 + $0x690] ss:$12 sps:$4 sm:$0xff]  }
0x1628   :  { %8888 = vmatprep.subr.bf16.mxu0 %v11697_v20  ;;  %v11742_v47 = vld [vmem:[#allocation16 + $0x5bc] ss:$12 sps:$4 sm:$0xff]  }
0x162a   :  { %8916 = vmatpush1.bf16.msra.mxu1 %v11692_v39  ;;  %v11745_v39 = vld [vmem:[#allocation16 + $0x67c] ss:$12 sps:$4 sm:$0xff]  }
0x162b   :  { %8889 = vmatpush2.bf16.msra.mxu0 %v11695_v31  ;;  %8917 = vmatprep.subr.bf16.mxu1 %v11700_v44  ;;  %v6632_v31 = vpop.f32.mrf.mxu0 }
0x162c   :  { %8890 = vmatprep.subr.bf16.mxu0 %v11703_v45  ;;  %v11740_v45 = vld [vmem:[#allocation16 + $0x5b8] ss:$12 sps:$4 sm:$0xff]  }
0x162e   :  { %8918 = vmatpush1.bf16.msra.mxu1 %v11698_v49 }
0x162f   :  { %8891 = vmatpush2.bf16.msra.mxu0 %v11701_v46  ;;  %8919 = vmatprep.subr.bf16.mxu1 %v11706_v22  ;;  %v11743_v46 = vld [vmem:[#allocation16 + $0x678] ss:$12 sps:$4 sm:$0xff]  }
0x1630   :  { %8892 = vmatprep.subr.bf16.mxu0 %v11709_v7  ;;  %v11748_v22 = vld [vmem:[#allocation16 + $0x5a4] ss:$12 sps:$4 sm:$0xff]  }
0x1632   :  { %8920 = vmatpush1.bf16.msra.mxu1 %v11704_v17  ;;  %v11751_v17 = vld [vmem:[#allocation16 + $0x664] ss:$12 sps:$4 sm:$0xff]  }
0x1633   :  { %8893 = vmatpush2.bf16.msra.mxu0 %v11707_v29  ;;  %8921 = vmatprep.subr.bf16.mxu1 %v11712_v33  ;;  %v6634_v29 = vpop.f32.mrf.mxu0 }
0x1634   :  { %8894 = vmatprep.subr.bf16.mxu0 %v11715_v14  ;;  %v11746_v14 = vld [vmem:[#allocation16 + $0x5a0] ss:$12 sps:$4 sm:$0xff]  }
0x1636   :  { %8922 = vmatpush1.bf16.msra.mxu1 %v11710_v51  ;;  %v11754_v51 = vld [vmem:[#allocation16 + $0x58c] ss:$12 sps:$4 sm:$0xff]  }
0x1637   :  { %8895 = vmatpush2.bf16.msra.mxu0 %v11713_v15  ;;  %8923 = vmatprep.subr.bf16.mxu1 %v11718_v21 }
0x1638   :  { %8896 = vmatprep.subr.bf16.mxu0 %v11721_v30  ;;  %v4819_v30 = vsub.s32 6, %v12383_v24 }
0x163a   :  { %8924 = vmatpush1.bf16.msra.mxu1 %v11716_v1  ;;  %v11752_v1 = vld [vmem:[#allocation16 + $0x588] ss:$12 sps:$4 sm:$0xff]  }
0x163b   :  { %8897 = vmatpush2.bf16.msra.mxu0 %v11719_v38  ;;  %8925 = vmatprep.subr.bf16.mxu1 %v11724_v5  ;;  %v11755_v38 = vld [vmem:[#allocation16 + $0x648] ss:$12 sps:$4 sm:$0xff]  }
0x163c   :  { %8898 = vmatprep.subr.bf16.mxu0 %v11727_v11  ;;  %v11760_v5 = vld [vmem:[#allocation16 + $0x574] ss:$12 sps:$4 sm:$0xff]   ;;  %v4820_v11 = vrot.slane %v12997_v43, %v4819_v30  ;;  %v11787_v30 = vld [vmem:[#allocation16 + $0x724] ss:$12 sps:$4 sm:$0xff]  }
0x163e   :  { %8926 = vmatpush1.bf16.msra.mxu1 %v11722_v54 }
0x163f   :  { %8899 = vmatpush2.bf16.msra.mxu0 %v11725_v16  ;;  %8927 = vmatprep.subr.bf16.mxu1 %v11730_v40  ;;  %v11761_v16 = vld [vmem:[#allocation16 + $0x630] ss:$12 sps:$4 sm:$0xff]  }
0x1640   :  { %8954 = vmatprep.subr.bf16.mxu0 %v11733_v41  ;;  %v11766_v40 = vld [vmem:[#allocation16 + $0x55c] ss:$12 sps:$4 sm:$0xff]  }
0x1641   :  { %v6585_v19 = vpop.f32.mrf.mxu1 }
0x1642   :  { %8901 = vmatmul.mubr.bf16.vlgmr.msra.gmra.mxu0 %v13061_v18  ;;  %8928 = vmatpush2.bf16.msra.mxu1 %v11728_v42  ;;  %v6586_v41 = vadd.f32 %v6585_v19, %v4820_v11  ;;  %v11767_v42 = vld [vmem:[#allocation16 + $0x618] ss:$12 sps:$4 sm:$0xff]  }
0x1643   :  { %v6587_v57 = vpop.f32.mrf.mxu1  ;;  %8955 = vmatpush1.bf16.msra.mxu0 %v11731_v12  ;;  %8929 = vmatprep.subr.bf16.mxu1 %v11736_v60  ;;  %v11772_v12 = vld [vmem:[#allocation16 + $0x544] ss:$12 sps:$4 sm:$0xff]   ;;  %v11778_v19 = vld [vmem:[#allocation16 + $0x76c] ss:$12 sps:$4 sm:$0xff]  }
0x1644   :  { %v6588_v20 = vadd.f32 %v6587_v57, %v4824_v13  ;;  %8956 = vmatprep.subr.bf16.mxu0 %v11739_v52  ;;  %v11775_v60 = vld [vmem:[#allocation16 + $0x604] ss:$12 sps:$4 sm:$0xff]   ;;  %v6629_v43 = vadd.f32 %v13059_v61, %v6586_v41  ;;  %v11781_v61 = vld [vmem:[#allocation16 + $0x754] ss:$12 sps:$4 sm:$0xff]  }
0x1645   :  { %v6589_v44 = vpop.f32.mrf.mxu1  ;;  %v11812_v41 = vld [vmem:[#allocation16 + $0x7c8] ss:$12 sps:$4 sm:$0xff]  }
0x1646   :  { %8930 = vmatpush2.bf16.msra.mxu1 %v11734_v55  ;;  %v6631_v7 = vadd.f32 %v6630_v27, %v6588_v20  ;;  %v6590_v54 = vadd.f32 %v6589_v44, %v4820_v11  ;;  %v11773_v27 = vld [vmem:[#allocation16 + $0x600] ss:$12 sps:$4 sm:$0xff]   ;;  %v6815_v57 = vmax.f32 %v6629_v43, 0.0  ;;  %v11776_v20 = vld [vmem:[#allocation16 + $0x768] ss:$12 sps:$4 sm:$0xff]  }
0x1647   :  { %v6591_v49 = vpop.f32.mrf.mxu1  ;;  %8957 = vmatpush1.bf16.msra.mxu0 %v11737_v4  ;;  %8931 = vmatprep.subr.bf16.mxu1 %v11742_v47  ;;  %v11790_v55 = vld [vmem:[#allocation16 + $0x82c] ss:$12 sps:$4 sm:$0xff]   ;;  %v11788_v4 = vld [vmem:[#allocation16 + $0x828] ss:$12 sps:$4 sm:$0xff]   ;;  %v11817_v43 = vld [vmem:[#allocation16 + $0x7b0] ss:$12 sps:$4 sm:$0xff]  }
0x1648   :  { %v6592_v48 = vadd.f32 %v6591_v49, %v4824_v13  ;;  %8958 = vmatprep.subr.bf16.mxu0 %v11745_v39  ;;  %v6816_v15 = vmax.f32 %v6631_v7, 0.0  ;;  %v6633_v23 = vadd.f32 %v6632_v31, %v6590_v54  ;;  %v11770_v13 = vld [vmem:[#allocation16 + $0x540] ss:$12 sps:$4 sm:$0xff]   ;;  %v13073_v31 = vld [vmem:[#allocation14 + $0x8] sm:$0xf] }
0x1649   :  { %v11796_v39 = vld [vmem:[#allocation16 + $0x814] ss:$12 sps:$4 sm:$0xff]   ;;  %v11779_v7 = vld [vmem:[#allocation16 + $0x750] ss:$12 sps:$4 sm:$0xff]   ;;  %v11814_v54 = vld [vmem:[#allocation16 + $0x7cc] ss:$12 sps:$4 sm:$0xff]  }
0x164a   :  { %v6635_v33 = vadd.f32 %v6634_v29, %v6592_v48  ;;  %8932 = vmatpush2.bf16.msra.mxu1 %v11740_v45  ;;  %v6827_v52 = vmax.f32 %v6633_v23, 0.0  ;;  %v4832_v45 = vrot.slane %v13073_v31, %v12386_v25  ;;  %v11802_v48 = vld [vmem:[#allocation16 + $0x7fc] ss:$12 sps:$4 sm:$0xff]  }
0x164b   :  { %8959 = vmatpush1.bf16.msra.mxu0 %v11743_v46  ;;  %8933 = vmatprep.subr.bf16.mxu1 %v11748_v22  ;;  %v11794_v46 = vld [vmem:[#allocation16 + $0x810] ss:$12 sps:$4 sm:$0xff]   ;;  %v11791_v23 = vld [vmem:[#allocation16 + $0x708] ss:$12 sps:$4 sm:$0xff]  }
0x164c   :  { %v6828_v21 = vmax.f32 %v6635_v33, 0.0  ;;  %8960 = vmatprep.subr.bf16.mxu0 %v11751_v17  ;;  %v13071_v47 = vpack.c.bf16 %v6827_v52, %v6815_v57  ;;  %v11784_v29 = vld [vmem:[#allocation16 + $0x73c] ss:$12 sps:$4 sm:$0xff]   ;;  %v11822_v57 = vld [vmem:[#allocation16 + $0x798] ss:$12 sps:$4 sm:$0xff]  }
0x164d   :  { %v11824_v52 = vld [vmem:[#allocation16 + $0x79c] ss:$12 sps:$4 sm:$0xff]  }
0x164e   :  { %8934 = vmatpush2.bf16.msra.mxu1 %v11746_v14  ;;  %v13066_v10 = vpack.c.bf16 %v6828_v21, %v6816_v15  ;;  %v11782_v15 = vld [vmem:[#allocation16 + $0x738] ss:$12 sps:$4 sm:$0xff]  }
0x164f   :  { %8961 = vmatpush1.bf16.msra.mxu0 %v11749_v3  ;;  %8935 = vmatprep.subr.bf16.mxu1 %v11754_v51  ;;  %v11800_v51 = vld [vmem:[#allocation16 + $0x7f8] ss:$12 sps:$4 sm:$0xff]  }
0x1650   :  { %8943 = vmatprep.mubr.bf16.mxu1 %v13066_v10  ;;  %8962 = vmatprep.subr.bf16.mxu0 %v11757_v9  ;;  %v11808_v21 = vld [vmem:[#allocation16 + $0x7e4] ss:$12 sps:$4 sm:$0xff]  }
0x1652   :  { %8936 = vmatpush2.bf16.msra.mxu1 %v11752_v1 }
0x1653   :  { %8963 = vmatpush1.bf16.msra.mxu0 %v11755_v38  ;;  %8937 = vmatprep.subr.bf16.mxu1 %v11760_v5 }
0x1654   :  { %8964 = vmatprep.subr.bf16.mxu0 %v11763_v8  ;;  %v11806_v8 = vld [vmem:[#allocation16 + $0x7e0] ss:$12 sps:$4 sm:$0xff]  }
0x1656   :  { %8938 = vmatpush2.bf16.msra.mxu1 %v11758_v50  ;;  %v11785_v50 = vld [vmem:[#allocation16 + $0x720] ss:$12 sps:$4 sm:$0xff]  }
0x1657   :  { %8965 = vmatpush1.bf16.msra.mxu0 %v11761_v16  ;;  %8939 = vmatprep.subr.bf16.mxu1 %v11766_v40  ;;  %v11793_v16 = vld [vmem:[#allocation16 + $0x70c] ss:$12 sps:$4 sm:$0xff]  }
0x1658   :  { %8966 = vmatprep.subr.bf16.mxu0 %v11769_v2 }
0x165a   :  { %8940 = vmatpush2.bf16.msra.mxu1 %v11764_v59 }
0x165b   :  { %8967 = vmatpush1.bf16.msra.mxu0 %v11767_v42  ;;  %8941 = vmatprep.subr.bf16.mxu1 %v11772_v12  ;;  %v11819_v42 = vld [vmem:[#allocation16 + $0x7b4] ss:$12 sps:$4 sm:$0xff]  }
0x165c   :  { %8968 = vmatprep.subr.bf16.mxu0 %v11775_v60  ;;  %v11799_v12 = vld [vmem:[#allocation16 + $0x6f4] ss:$12 sps:$4 sm:$0xff]   ;;  %v4828_v60 = vrot.slane %v13073_v31, %v12392_v28 }
0x165e   :  { %8942 = vmatpush2.bf16.msra.mxu1 %v11770_v13  ;;  %v11797_v13 = vld [vmem:[#allocation16 + $0x6f0] ss:$12 sps:$4 sm:$0xff]  }
0x165f   :  { %8969 = vmatpush1.bf16.msra.mxu0 %v11773_v27  ;;  %8997 = vmatprep.subr.bf16.mxu1 %v11790_v55  ;;  %v11805_v55 = vld [vmem:[#allocation16 + $0x6dc] ss:$12 sps:$4 sm:$0xff]  }
0x1660   :  { %8970 = vmatprep.subr.bf16.mxu0 %v11778_v19 }
0x1661   :  { %v13075_v44 = vpop.f32.mrf.mxu1  ;;  %8944 = vmatmul.mubr.bf16.vlgmr.msra.gmra.mxu1 %v13071_v47 }
0x1662   :  { %v6671_v49 = vpop.f32.mrf.mxu0  ;;  %8998 = vmatpush1.bf16.msra.mxu1 %v11788_v4  ;;  %v11803_v4 = vld [vmem:[#allocation16 + $0x6d8] ss:$12 sps:$4 sm:$0xff]  }
0x1663   :  { %v6716_v22 = vpop.f32.mrf.mxu1  ;;  %8971 = vmatpush2.bf16.msra.mxu0 %v11776_v20  ;;  %8999 = vmatprep.subr.bf16.mxu1 %v11796_v39  ;;  %v6672_v19 = vadd.f32 %v6671_v49, %v4828_v60  ;;  %v11829_v20 = vld [vmem:[#allocation16 + $0x784] ss:$12 sps:$4 sm:$0xff]  }
0x1664   :  { %v6673_v17 = vpop.f32.mrf.mxu0  ;;  %8972 = vmatprep.subr.bf16.mxu0 %v11781_v61  ;;  %v11811_v61 = vld [vmem:[#allocation16 + $0x6c4] ss:$12 sps:$4 sm:$0xff]  }
0x1665   :  { %v6674_v33 = vadd.f32 %v6673_v17, %v4832_v45  ;;  %v6718_v14 = vpop.f32.mrf.mxu1  ;;  %v11815_v49 = vld [vmem:[#allocation16 + $0x170] ss:$12 sps:$4 sm:$0xff]  }
0x1666   :  { %v6675_v3 = vpop.f32.mrf.mxu0  ;;  %9000 = vmatpush1.bf16.msra.mxu1 %v11794_v46  ;;  %v11827_v46 = vld [vmem:[#allocation16 + $0x780] ss:$12 sps:$4 sm:$0xff]  }
0x1667   :  { %8973 = vmatpush2.bf16.msra.mxu0 %v11779_v7  ;;  %9001 = vmatprep.subr.bf16.mxu1 %v11802_v48  ;;  %v6717_v1 = vadd.f32 %v6716_v22, %v6674_v33  ;;  %v6720_v5 = vpop.f32.mrf.mxu1  ;;  %v6676_v27 = vadd.f32 %v6675_v3, %v4828_v60  ;;  %v11809_v22 = vld [vmem:[#allocation16 + $0x6c0] ss:$12 sps:$4 sm:$0xff]   ;;  %v11816_v33 = vld [vmem:[#allocation16 + $0xb0] ss:$12 sps:$4 sm:$0xff]   ;;  %v11820_v3 = vld [vmem:[#allocation16 + $0x158] ss:$12 sps:$4 sm:$0xff]  }
0x1668   :  { %v6677_v9 = vpop.f32.mrf.mxu0  ;;  %8974 = vmatprep.subr.bf16.mxu0 %v11784_v29  ;;  %v11834_v7 = vld [vmem:[#allocation16 + $0x8ec] ss:$12 sps:$4 sm:$0xff]   ;;  %v11832_v29 = vld [vmem:[#allocation16 + $0x8e8] ss:$12 sps:$4 sm:$0xff]  }
0x1669   :  { %v6678_v38 = vadd.f32 %v6677_v9, %v4832_v45  ;;  %v6818_v40 = vmax.f32 %v6717_v1, 0.0  ;;  %v6719_v39 = vadd.f32 %v6718_v14, %v6676_v27  ;;  %v6715_v45 = vadd.f32 %v13075_v44, %v6672_v19  ;;  %v11839_v44 = vld [vmem:[#allocation16 + $0x8d4] ss:$12 sps:$4 sm:$0xff]   ;;  %v11862_v60 = vld [vmem:[#allocation16 + $0x858] ss:$12 sps:$4 sm:$0xff]  }
0x166a   :  { %9002 = vmatpush1.bf16.msra.mxu1 %v11800_v51  ;;  %v11837_v51 = vld [vmem:[#allocation16 + $0x8d0] ss:$12 sps:$4 sm:$0xff]   ;;  %v11825_v9 = vld [vmem:[#allocation16 + $0x140] ss:$12 sps:$4 sm:$0xff]  }
0x166b   :  { %v6721_v11 = vadd.f32 %v6720_v5, %v6678_v38  ;;  %8975 = vmatpush2.bf16.msra.mxu0 %v11782_v15  ;;  %9003 = vmatprep.subr.bf16.mxu1 %v11808_v21  ;;  %v6829_v48 = vmax.f32 %v6719_v39, 0.0  ;;  %v6817_v17 = vmax.f32 %v6715_v45, 0.0  ;;  %v11821_v15 = vld [vmem:[#allocation16 + $0x98] ss:$12 sps:$4 sm:$0xff]   ;;  %v11844_v21 = vld [vmem:[#allocation16 + $0x8bc] ss:$12 sps:$4 sm:$0xff]   ;;  %v4840_v39 = vrot.slane %v13073_v31, %v4807_v58 }
0x166c   :  { %8976 = vmatprep.subr.bf16.mxu0 %v11787_v30  ;;  %v11842_v30 = vld [vmem:[#allocation16 + $0x8b8] ss:$12 sps:$4 sm:$0xff]   ;;  %v11826_v1 = vld [vmem:[#allocation16 + $0x80] ss:$12 sps:$4 sm:$0xff]   ;;  %v11830_v5 = vld [vmem:[#allocation16 + $0x128] ss:$12 sps:$4 sm:$0xff]  }
0x166d   :  { %v6830_v2 = vmax.f32 %v6721_v11, 0.0  ;;  %v13086_v14 = vpack.c.bf16 %v6829_v48, %v6817_v17  ;;  %v11849_v38 = vld [vmem:[#allocation16 + $0x8a4] ss:$12 sps:$4 sm:$0xff]   ;;  %v11831_v11 = vld [vmem:[#allocation16 + $0x68] ss:$12 sps:$4 sm:$0xff]  }
0x166e   :  { %9004 = vmatpush1.bf16.msra.mxu1 %v11806_v8  ;;  %v11847_v8 = vld [vmem:[#allocation16 + $0x8a0] ss:$12 sps:$4 sm:$0xff]   ;;  %v11872_v19 = vld [vmem:[#allocation16 + $0x2f0] ss:$12 sps:$4 sm:$0xff]   ;;  %v11861_v48 = vld [vmem:[#allocation16 + $0x398] ss:$12 sps:$4 sm:$0xff]  }
0x166f   :  { %8977 = vmatpush2.bf16.msra.mxu0 %v11785_v50  ;;  %v13080_v59 = vpack.c.bf16 %v6830_v2, %v6818_v40  ;;  %9005 = vmatprep.subr.bf16.mxu1 %v11814_v54  ;;  %v11854_v50 = vld [vmem:[#allocation16 + $0x88c] ss:$12 sps:$4 sm:$0xff]   ;;  %v11852_v54 = vld [vmem:[#allocation16 + $0x888] ss:$12 sps:$4 sm:$0xff]  }
0x1670   :  { %8978 = vmatprep.subr.bf16.mxu0 %v11793_v16  ;;  %v11836_v16 = vld [vmem:[#allocation16 + $0x50] ss:$12 sps:$4 sm:$0xff]   ;;  %v11859_v40 = vld [vmem:[#allocation16 + $0x874] ss:$12 sps:$4 sm:$0xff]   ;;  %v11840_v2 = vld [vmem:[#allocation16 + $0xf8] ss:$12 sps:$4 sm:$0xff]  }
0x1671   :  { %8986 = vmatprep.mubr.bf16.mxu0 %v13080_v59  ;;  %v11867_v27 = vld [vmem:[#allocation16 + $0x840] ss:$12 sps:$4 sm:$0xff]  }
0x1672   :  { %9006 = vmatpush1.bf16.msra.mxu1 %v11812_v41  ;;  %v11857_v41 = vld [vmem:[#allocation16 + $0x870] ss:$12 sps:$4 sm:$0xff]   ;;  %v11865_v17 = vld [vmem:[#allocation16 + $0x440] ss:$12 sps:$4 sm:$0xff]  }
0x1673   :  { %8979 = vmatpush2.bf16.msra.mxu0 %v11791_v23  ;;  %9007 = vmatprep.subr.bf16.mxu1 %v11819_v42  ;;  %v11841_v23 = vld [vmem:[#allocation16 + $0x38] ss:$12 sps:$4 sm:$0xff]   ;;  %v11864_v42 = vld [vmem:[#allocation16 + $0x85c] ss:$12 sps:$4 sm:$0xff]  }
0x1674   :  { %8980 = vmatprep.subr.bf16.mxu0 %v11799_v12  ;;  %v11845_v12 = vld [vmem:[#allocation16 + $0xe0] ss:$12 sps:$4 sm:$0xff]  }
0x1676   :  { %9008 = vmatpush1.bf16.msra.mxu1 %v11817_v43  ;;  %v11846_v43 = vld [vmem:[#allocation16 + $0x20] ss:$12 sps:$4 sm:$0xff]  }
0x1677   :  { %8981 = vmatpush2.bf16.msra.mxu0 %v11797_v13  ;;  %9009 = vmatprep.subr.bf16.mxu1 %v11824_v52  ;;  %v11869_v13 = vld [vmem:[#allocation16 + $0x844] ss:$12 sps:$4 sm:$0xff]   ;;  %v11850_v52 = vld [vmem:[#allocation16 + $0xc8] ss:$12 sps:$4 sm:$0xff]  }
0x1678   :  { %8982 = vmatprep.subr.bf16.mxu0 %v11805_v55  ;;  %v11851_v55 = vld [vmem:[#allocation16 + $0x8] ss:$12 sps:$4 sm:$0xff]  }
0x167a   :  { %9010 = vmatpush1.bf16.msra.mxu1 %v11822_v57  ;;  %v11855_v57 = vld [vmem:[#allocation16 + $0x470] ss:$12 sps:$4 sm:$0xff]  }
0x167b   :  { %8983 = vmatpush2.bf16.msra.mxu0 %v11803_v4  ;;  %9011 = vmatprep.subr.bf16.mxu1 %v11829_v20  ;;  %v11856_v20 = vld [vmem:[#allocation16 + $0x3b0] ss:$12 sps:$4 sm:$0xff]  }
0x167c   :  { %8984 = vmatprep.subr.bf16.mxu0 %v11811_v61  ;;  %v11860_v61 = vld [vmem:[#allocation16 + $0x458] ss:$12 sps:$4 sm:$0xff]  }
0x167e   :  { %9012 = vmatpush1.bf16.msra.mxu1 %v11827_v46  ;;  %v4836_v46 = vrot.slane %v13073_v31, %v12389_v26 }
0x167f   :  { %8985 = vmatpush2.bf16.msra.mxu0 %v11809_v22  ;;  %9013 = vmatprep.subr.bf16.mxu1 %v11834_v7 }
0x1680   :  { %10329 = vmatprep.subr.bf16.mxu0 %v11815_v49 }
0x1682   :  { %8987 = vmatmul.mubr.bf16.vlgmr.msra.gmra.mxu0 %v13086_v14  ;;  %9014 = vmatpush2.bf16.msra.mxu1 %v11832_v29  ;;  %v6800_v4 = vpop.f32.mrf.mxu0 }
0x1683   :  { %10330 = vmatpush3.bf16.msra.mxu0 %v11816_v33  ;;  %9072 = vmatprep.mubr.bf16.mxu0 %v13009_v37  ;;  %v11835_v37 = vld [vmem:[#allocation16 + $0x110] ss:$12 sps:$4 sm:$0xff]  }
0x1684   :  { %10331 = vmatprep.subr.bf16.mxu0 %v11820_v3  ;;  %9015 = vmatprep.subr.bf16.mxu1 %v11839_v44  ;;  %v6802_v45 = vpop.f32.mrf.mxu0  ;;  %v11866_v44 = vld [vmem:[#allocation16 + $0x380] ss:$12 sps:$4 sm:$0xff]  }
0x1686   :  { %9016 = vmatpush2.bf16.msra.mxu1 %v11837_v51  ;;  %v6804_v29 = vpop.f32.mrf.mxu0 }
0x1687   :  { %10332 = vmatpush3.bf16.msra.mxu0 %v11821_v15  ;;  %9017 = vmatprep.subr.bf16.mxu1 %v11844_v21 }
0x1688   :  { %10333 = vmatprep.subr.bf16.mxu0 %v11825_v9  ;;  %v6806_v21 = vpop.f32.mrf.mxu0 }
0x168a   :  { %9018 = vmatpush2.bf16.msra.mxu1 %v11842_v30 }
0x168b   :  { %10334 = vmatpush3.bf16.msra.mxu0 %v11826_v1  ;;  %9019 = vmatprep.subr.bf16.mxu1 %v11849_v38  ;;  %v11871_v1 = vld [vmem:[#allocation16 + $0x368] ss:$12 sps:$4 sm:$0xff]  }
0x168c   :  { %10335 = vmatprep.subr.bf16.mxu0 %v11830_v5 }
0x168e   :  { %9020 = vmatpush2.bf16.msra.mxu1 %v11847_v8  ;;  %v11874_v8 = vld [vmem:[#allocation16 + $0x410] ss:$12 sps:$4 sm:$0xff]  }
0x168f   :  { %10336 = vmatpush3.bf16.msra.mxu0 %v11831_v11  ;;  %9021 = vmatprep.subr.bf16.mxu1 %v11854_v50 }
0x1690   :  { %10337 = vmatprep.subr.bf16.mxu0 %v11835_v37  ;;  %v11873_v37 = vld [vmem:[#allocation16 + $0x230] ss:$12 sps:$4 sm:$0xff]  }
0x1692   :  { %9022 = vmatpush2.bf16.msra.mxu1 %v11852_v54 }
0x1693   :  { %10338 = vmatpush3.bf16.msra.mxu0 %v11836_v16  ;;  %9023 = vmatprep.subr.bf16.mxu1 %v11859_v40  ;;  %v11875_v16 = vld [vmem:[#allocation16 + $0x350] ss:$12 sps:$4 sm:$0xff]   ;;  %v11876_v40 = vld [vmem:[#allocation16 + $0x2d8] ss:$12 sps:$4 sm:$0xff]  }
0x1694   :  { %10339 = vmatprep.subr.bf16.mxu0 %v11840_v2  ;;  %v11878_v2 = vld [vmem:[#allocation16 + $0x3f8] ss:$12 sps:$4 sm:$0xff]  }
0x1696   :  { %9024 = vmatpush2.bf16.msra.mxu1 %v11857_v41  ;;  %v11877_v41 = vld [vmem:[#allocation16 + $0x218] ss:$12 sps:$4 sm:$0xff]  }
0x1697   :  { %10340 = vmatpush3.bf16.msra.mxu0 %v11841_v23  ;;  %9025 = vmatprep.subr.bf16.mxu1 %v11864_v42  ;;  %v11879_v23 = vld [vmem:[#allocation16 + $0x338] ss:$12 sps:$4 sm:$0xff]   ;;  %v11880_v42 = vld [vmem:[#allocation16 + $0x2c0] ss:$12 sps:$4 sm:$0xff]  }
0x1698   :  { %10341 = vmatprep.subr.bf16.mxu0 %v11845_v12  ;;  %v11882_v12 = vld [vmem:[#allocation16 + $0x3e0] ss:$12 sps:$4 sm:$0xff]  }
0x169a   :  { %9026 = vmatpush2.bf16.msra.mxu1 %v11862_v60  ;;  %v11881_v60 = vld [vmem:[#allocation16 + $0x200] ss:$12 sps:$4 sm:$0xff]  }
0x169b   :  { %10342 = vmatpush3.bf16.msra.mxu0 %v11846_v43  ;;  %9027 = vmatprep.subr.bf16.mxu1 %v11869_v13  ;;  %v11883_v43 = vld [vmem:[#allocation16 + $0x320] ss:$12 sps:$4 sm:$0xff]   ;;  %v11884_v13 = vld [vmem:[#allocation16 + $0x2a8] ss:$12 sps:$4 sm:$0xff]  }
0x169c   :  { %10343 = vmatprep.subr.bf16.mxu0 %v11850_v52  ;;  %v11886_v52 = vld [vmem:[#allocation16 + $0x3c8] ss:$12 sps:$4 sm:$0xff]  }
0x169e   :  { %9028 = vmatpush2.bf16.msra.mxu1 %v11867_v27  ;;  %v11885_v27 = vld [vmem:[#allocation16 + $0x1e8] ss:$12 sps:$4 sm:$0xff]  }
0x169f   :  { %10344 = vmatpush3.bf16.msra.mxu0 %v11851_v55  ;;  %10351 = vmatprep.subr.bf16.mxu1 %v11872_v19  ;;  %v11888_v55 = vld [vmem:[#allocation16 + $0x290] ss:$12 sps:$4 sm:$0xff]  }
0x16a0   :  { %10373 = vmatprep.subr.bf16.mxu0 %v11855_v57  ;;  %v11890_v19 = vld [vmem:[#allocation16 + $0x770] ss:$12 sps:$4 sm:$0xff]  }
0x16a1   :  { %v6757_v22 = vpop.f32.mrf.mxu1  ;;  %v11889_v57 = vld [vmem:[#allocation16 + $0x1d0] ss:$12 sps:$4 sm:$0xff]  }
0x16a2   :  { %9073 = vmatmul.mubr.bf16.vlgmr.msra.gmra.mxu0 %v13005_v34  ;;  %v6758_v24 = vadd.f32 %v6757_v22, %v4836_v46  ;;  %v11870_v34 = vld [vmem:[#allocation16 + $0x428] ss:$12 sps:$4 sm:$0xff]   ;;  %v11898_v22 = vld [vmem:[#allocation16 + $0x740] ss:$12 sps:$4 sm:$0xff]  }
0x16a3   :  { %v6759_v7 = vpop.f32.mrf.mxu1  ;;  %10374 = vmatpush3.bf16.msra.mxu0 %v11856_v20  ;;  %9154 = vmatprep.mubr.bf16.mxu0 %v13040_v6  ;;  %v11892_v20 = vld [vmem:[#allocation16 + $0x278] ss:$12 sps:$4 sm:$0xff]  }
0x16a4   :  { %v6760_v49 = vadd.f32 %v6759_v7, %v4840_v39  ;;  %10375 = vmatprep.subr.bf16.mxu0 %v11860_v61  ;;  %v6801_v9 = vadd.f32 %v6800_v4, %v6758_v24  ;;  %v11891_v4 = vld [vmem:[#allocation16 + $0x6b0] ss:$12 sps:$4 sm:$0xff]   ;;  %v11893_v61 = vld [vmem:[#allocation16 + $0x1b8] ss:$12 sps:$4 sm:$0xff]   ;;  %v11897_v7 = vld [vmem:[#allocation16 + $0x1a0] ss:$12 sps:$4 sm:$0xff]  }
0x16a5   :  { %v6761_v33 = vpop.f32.mrf.mxu1  ;;  %v11904_v24 = vld [vmem:[#allocation16 + $0x5f0] ss:$12 sps:$4 sm:$0xff]  }
0x16a6   :  { %v6762_v58 = vadd.f32 %v6761_v33, %v4836_v46  ;;  %v6803_v51 = vadd.f32 %v6802_v45, %v6760_v49  ;;  %v6819_v11 = vmax.f32 %v6801_v9, 0.0  ;;  %v11895_v45 = vld [vmem:[#allocation16 + $0x698] ss:$12 sps:$4 sm:$0xff]   ;;  %v11896_v46 = vld [vmem:[#allocation16 + $0x260] ss:$12 sps:$4 sm:$0xff]  }
0x16a7   :  { %v6763_v3 = vpop.f32.mrf.mxu1  ;;  %10376 = vmatpush3.bf16.msra.mxu0 %v11861_v48  ;;  %v11899_v48 = vld [vmem:[#allocation16 + $0x680] ss:$12 sps:$4 sm:$0xff]   ;;  %v11900_v49 = vld [vmem:[#allocation16 + $0x248] ss:$12 sps:$4 sm:$0xff]   ;;  %v11905_v33 = vld [vmem:[#allocation16 + $0x530] ss:$12 sps:$4 sm:$0xff]  }
0x16a8   :  { %v6805_v31 = vadd.f32 %v6804_v29, %v6762_v58  ;;  %v6764_v15 = vadd.f32 %v6763_v3, %v4840_v39  ;;  %10377 = vmatprep.subr.bf16.mxu0 %v11865_v17  ;;  %v6820_v38 = vmax.f32 %v6803_v51, 0.0  ;;  %v11894_v39 = vld [vmem:[#allocation16 + $0x758] ss:$12 sps:$4 sm:$0xff]   ;;  %v11902_v17 = vld [vmem:[#allocation16 + $0x728] ss:$12 sps:$4 sm:$0xff]  }
0x16a9   :  { %v11901_v29 = vld [vmem:[#allocation16 + $0x188] ss:$12 sps:$4 sm:$0xff]   ;;  %v11907_v58 = vld [vmem:[#allocation16 + $0x650] ss:$12 sps:$4 sm:$0xff]   ;;  %v11908_v3 = vld [vmem:[#allocation16 + $0x5d8] ss:$12 sps:$4 sm:$0xff]  }
0x16aa   :  { %v6807_v30 = vadd.f32 %v6806_v21, %v6764_v15  ;;  %v6831_v6 = vmax.f32 %v6805_v31, 0.0  ;;  %v11909_v51 = vld [vmem:[#allocation16 + $0x518] ss:$12 sps:$4 sm:$0xff]   ;;  %v11912_v15 = vld [vmem:[#allocation16 + $0x5c0] ss:$12 sps:$4 sm:$0xff]  }
0x16ab   :  { %10378 = vmatpush3.bf16.msra.mxu0 %v11866_v44  ;;  %v11910_v44 = vld [vmem:[#allocation16 + $0x6f8] ss:$12 sps:$4 sm:$0xff]   ;;  %v11913_v21 = vld [vmem:[#allocation16 + $0x500] ss:$12 sps:$4 sm:$0xff]  }
0x16ac   :  { %v6832_v5 = vmax.f32 %v6807_v30, 0.0  ;;  %10379 = vmatprep.subr.bf16.mxu0 %v11870_v34  ;;  %v13099_v54 = vpack.c.bf16 %v6831_v6, %v6819_v11  ;;  %v11911_v31 = vld [vmem:[#allocation16 + $0x638] ss:$12 sps:$4 sm:$0xff]   ;;  %v11914_v34 = vld [vmem:[#allocation16 + $0x6e0] ss:$12 sps:$4 sm:$0xff]  }
0x16ad   :  { %v11915_v9 = vld [vmem:[#allocation16 + $0x620] ss:$12 sps:$4 sm:$0xff]   ;;  %v11916_v30 = vld [vmem:[#allocation16 + $0x5a8] ss:$12 sps:$4 sm:$0xff]  }
0x16ae   :  { %v13097_v50 = vpack.c.bf16 %v6832_v5, %v6820_v38  ;;  %v11918_v6 = vld [vmem:[#allocation16 + $0x6c8] ss:$12 sps:$4 sm:$0xff]   ;;  %v11921_v38 = vld [vmem:[#allocation16 + $0x4d0] ss:$12 sps:$4 sm:$0xff]   ;;  %v11922_v5 = vld [vmem:[#allocation16 + $0x578] ss:$12 sps:$4 sm:$0xff]  }
0x16af   :  { %10380 = vmatpush3.bf16.msra.mxu0 %v11871_v1  ;;  %v11920_v1 = vld [vmem:[#allocation16 + $0x590] ss:$12 sps:$4 sm:$0xff]   ;;  %v11924_v11 = vld [vmem:[#allocation16 + $0x560] ss:$12 sps:$4 sm:$0xff]  }
0x16b0   :  { %9029 = vmatprep.mubr.bf16.mxu1 %v13097_v50  ;;  %10381 = vmatprep.subr.bf16.mxu0 %v11874_v8  ;;  %v11923_v8 = vld [vmem:[#allocation16 + $0x4b8] ss:$12 sps:$4 sm:$0xff]  }
0x16b1   :  { %9030 = vmatmul.mubr.bf16.vlgmr.msra.gmra.mxu1 %v13099_v54 }
0x16b2   :  { %10352 = vmatpush3.bf16.msra.mxu1 %v11873_v37  ;;  %9113 = vmatprep.mubr.bf16.mxu1 %v13026_v35  ;;  %v11887_v35 = vld [vmem:[#allocation16 + $0x308] ss:$12 sps:$4 sm:$0xff]   ;;  %v11925_v37 = vld [vmem:[#allocation16 + $0x4a0] ss:$12 sps:$4 sm:$0xff]  }
0x16b3   :  { %10382 = vmatpush3.bf16.msra.mxu0 %v11875_v16  ;;  %10353 = vmatprep.subr.bf16.mxu1 %v11876_v40  ;;  %v11926_v16 = vld [vmem:[#allocation16 + $0x548] ss:$12 sps:$4 sm:$0xff]  }
0x16b4   :  { %10383 = vmatprep.subr.bf16.mxu0 %v11878_v2  ;;  %v11927_v40 = vld [vmem:[#allocation16 + $0x488] ss:$12 sps:$4 sm:$0xff]   ;;  %v11928_v2 = vld [vmem:[#allocation16 + $0x8f0] ss:$12 sps:$4 sm:$0xff]  }
0x16b6   :  { %10354 = vmatpush3.bf16.msra.mxu1 %v11877_v41  ;;  %v11929_v41 = vld [vmem:[#allocation16 + $0x830] ss:$12 sps:$4 sm:$0xff]  }
0x16b7   :  { %10384 = vmatpush3.bf16.msra.mxu0 %v11879_v23  ;;  %10355 = vmatprep.subr.bf16.mxu1 %v11880_v42  ;;  %v11930_v23 = vld [vmem:[#allocation16 + $0x8d8] ss:$12 sps:$4 sm:$0xff]   ;;  %v11932_v42 = vld [vmem:[#allocation16 + $0x8c0] ss:$12 sps:$4 sm:$0xff]  }
0x16b8   :  { %10385 = vmatprep.subr.bf16.mxu0 %v11882_v12  ;;  %v11933_v12 = vld [vmem:[#allocation16 + $0x800] ss:$12 sps:$4 sm:$0xff]  }
0x16ba   :  { %10356 = vmatpush3.bf16.msra.mxu1 %v11881_v60  ;;  %v11934_v60 = vld [vmem:[#allocation16 + $0x8a8] ss:$12 sps:$4 sm:$0xff]  }
0x16bb   :  { %10386 = vmatpush3.bf16.msra.mxu0 %v11883_v43  ;;  %10357 = vmatprep.subr.bf16.mxu1 %v11884_v13  ;;  %v11935_v43 = vld [vmem:[#allocation16 + $0x7e8] ss:$12 sps:$4 sm:$0xff]   ;;  %v11936_v13 = vld [vmem:[#allocation16 + $0x890] ss:$12 sps:$4 sm:$0xff]  }
0x16bc   :  { %10387 = vmatprep.subr.bf16.mxu0 %v11886_v52  ;;  %v11937_v52 = vld [vmem:[#allocation16 + $0x7d0] ss:$12 sps:$4 sm:$0xff]  }
0x16be   :  { %10358 = vmatpush3.bf16.msra.mxu1 %v11885_v27  ;;  %v11938_v27 = vld [vmem:[#allocation16 + $0x878] ss:$12 sps:$4 sm:$0xff]  }
0x16bf   :  { %10388 = vmatpush3.bf16.msra.mxu0 %v11887_v35  ;;  %10359 = vmatprep.subr.bf16.mxu1 %v11888_v55  ;;  %v11940_v35 = vld [vmem:[#allocation16 + $0x860] ss:$12 sps:$4 sm:$0xff]   ;;  %v11942_v55 = vld [vmem:[#allocation16 + $0x848] ss:$12 sps:$4 sm:$0xff]  }
0x16c0   :  { %10417 = vmatprep.subr.bf16.mxu0 %v11890_v19  ;;  %v11943_v19 = vld [vmem:[#allocation16 + $0x788] ss:$12 sps:$4 sm:$0xff]  }
0x16c2   :  { %10360 = vmatpush3.bf16.msra.mxu1 %v11889_v57  ;;  %9155 = vmatmul.mubr.bf16.vlgmr.msra.gmra.mxu0 %v13061_v18  ;;  %v11903_v18 = vld [vmem:[#allocation16 + $0x668] ss:$12 sps:$4 sm:$0xff]   ;;  %v8816_v57 = vpop.f32.mrf.mxu0 }
0x16c3   :  { %10418 = vmatpush3.bf16.msra.mxu0 %v11891_v4  ;;  %9236 = vmatprep.mubr.bf16.mxu0 %v13080_v59  ;;  %v11906_v59 = vld [vmem:[#allocation16 + $0x710] ss:$12 sps:$4 sm:$0xff]  }
0x16c4   :  { %10361 = vmatprep.subr.bf16.mxu1 %v11892_v20  ;;  %10419 = vmatprep.subr.bf16.mxu0 %v11894_v39  ;;  %v8818_v4 = vpop.f32.mrf.mxu0 }
0x16c6   :  { %10362 = vmatpush3.bf16.msra.mxu1 %v11893_v61  ;;  %v8820_v20 = vpop.f32.mrf.mxu0 }
0x16c7   :  { %10420 = vmatpush3.bf16.msra.mxu0 %v11895_v45  ;;  %10363 = vmatprep.subr.bf16.mxu1 %v11896_v46 }
0x16c8   :  { %10421 = vmatprep.subr.bf16.mxu0 %v11898_v22  ;;  %v8822_v61 = vpop.f32.mrf.mxu0 }
0x16ca   :  { %10364 = vmatpush3.bf16.msra.mxu1 %v11897_v7 }
0x16cb   :  { %10422 = vmatpush3.bf16.msra.mxu0 %v11899_v48  ;;  %10365 = vmatprep.subr.bf16.mxu1 %v11900_v49  ;;  %v7229_v48 = vld [vmem:[#allocation17] sm:$0x7] }
0x16cc   :  { %10423 = vmatprep.subr.bf16.mxu0 %v11902_v17 }
0x16ce   :  { %10366 = vmatpush3.bf16.msra.mxu1 %v11901_v29 }
0x16cf   :  { %10424 = vmatpush3.bf16.msra.mxu0 %v11903_v18  ;;  %10395 = vmatprep.subr.bf16.mxu1 %v11904_v24  ;;  %v7234_v18 = vrot.slane %v7229_v48, %v12392_v28 }
0x16d0   :  { %10425 = vmatprep.subr.bf16.mxu0 %v11906_v59  ;;  %v7238_v59 = vrot.slane %v7229_v48, %v12386_v25 }
0x16d1   :  { %9114 = vmatmul.mubr.bf16.vlgmr.msra.gmra.mxu1 %v13049_v36  ;;  %v11917_v36 = vld [vmem:[#allocation16 + $0x4e8] ss:$12 sps:$4 sm:$0xff]  }
0x16d2   :  { %10396 = vmatpush3.bf16.msra.mxu1 %v11905_v33  ;;  %9195 = vmatprep.mubr.bf16.mxu1 %v13066_v10  ;;  %v11919_v10 = vld [vmem:[#allocation16 + $0x608] ss:$12 sps:$4 sm:$0xff]  }
0x16d3   :  { %10426 = vmatpush3.bf16.msra.mxu0 %v11907_v58  ;;  %10397 = vmatprep.subr.bf16.mxu1 %v11908_v3  ;;  %v8817_v58 = vadd.f32 %v8816_v57, %v7234_v18  ;;  %v8819_v3 = vadd.f32 %v8818_v4, %v7238_v59 }
0x16d4   :  { %10427 = vmatprep.subr.bf16.mxu0 %v11910_v44 }
0x16d6   :  { %10398 = vmatpush3.bf16.msra.mxu1 %v11909_v51 }
0x16d7   :  { %10428 = vmatpush3.bf16.msra.mxu0 %v11911_v31  ;;  %10399 = vmatprep.subr.bf16.mxu1 %v11912_v15  ;;  %v8821_v15 = vadd.f32 %v8820_v20, %v7234_v18 }
0x16d8   :  { %10429 = vmatprep.subr.bf16.mxu0 %v11914_v34 }
0x16da   :  { %10400 = vmatpush3.bf16.msra.mxu1 %v11913_v21 }
0x16db   :  { %10430 = vmatpush3.bf16.msra.mxu0 %v11915_v9  ;;  %10401 = vmatprep.subr.bf16.mxu1 %v11916_v30  ;;  %v8823_v9 = vadd.f32 %v8822_v61, %v7238_v59 }
0x16dc   :  { %10431 = vmatprep.subr.bf16.mxu0 %v11918_v6 }
0x16de   :  { %10402 = vmatpush3.bf16.msra.mxu1 %v11917_v36 }
0x16df   :  { %10432 = vmatpush3.bf16.msra.mxu0 %v11919_v10  ;;  %10403 = vmatprep.subr.bf16.mxu1 %v11920_v1 }
0x16e1   :  { %v8859_v39 = vpop.f32.mrf.mxu1 }
0x16e2   :  { %10404 = vmatpush3.bf16.msra.mxu1 %v11921_v38  ;;  %9237 = vmatmul.mubr.bf16.vlgmr.msra.gmra.mxu0 %v13086_v14  ;;  %v11931_v14 = vld [vmem:[#allocation16 + $0x818] ss:$12 sps:$4 sm:$0xff]   ;;  %v8860_v44 = vadd.f32 %v8859_v39, %v8817_v58 }
0x16e3   :  { %10405 = vmatprep.subr.bf16.mxu1 %v11922_v5  ;;  %v8861_v45 = vpop.f32.mrf.mxu1 }
0x16e4   :  { %v8862_v34 = vadd.f32 %v8861_v45, %v8819_v3 }
0x16e5   :  { %v8863_v22 = vpop.f32.mrf.mxu1 }
0x16e6   :  { %10406 = vmatpush3.bf16.msra.mxu1 %v11923_v8  ;;  %v8864_v30 = vadd.f32 %v8863_v22, %v8821_v15 }
0x16e7   :  { %10407 = vmatprep.subr.bf16.mxu1 %v11924_v11  ;;  %v8865_v49 = vpop.f32.mrf.mxu1 }
0x16e8   :  { %v8866_v28 = vadd.f32 %v8865_v49, %v8823_v9 }
0x16ea   :  { %10408 = vmatpush3.bf16.msra.mxu1 %v11925_v37 }
0x16eb   :  { %10409 = vmatprep.subr.bf16.mxu1 %v11926_v16 }
0x16ee   :  { %10410 = vmatpush3.bf16.msra.mxu1 %v11927_v40 }
0x16ef   :  { %10439 = vmatprep.subr.bf16.mxu1 %v11928_v2 }
0x16f1   :  { %9196 = vmatmul.mubr.bf16.vlgmr.msra.gmra.mxu1 %v13071_v47  ;;  %v11939_v47 = vld [vmem:[#allocation16 + $0x7b8] ss:$12 sps:$4 sm:$0xff]  }
0x16f2   :  { %10440 = vmatpush3.bf16.msra.mxu1 %v11929_v41  ;;  %9277 = vmatprep.mubr.bf16.mxu1 %v13097_v50  ;;  %v11941_v50 = vld [vmem:[#allocation16 + $0x7a0] ss:$12 sps:$4 sm:$0xff]  }
0x16f3   :  { %10441 = vmatprep.subr.bf16.mxu1 %v11930_v23 }
0x16f6   :  { %10442 = vmatpush3.bf16.msra.mxu1 %v11931_v14 }
0x16f7   :  { %10443 = vmatprep.subr.bf16.mxu1 %v11932_v42 }
0x16fa   :  { %10444 = vmatpush3.bf16.msra.mxu1 %v11933_v12 }
0x16fb   :  { %10445 = vmatprep.subr.bf16.mxu1 %v11934_v60 }
0x16fe   :  { %10446 = vmatpush3.bf16.msra.mxu1 %v11935_v43 }
0x16ff   :  { %10447 = vmatprep.subr.bf16.mxu1 %v11936_v13 }
0x1702   :  { %10448 = vmatpush3.bf16.msra.mxu1 %v11937_v52  ;;  %v8902_v46 = vpop.f32.mrf.mxu0 }
0x1703   :  { %10449 = vmatprep.subr.bf16.mxu1 %v11938_v27  ;;  %v8903_v21 = vadd.f32 %v8902_v46, %v8860_v44 }
0x1704   :  { %v8904_v7 = vpop.f32.mrf.mxu0 }
0x1705   :  { %v8905_v6 = vadd.f32 %v8904_v7, %v8862_v34  ;;  %v7242_v7 = vrot.slane %v7229_v48, %v12389_v26 }
0x1706   :  { %10450 = vmatpush3.bf16.msra.mxu1 %v11939_v47  ;;  %v8906_v17 = vpop.f32.mrf.mxu0 }
0x1707   :  { %10451 = vmatprep.subr.bf16.mxu1 %v11940_v35  ;;  %v8907_v38 = vadd.f32 %v8906_v17, %v8864_v30 }
0x1708   :  { %v8908_v24 = vpop.f32.mrf.mxu0 }
0x1709   :  { %v8909_v11 = vadd.f32 %v8908_v24, %v8866_v28 }
0x170a   :  { %10452 = vmatpush3.bf16.msra.mxu1 %v11941_v50 }
0x170b   :  { %10453 = vmatprep.subr.bf16.mxu1 %v11942_v55 }
0x170e   :  { %10454 = vmatpush3.bf16.msra.mxu1 %v11943_v19 }
0x1711   :  { %9278 = vmatmul.mubr.bf16.vlgmr.msra.gmra.mxu1 %v13099_v54 }
0x1721   :  { %v8945_v29 = vpop.f32.mrf.mxu1 }
0x1722   :  { %v8946_v36 = vadd.f32 %v8945_v29, %v8903_v21 }
0x1723   :  { %v8947_v33 = vpop.f32.mrf.mxu1 }
0x1724   :  { %v8948_v5 = vadd.f32 %v8947_v33, %v8905_v6 }
0x1725   :  { %v8949_v51 = vpop.f32.mrf.mxu1 }
0x1726   :  { %v8950_v37 = vadd.f32 %v8949_v51, %v8907_v38 }
0x1727   :  { %v8951_v10 = vpop.f32.mrf.mxu1 }
0x1728   :  { %v8952_v23 = vadd.f32 %v8951_v10, %v8909_v11 }
0x1742   :  { %v8988_v54 = vpop.f32.mrf.mxu0 }
0x1743   :  { %v8989_v25 = vadd.f32 %v8988_v54, %v8946_v36 }
0x1744   :  { %v8990_v31 = vpop.f32.mrf.mxu0 }
0x1745   :  { %v8991_v16 = vadd.f32 %v8990_v31, %v8948_v5 }
0x1746   :  { %v8992_v1 = vpop.f32.mrf.mxu0 }
0x1747   :  { %v8993_v14 = vadd.f32 %v8992_v1, %v8950_v37 }
0x1748   :  { %v8994_v2 = vpop.f32.mrf.mxu0 }
0x1749   :  { %v8995_v43 = vadd.f32 %v8994_v2, %v8952_v23 }
0x1762   :  { %v10345_v55 = vpop.f32.mrf.mxu0 }
0x1764   :  { %v10346_v19 = vpop.f32.mrf.mxu0 }
0x1766   :  { %v10348_v57 = vpop.f32.mrf.mxu0 }
0x1768   :  { %v10349_v4 = vpop.f32.mrf.mxu0 }
0x1769   :  { %v10350_v24 = vadd.f32 %v10349_v4, %v10348_v57 }
0x176b   :  { %v9078_v3 = vadd.f32 %v10350_v24, %v7242_v7 }
0x1771   :  { %v9031_v8 = vpop.f32.mrf.mxu1 }
0x1772   :  { %v9032_v40 = vadd.f32 %v9031_v8, %v8989_v25 }
0x1773   :  { %v9033_v41 = vpop.f32.mrf.mxu1 }
0x1774   :  { %v9286_v42 = vadd.f32 %v9032_v40, %v12907_v56  ;;  %v9034_v12 = vadd.f32 %v9033_v41, %v8991_v16 }
0x1775   :  { %v9035_v60 = vpop.f32.mrf.mxu1 }
0x1776   :  { %9292 = vst [vmem:[#allocation19] sm:$0xff] %v9286_v42  ;;  %v9287_v13 = vadd.f32 %v9034_v12, %v12909_v32  ;;  %v9036_v52 = vadd.f32 %v9035_v60, %v8993_v14 }
0x1777   :  { %v9037_v27 = vpop.f32.mrf.mxu1 }
0x1778   :  { %9293 = vst [vmem:[#allocation19 + $0x8] sm:$0xff] %v9287_v13  ;;  %v9289_v47 = vadd.f32 %v9036_v52, %v12916_v0  ;;  %v9038_v35 = vadd.f32 %v9037_v27, %v8995_v43  ;;  %v10347_v0 = vadd.f32 %v10346_v19, %v10345_v55 }
0x177a   :  { %9295 = vst [vmem:[#allocation19 + $0x18] sm:$0xff] %v9289_v47  ;;  %v9290_v50 = vadd.f32 %v9038_v35, %v12918_v62  ;;  %v9075_v18 = vadd.f32 %v10347_v0, %v7242_v7 }
0x177c   :  { %9296 = vst [vmem:[#allocation19 + $0x20] sm:$0xff] %v9290_v50 }
0x1782   :  { %v10389_v39 = vpop.f32.mrf.mxu0 }
0x1784   :  { %v10390_v45 = vpop.f32.mrf.mxu0 }
0x1785   :  { %v10391_v44 = vadd.f32 %v10390_v45, %v10389_v39 }
0x1786   :  { %v10392_v46 = vpop.f32.mrf.mxu0 }
0x1788   :  { %v10393_v49 = vpop.f32.mrf.mxu0 }
0x1789   :  { %v10394_v9 = vadd.f32 %v10393_v49, %v10392_v46 }
0x1791   :  { %v10367_v56 = vpop.f32.mrf.mxu1 }
0x1793   :  { %v10368_v20 = vpop.f32.mrf.mxu1 }
0x1794   :  { %v10369_v29 = vadd.f32 %v10368_v20, %v10367_v56 }
0x1795   :  { %v10370_v61 = vpop.f32.mrf.mxu1 }
0x1796   :  { %v9116_v33 = vadd.f32 %v10369_v29, %v9075_v18 }
0x1797   :  { %v10371_v32 = vpop.f32.mrf.mxu1 }
0x1798   :  { %v10372_v54 = vadd.f32 %v10371_v32, %v10370_v61  ;;  %v9157_v34 = vadd.f32 %v10391_v44, %v9116_v33 }
0x179a   :  { %v9119_v15 = vadd.f32 %v10372_v54, %v9078_v3 }
0x179c   :  { %v9160_v36 = vadd.f32 %v10394_v9, %v9119_v15 }
0x17a2   :  { %v10433_v62 = vpop.f32.mrf.mxu0 }
0x17a4   :  { %v10434_v58 = vpop.f32.mrf.mxu0 }
0x17a5   :  { %v10435_v6 = vadd.f32 %v10434_v58, %v10433_v62 }
0x17a6   :  { %v10436_v21 = vpop.f32.mrf.mxu0 }
0x17a8   :  { %v10437_v10 = vpop.f32.mrf.mxu0 }
0x17a9   :  { %v10438_v8 = vadd.f32 %v10437_v10, %v10436_v21 }
0x17b1   :  { %v10411_v22 = vpop.f32.mrf.mxu1 }
0x17b3   :  { %v10412_v17 = vpop.f32.mrf.mxu1 }
0x17b4   :  { %v10413_v51 = vadd.f32 %v10412_v17, %v10411_v22 }
0x17b5   :  { %v10414_v59 = vpop.f32.mrf.mxu1 }
0x17b6   :  { %v9198_v26 = vadd.f32 %v10413_v51, %v9157_v34 }
0x17b7   :  { %v10415_v31 = vpop.f32.mrf.mxu1 }
0x17b8   :  { %v10416_v48 = vadd.f32 %v10415_v31, %v10414_v59  ;;  %v9239_v38 = vadd.f32 %v10435_v6, %v9198_v26 }
0x17ba   :  { %v9201_v28 = vadd.f32 %v10416_v48, %v9160_v36 }
0x17bc   :  { %v9242_v40 = vadd.f32 %v10438_v8, %v9201_v28 }
0x17d1   :  { %v10455_v30 = vpop.f32.mrf.mxu1 }
0x17d3   :  { %v10456_v1 = vpop.f32.mrf.mxu1 }
0x17d4   :  { %v10457_v5 = vadd.f32 %v10456_v1, %v10455_v30 }
0x17d5   :  { %v10458_v25 = vpop.f32.mrf.mxu1 }
0x17d6   :  { %v9280_v11 = vadd.f32 %v10457_v5, %v9239_v38 }
0x17d7   :  { %v10459_v37 = vpop.f32.mrf.mxu1 }
0x17d8   :  { %v9288_v16 = vadd.f32 %v9280_v11, %v12912_v53  ;;  %v10460_v2 = vadd.f32 %v10459_v37, %v10458_v25 }
0x17da   :  { %9294 = vst [vmem:[#allocation19 + $0x10] sm:$0xff] %v9288_v16  ;;  %v9283_v41 = vadd.f32 %v10460_v2, %v9242_v40 }
0x17dc   :  { %v9291_v23 = vadd.f32 %v9283_v41, %v12921_v63 }
0x17de   :  { %9297 = vst [vmem:[#allocation19 + $0x28] sm:$0xff] %v9291_v23 }
0x17df   :  { %12217 = shalt.err (!%p12214_p12)
}
0x17e0   :  { %9309 = dma.vmem_to_hbm [thread:$0]  %s9304_s25, 768, %s13137_s10, [#allocation4], %s12247_s5, %s12247_s5, %s12248_s18  }
0x17e1   :  { %12238 = dma.done.wait [#allocation4], 768  }
0x17e2   :  { %12239 = vsyncadd [#allocation4], 4294966528 }
0x17e3   :  { %9313 = vsyncpa [#allocation3], 1 }
0x17e4   :  { %9314 = vsyncpa [#allocation6], 1 }
0x17e5   :  { %9315 = vsyncpa [#allocation9], 1 }
0x17e6   :  { %9316 = vsyncpa [#allocation12], 1 }
0x17e7   :  { %9317 = vsyncpa [#allocation15], 1 }
0x17e8   :  { %9318 = vsyncpa [#allocation18], 1 }
0x17e9   :  { %9319 = vsyncpa [#allocation4], 1 }

</bundles_post_ra>
